<compile_context>
chip_gen: v6e
topology: v6e:2x2x1
jax: 0.10.0
libtpu: 0.0.40
codegen_flags: <defaults>
</compile_context>

<pallas_src>
import jax
import jax.numpy as jnp
from jax.experimental import pallas as pl
from jax.experimental.pallas import tpu as pltpu

EPS = 1e-5          # BatchNorm2d default eps
LANE = 128          # TPU lane width; channel-padding target


def _round_up(x, m):
    return ((x + m - 1) // m) * m


def _vmem_budget():
    """Generation-aware scoped-VMEM budget (v7x: ~48 MiB, v5e/v6e: ~96 MiB)."""
    try:
        cap = pltpu.get_tpu_info().vmem_capacity_bytes
    except Exception:
        cap = 64 * 1024 * 1024
    return int(min(cap * 3 // 4, 100 * 1024 * 1024))


def _conv_step_bytes(th, W, cin_p, cout_p):
    """Conservative per-grid-step VMEM estimate for the tap-conv kernel."""
    bf2, f4 = 2, 4
    in_main = 2 * th * W * cin_p * bf2            # double-buffered main tile (bf16)
    in_halo = 2 * 2 * W * cin_p * bf2             # two 1-row halos, double buffered
    weights = 2 * 9 * cin_p * cout_p * bf2        # resident taps (counted 2x)
    scales = 4 * cin_p * f4
    out_y = 2 * th * W * cout_p * bf2             # bf16 output tile, double buffered
    out_st = 2 * 2 * cout_p * f4
    acc = th * W * cout_p * f4                    # f32 scratch accumulator
    tmp = ((th + 2) * (W + 2) * cin_p * bf2       # padded pre-activated tile
           + 2 * th * W * 3 * cin_p * bf2         # live dx-packed windows
           + th * W * cin_p * f4)                 # f32 pre-activation temps
    return in_main + in_halo + weights + scales + out_y + out_st + acc + tmp


def _pick_row_tile(H, W, cin_p, cout_p, N, budget):
    """Largest even divisor of H that fits the budget and keeps >= ~8 grid steps."""
    divisors = [d for d in range(2, H + 1, 2) if H % d == 0]
    fitting = [d for d in divisors
               if _conv_step_bytes(d, W, cin_p, cout_p) <= budget // 2]
    if not fitting:
        fitting = divisors[:1]
    good = [d for d in fitting if (H // d) >= 2 and N * (H // d) >= 8]
    if good:
        return max(good)
    good = [d for d in fitting if (H // d) >= 2]
    return max(good) if good else max(fitting)


# ----------------------------------------------------------------------------
# Pallas kernels
# ----------------------------------------------------------------------------
def _make_matmul_stats_kernel(th, W, kp, cout_p):
    """conv1 im2col path: one MXU matmul per row tile + per-tile BN partial
    statistics.  Output tile stored in bf16 (stats taken from the f32 result)."""

    def kernel(x_ref, w_ref, y_ref, st_ref):
        x = x_ref[0].reshape(th * W, kp)                               # bf16
        y = jnp.dot(x, w_ref[...], preferred_element_type=jnp.float32)
        st_ref[0, 0] = jnp.concatenate(
            [jnp.sum(y, axis=0, keepdims=True),
             jnp.sum(y * y, axis=0, keepdims=True)], axis=0)
        y_ref[...] = y.reshape(1, th, W, cout_p).astype(y_ref.dtype)

    return kernel


def _make_tap_conv_kernel(th, W, cin_p, cout_p, preact):
    """3x3 conv (padding=1) over an unpadded bf16 input read as a main row tile
    plus two clamped 1-row halo blocks.  Optionally fuses the previous layer's
    BatchNorm+ReLU as a pre-activation (applied once in f32, cast once to bf16).
    The three dx taps are packed channel-wise per dy so each of the 3 matmuls
    contracts K = 3*cin_p.  f32 accumulation in a VMEM scratch; bf16 output tile
    plus f32 per-tile BN partial statistics."""

    def kernel(*refs):
        if preact:
            (main_ref, top_ref, bot_ref, w_ref, s_ref, t_ref,
             y_ref, st_ref, acc_ref) = refs
        else:
            main_ref, top_ref, bot_ref, w_ref, y_ref, st_ref, acc_ref = refs

        i = pl.program_id(1)
        nt = pl.num_programs(1)

        if preact:
            s = s_ref[0]
            t = t_ref[0]

            def pre(v):
                return jnp.maximum(v * s + t, 0.0).astype(jnp.bfloat16)
        else:
            def pre(v):
                return v.astype(jnp.bfloat16)

        zrow = jnp.zeros((1, W, cin_p), jnp.bfloat16)
        a_mid = pre(main_ref[0])                                      # (th, W, cin_p)
        a_top = jnp.where(i > 0, pre(top_ref[0]), zrow)               # image border -> 0
        a_bot = jnp.where(i < nt - 1, pre(bot_ref[0]), zrow)

        rows = jnp.concatenate([a_top, a_mid, a_bot], axis=0)         # (th+2, W, cin_p)
        zcol = jnp.zeros((th + 2, 1, cin_p), jnp.bfloat16)
        xp = jnp.concatenate([zcol, rows, zcol], axis=1)              # (th+2, W+2, cin_p)

        for dy in range(3):
            win = jnp.concatenate(
                [xp[dy:dy + th, 0:W, :],
                 xp[dy:dy + th, 1:W + 1, :],
                 xp[dy:dy + th, 2:W + 2, :]], axis=-1)                # (th, W, 3*cin_p)
            win = win.reshape(th * W, 3 * cin_p)
            part = jnp.dot(win, w_ref[dy], preferred_element_type=jnp.float32)
            if dy == 0:
                acc_ref[...] = part
            else:
                acc_ref[...] += part

        y = acc_ref[...]                                              # (th*W, cout_p) f32
        st_ref[0, 0] = jnp.concatenate(
            [jnp.sum(y, axis=0, keepdims=True),
             jnp.sum(y * y, axis=0, keepdims=True)], axis=0)
        y_ref[...] = y.reshape(1, th, W, cout_p).astype(y_ref.dtype)

    return kernel


def _make_bn_relu_pool_kernel(th, W, cp):
    """BN-apply (y*s + t) + ReLU + fused 2x2 MaxPool over the same VMEM tile."""

    def kernel(y_ref, s_ref, t_ref, a_ref, p_ref):
        a = jnp.maximum(y_ref[0] * s_ref[0] + t_ref[0], 0.0)          # (th, W, cp) f32
        a_ref[...] = a.reshape(1, th, W, cp)
        # 2x2 max pool, stride 2 (th and W are even).
        ah = a.reshape(th // 2, 2, W, cp)
        rmax = jnp.maximum(ah[:, 0], ah[:, 1])                        # (th//2, W, cp)
        cw = rmax.reshape(th // 2, W // 2, 2, cp)
        p = jnp.maximum(cw[:, :, 0, :], cw[:, :, 1, :])               # (th//2, W//2, cp)
        p_ref[...] = p.reshape(1, th // 2, W // 2, cp)

    return kernel


# ----------------------------------------------------------------------------
# pallas_call wrappers
# ----------------------------------------------------------------------------
def _conv1_im2col(x_im, w_mat, *, H, W, th, cout_p, vmem_limit):
    N = x_im.shape[0]
    kp = x_im.shape[-1]
    nt = H // th
    kernel = _make_matmul_stats_kernel(th, W, kp, cout_p)
    return pl.pallas_call(
        kernel,
        out_shape=(jax.ShapeDtypeStruct((N, H, W, cout_p), jnp.bfloat16),
                   jax.ShapeDtypeStruct((N, nt, 2, cout_p), jnp.float32)),
        grid=(N, nt),
        in_specs=[
            pl.BlockSpec((1, th, W, kp), lambda n, i: (n, i, 0, 0)),
            pl.BlockSpec((kp, cout_p), lambda n, i: (0, 0)),
        ],
        out_specs=(
            pl.BlockSpec((1, th, W, cout_p), lambda n, i: (n, i, 0, 0)),
            pl.BlockSpec((1, 1, 2, cout_p), lambda n, i: (n, i, 0, 0)),
        ),
        compiler_params=pltpu.CompilerParams(
            dimension_semantics=("parallel", "parallel"),
            vmem_limit_bytes=vmem_limit),
    )(x_im, w_mat)


def _conv3x3_tap(x_bf16, w_taps, pre_s=None, pre_t=None, *, H, W, th, vmem_limit):
    """x_bf16: (N, H, W, cin_p) bf16, spatially unpadded.
    w_taps: (3, 3*cin_p, cout_p) bf16, rows within each dy ordered (dx, ci).
    Returns bf16 conv output and f32 per-row-tile BN partial statistics."""
    N, _, _, cin_p = x_bf16.shape
    cout_p = w_taps.shape[-1]
    nt = H // th
    preact = pre_s is not None
    kernel = _make_tap_conv_kernel(th, W, cin_p, cout_p, preact)

    in_specs = [
        pl.BlockSpec((1, th, W, cin_p), lambda n, i: (n, i, 0, 0)),
        # clamped 1-row halos (boundary rows are zeroed in-kernel)
        pl.BlockSpec((1, 1, W, cin_p),
                     lambda n, i: (n, jnp.maximum(i * th - 1, 0), 0, 0)),
        pl.BlockSpec((1, 1, W, cin_p),
                     lambda n, i: (n, jnp.minimum((i + 1) * th, H - 1), 0, 0)),
        pl.BlockSpec((3, 3 * cin_p, cout_p), lambda n, i: (0, 0, 0)),
    ]
    args = [x_bf16, x_bf16, x_bf16, w_taps]
    if preact:
        in_specs += [pl.BlockSpec((1, cin_p), lambda n, i: (0, 0))] * 2
        args += [pre_s.reshape(1, cin_p), pre_t.reshape(1, cin_p)]

    return pl.pallas_call(
        kernel,
        out_shape=(jax.ShapeDtypeStruct((N, H, W, cout_p), jnp.bfloat16),
                   jax.ShapeDtypeStruct((N, nt, 2, cout_p), jnp.float32)),
        grid=(N, nt),
        in_specs=in_specs,
        out_specs=(
            pl.BlockSpec((1, th, W, cout_p), lambda n, i: (n, i, 0, 0)),
            pl.BlockSpec((1, 1, 2, cout_p), lambda n, i: (n, i, 0, 0)),
        ),
        scratch_shapes=[pltpu.VMEM((th * W, cout_p), jnp.float32)],
        compiler_params=pltpu.CompilerParams(
            dimension_semantics=("parallel", "parallel"),
            vmem_limit_bytes=vmem_limit),
    )(*args)


def _bn_relu_pool(y, s, t, *, th, vmem_limit):
    N, H, W, cp = y.shape
    nt = H // th
    kernel = _make_bn_relu_pool_kernel(th, W, cp)
    return pl.pallas_call(
        kernel,
        out_shape=(jax.ShapeDtypeStruct((N, H, W, cp), jnp.float32),
                   jax.ShapeDtypeStruct((N, H // 2, W // 2, cp), jnp.float32)),
        grid=(N, nt),
        in_specs=[
            pl.BlockSpec((1, th, W, cp), lambda n, i: (n, i, 0, 0)),
            pl.BlockSpec((1, cp), lambda n, i: (0, 0)),
            pl.BlockSpec((1, cp), lambda n, i: (0, 0)),
        ],
        out_specs=(
            pl.BlockSpec((1, th, W, cp), lambda n, i: (n, i, 0, 0)),
            pl.BlockSpec((1, th // 2, W // 2, cp), lambda n, i: (n, i, 0, 0)),
        ),
        compiler_params=pltpu.CompilerParams(
            dimension_semantics=("parallel", "parallel"),
            vmem_limit_bytes=vmem_limit),
    )(y, s.reshape(1, cp), t.reshape(1, cp))


# ----------------------------------------------------------------------------
# Parameter / input preparation (tiny XLA-side plumbing)
# ----------------------------------------------------------------------------
def _bn_scale_shift(stats, gamma_p, beta_p, count):
    """Exact train-mode BatchNorm (biased variance) from per-tile partial sums,
    folded into per-channel scale/shift."""
    ssum = jnp.sum(stats[:, :, 0, :], axis=(0, 1))
    ssq = jnp.sum(stats[:, :, 1, :], axis=(0, 1))
    mean = ssum / count
    var = jnp.maximum(ssq / count - mean * mean, 0.0)
    s = gamma_p * jax.lax.rsqrt(var + EPS)
    t = beta_p - mean * s
    return s, t


def _prep_w_im2col(w, kp, cout_p):
    # (Cout, Cin, 3, 3) -> rows ordered (dy, dx, ci), K-padded to kp, bf16.
    cout, cin = w.shape[0], w.shape[1]
    wm = jnp.transpose(w, (2, 3, 1, 0)).reshape(9 * cin, cout)
    wm = jnp.pad(wm, ((0, kp - 9 * cin), (0, cout_p - cout)))
    return wm.astype(jnp.bfloat16)


def _prep_w_taps(w, cin_p, cout_p):
    # (Cout, Cin, 3, 3) -> (3 [dy], 3*cin_p [dx, ci], cout_p), bf16.
    cout, cin = w.shape[0], w.shape[1]
    wt = jnp.transpose(w, (2, 3, 1, 0))                       # (dy, dx, ci, co)
    wt = jnp.pad(wt, ((0, 0), (0, 0), (0, cin_p - cin), (0, cout_p - cout)))
    return wt.reshape(3, 3 * cin_p, cout_p).astype(jnp.bfloat16)


def _im2col_3x3(x, kp):
    """x: (N, H, W, cin) f32 with 9*cin <= kp.  Returns (N, H, W, kp) bf16
    with channel order (dy, dx, ci) matching _prep_w_im2col."""
    N, H, W, cin = x.shape
    xp = jnp.pad(x, ((0, 0), (1, 1), (1, 1), (0, 0)))
    cols = [xp[:, dy:dy + H, dx:dx + W, :] for dy in range(3) for dx in range(3)]
    xi = jnp.concatenate(cols, axis=-1)
    xi = jnp.pad(xi, ((0, 0), (0, 0), (0, 0), (0, kp - 9 * cin)))
    return xi.astype(jnp.bfloat16)


def _pad_vec(v, size):
    return jnp.pad(v.astype(jnp.float32), (0, size - v.shape[0]))


# ----------------------------------------------------------------------------
# EncoderBlock forward
# ----------------------------------------------------------------------------
def encoder_block_forward(x_nchw, params, *, row_tile=None):
    """EncoderBlock forward.  x_nchw: (N, Cin, H, W) f32.  Returns (x, pool) NCHW."""
    x = jnp.transpose(x_nchw, (0, 2, 3, 1)).astype(jnp.float32)       # NHWC
    N, H, W, cin = x.shape
    assert H % 2 == 0 and W % 2 == 0, "even spatial dims expected for MaxPool2d(2)"
    # TODO(synk): odd H/W (floor-mode pooling) and H without an even divisor
    # row tile would need masked tail handling.
    cout = params["conv1_w"].shape[0]
    cin_p = _round_up(cin, LANE)
    cout_p = _round_up(cout, LANE)

    vmem_limit = _vmem_budget()
    if row_tile is None:
        th = _pick_row_tile(H, W, max(cin_p, cout_p), cout_p, N, vmem_limit)
    else:
        th = max(d for d in range(2, max(row_tile, 2) + 1, 2) if H % d == 0)

    # Conv biases are intentionally dropped: a conv bias followed immediately by
    # train-mode BatchNorm is absorbed by the batch mean (no effect on outputs).

    # ---- conv1 ---------------------------------------------------------------
    if 9 * cin <= LANE:
        # True im2col along K for the tiny-cin stem: one matmul per tile.
        kp = _round_up(9 * cin, LANE)
        x_im = _im2col_3x3(x, kp)
        w1 = _prep_w_im2col(params["conv1_w"], kp, cout_p)
        y1, st1 = _conv1_im2col(x_im, w1, H=H, W=W, th=th, cout_p=cout_p,
                                vmem_limit=vmem_limit)
    else:
        x_b = jnp.pad(x, ((0, 0), (0, 0), (0, 0), (0, cin_p - cin))).astype(jnp.bfloat16)
        w1 = _prep_w_taps(params["conv1_w"], cin_p, cout_p)
        y1, st1 = _conv3x3_tap(x_b, w1, H=H, W=W, th=th, vmem_limit=vmem_limit)
    s1, t1 = _bn_scale_shift(st1, _pad_vec(params["bn1_g"], cout_p),
                             _pad_vec(params["bn1_b"], cout_p), N * H * W)

    # ---- conv2 (BN1 + ReLU1 fused as the pre-activation; no re-pad pass) ------
    w2 = _prep_w_taps(params["conv2_w"], cout_p, cout_p)
    y2, st2 = _conv3x3_tap(y1, w2, pre_s=s1, pre_t=t1, H=H, W=W, th=th,
                           vmem_limit=vmem_limit)
    s2, t2 = _bn_scale_shift(st2, _pad_vec(params["bn2_g"], cout_p),
                             _pad_vec(params["bn2_b"], cout_p), N * H * W)

    # ---- BN2 + ReLU2 + 2x2 MaxPool in one fused pass --------------------------
    a_p, pool_p = _bn_relu_pool(y2, s2, t2, th=th, vmem_limit=vmem_limit)
    a = a_p[..., :cout]
    pool = pool_p[..., :cout]
    return jnp.transpose(a, (0, 3, 1, 2)), jnp.transpose(pool, (0, 3, 1, 2))


def init_params(key, inputs, outputs):
    ks = jax.random.split(key, 4)
    return {
        "conv1_w": 0.1 * jax.random.normal(ks[0], (outputs, inputs, 3, 3), jnp.float32),
        "conv1_b": 0.1 * jax.random.normal(ks[1], (outputs,), jnp.float32),
        "bn1_g": jnp.ones((outputs,), jnp.float32),
        "bn1_b": jnp.zeros((outputs,), jnp.float32),
        "conv2_w": 0.1 * jax.random.normal(ks[2], (outputs, outputs, 3, 3), jnp.float32),
        "conv2_b": 0.1 * jax.random.normal(ks[3], (outputs,), jnp.float32),
        "bn2_g": jnp.ones((outputs,), jnp.float32),
        "bn2_b": jnp.zeros((outputs,), jnp.float32),
    }


def _reference_forward(x_nchw, params):
    """Pure-JAX (XLA) f32 reference of the PyTorch EncoderBlock forward."""
    def conv_bn_relu(x, w, b, g, bt):
        y = jax.lax.conv_general_dilated(
            x, w, (1, 1), ((1, 1), (1, 1)),
            dimension_numbers=("NCHW", "OIHW", "NCHW")) + b[None, :, None, None]
        mean = jnp.mean(y, axis=(0, 2, 3), keepdims=True)
        var = jnp.mean((y - mean) ** 2, axis=(0, 2, 3), keepdims=True)
        yh = (y - mean) * jax.lax.rsqrt(var + EPS)
        return jnp.maximum(yh * g[None, :, None, None] + bt[None, :, None, None], 0.0)

    a = conv_bn_relu(x_nchw, params["conv1_w"], params["conv1_b"],
                     params["bn1_g"], params["bn1_b"])
    a = conv_bn_relu(a, params["conv2_w"], params["conv2_b"],
                     params["bn2_g"], params["bn2_b"])
    pool = jnp.maximum(
        jnp.maximum(a[:, :, 0::2, 0::2], a[:, :, 0::2, 1::2]),
        jnp.maximum(a[:, :, 1::2, 0::2], a[:, :, 1::2, 1::2]),
    )
    return a, pool


if __name__ == "__main__":
    inputs, outputs = 4, 8
    N, H, W = 2, 32, 32
    key = jax.random.PRNGKey(0)
    k_x, k_p = jax.random.split(key)
    x = jax.random.normal(k_x, (N, inputs, H, W), jnp.float32)         # NCHW
    params = init_params(k_p, inputs, outputs)

    fwd = jax.jit(encoder_block_forward)
    x_out, pool_out = fwd(x, params)
    x_out, pool_out = jax.block_until_ready((x_out, pool_out))

    assert x_out.shape == (N, outputs, H, W), x_out.shape
    assert pool_out.shape == (N, outputs, H // 2, W // 2), pool_out.shape
    assert bool(jnp.all(jnp.isfinite(x_out)))
    assert bool(jnp.all(jnp.isfinite(pool_out)))

    # Loose tolerance: the Pallas path feeds the MXU with bf16 operands and
    # stores the inter-conv intermediates in bf16; the reference is pure f32.
    ref_x, ref_pool = _reference_forward(x, params)
    err = max(float(jnp.max(jnp.abs(x_out - ref_x))),
              float(jnp.max(jnp.abs(pool_out - ref_pool))))
    assert err < 0.3, f"max abs error vs f32 reference too large: {err}"

    print("KERNEL_OK")
</pallas_src>

<mosaic_0001>
module attributes {stable_mosaic.version = 11 : i64} {
  func.func @kernel(%arg0: i32, %arg1: i32, %arg2: memref<1x8x32x128xbf16, #tpu.memory_space<vmem>>, %arg3: memref<128x128xbf16, #tpu.memory_space<vmem>>, %arg4: memref<1x8x32x128xbf16, #tpu.memory_space<vmem>>, %arg5: memref<1x1x2x128xf32, #tpu.memory_space<vmem>>) attributes {dimension_semantics = [#tpu.dimension_semantics<parallel>, #tpu.dimension_semantics<parallel>], iteration_bounds = array<i64: 2, 4>, scalar_prefetch = 0 : i64, scratch_operands = 0 : i64, tpu.core_type = #tpu.core_type<tc>, window_params = [{transform_indices = @transform_0, window_bounds = array<i64: 1, 8, 32, 128>}, {pipeline_mode = #tpu.pipeline_mode<synchronous>, transform_indices = @transform_1, window_bounds = array<i64: 128, 128>}, {transform_indices = @transform_2, window_bounds = array<i64: 1, 8, 32, 128>}, {transform_indices = @transform_3, window_bounds = array<i64: 1, 1, 2, 128>}]} {
    %c0 = arith.constant 0 : index
    %c0_0 = arith.constant 0 : index
    %c0_1 = arith.constant 0 : index
    %c0_2 = arith.constant 0 : index
    %0 = vector.load %arg2[%c0, %c0_0, %c0_1, %c0_2] : memref<1x8x32x128xbf16, #tpu.memory_space<vmem>>, vector<1x8x32x128xbf16>
    %1 = vector.shape_cast %0 : vector<1x8x32x128xbf16> to vector<8x32x128xbf16>
    %2 = vector.shape_cast %1 : vector<8x32x128xbf16> to vector<256x128xbf16>
    %c0_3 = arith.constant 0 : index
    %c0_4 = arith.constant 0 : index
    %3 = vector.load %arg3[%c0_3, %c0_4] : memref<128x128xbf16, #tpu.memory_space<vmem>>, vector<128x128xbf16>
    %cst = arith.constant dense<0.000000e+00> : vector<256x128xf32>
    %4 = tpu.matmul %2, %3, %cst {dimension_numbers = #tpu.dot_dimension_numbers<[1], [0], [0], [1], [0, 0, 1, 1], [], []>} : vector<256x128xbf16>, vector<128x128xbf16>, vector<256x128xf32> -> vector<256x128xf32>
    %cst_5 = arith.constant dense<0.000000e+00> : vector<128xf32>
    %5 = vector.multi_reduction <add>, %4, %cst_5 [0] : vector<256x128xf32> to vector<128xf32>
    %6 = vector.shape_cast %5 : vector<128xf32> to vector<1x128xf32>
    %7 = arith.mulf %4, %4 : vector<256x128xf32>
    %cst_6 = arith.constant dense<0.000000e+00> : vector<128xf32>
    %8 = vector.multi_reduction <add>, %7, %cst_6 [0] : vector<256x128xf32> to vector<128xf32>
    %9 = vector.shape_cast %8 : vector<128xf32> to vector<1x128xf32>
    %10 = tpu.concatenate %6, %9 in 0 : vector<1x128xf32>, vector<1x128xf32> -> vector<2x128xf32>
    %c0_7 = arith.constant 0 : index
    %c0_8 = arith.constant 0 : index
    %c0_9 = arith.constant 0 : index
    %c0_10 = arith.constant 0 : index
    %11 = vector.load %arg5[%c0_7, %c0_8, %c0_9, %c0_10] : memref<1x1x2x128xf32, #tpu.memory_space<vmem>>, vector<1x1x2x128xf32>
    %12 = vector.shape_cast %11 : vector<1x1x2x128xf32> to vector<2x128xf32>
    %13 = vector.shape_cast %10 : vector<2x128xf32> to vector<1x1x2x128xf32>
    tpu.vector_store %arg5[%c0_7, %c0_8, %c0_9, %c0_10], %13 {strides = array<i32>} : memref<1x1x2x128xf32, #tpu.memory_space<vmem>>, vector<1x1x2x128xf32>,
    %14 = vector.shape_cast %4 : vector<256x128xf32> to vector<1x8x32x128xf32>
    %15 = arith.truncf %14 : vector<1x8x32x128xf32> to vector<1x8x32x128xbf16>
    %c0_11 = arith.constant 0 : index
    %c0_12 = arith.constant 0 : index
    %c0_13 = arith.constant 0 : index
    %c0_14 = arith.constant 0 : index
    %16 = vector.load %arg4[%c0_11, %c0_12, %c0_13, %c0_14] : memref<1x8x32x128xbf16, #tpu.memory_space<vmem>>, vector<1x8x32x128xbf16>
    tpu.vector_store %arg4[%c0_11, %c0_12, %c0_13, %c0_14], %15 {strides = array<i32>} : memref<1x8x32x128xbf16, #tpu.memory_space<vmem>>, vector<1x8x32x128xbf16>,
    return
  }
  func.func @transform_0(%arg0: i32, %arg1: i32) -> (i32, i32, i32, i32) {
    %c0_i32 = arith.constant 0 : i32
    %c0_i32_0 = arith.constant 0 : i32
    %c0_i32_1 = arith.constant 0 : i32
    return %arg0, %arg1, %c0_i32, %c0_i32_0 : i32, i32, i32, i32
  }
  func.func @transform_1(%arg0: i32, %arg1: i32) -> (i32, i32) {
    %c0_i32 = arith.constant 0 : i32
    %c0_i32_0 = arith.constant 0 : i32
    %c0_i32_1 = arith.constant 0 : i32
    return %c0_i32, %c0_i32_0 : i32, i32
  }
  func.func @transform_2(%arg0: i32, %arg1: i32) -> (i32, i32, i32, i32) {
    %c0_i32 = arith.constant 0 : i32
    %c0_i32_0 = arith.constant 0 : i32
    %c0_i32_1 = arith.constant 0 : i32
    return %arg0, %arg1, %c0_i32, %c0_i32_0 : i32, i32, i32, i32
  }
  func.func @transform_3(%arg0: i32, %arg1: i32) -> (i32, i32, i32, i32) {
    %c0_i32 = arith.constant 0 : i32
    %c0_i32_0 = arith.constant 0 : i32
    %c0_i32_1 = arith.constant 0 : i32
    return %arg0, %arg1, %c0_i32, %c0_i32_0 : i32, i32, i32, i32
  }
}

module attributes {stable_mosaic.version = 11 : i64} {
  func.func @kernel(%arg0: i32, %arg1: i32, %arg2: memref<1x8x32x128xbf16, #tpu.memory_space<vmem>>, %arg3: memref<1x1x32x128xbf16, #tpu.memory_space<vmem>>, %arg4: memref<1x1x32x128xbf16, #tpu.memory_space<vmem>>, %arg5: memref<3x384x128xbf16, #tpu.memory_space<vmem>>, %arg6: memref<1x128xf32, #tpu.memory_space<vmem>>, %arg7: memref<1x128xf32, #tpu.memory_space<vmem>>, %arg8: memref<1x8x32x128xbf16, #tpu.memory_space<vmem>>, %arg9: memref<1x1x2x128xf32, #tpu.memory_space<vmem>>, %arg10: memref<256x128xf32, #tpu.memory_space<vmem>>) attributes {dimension_semantics = [#tpu.dimension_semantics<parallel>, #tpu.dimension_semantics<parallel>], iteration_bounds = array<i64: 2, 4>, scalar_prefetch = 0 : i64, scratch_operands = 1 : i64, tpu.core_type = #tpu.core_type<tc>, window_params = [{transform_indices = @transform_0, window_bounds = array<i64: 1, 8, 32, 128>}, {transform_indices = @transform_1, window_bounds = array<i64: 1, 1, 32, 128>}, {transform_indices = @transform_2, window_bounds = array<i64: 1, 1, 32, 128>}, {pipeline_mode = #tpu.pipeline_mode<synchronous>, transform_indices = @transform_3, window_bounds = array<i64: 3, 384, 128>}, {pipeline_mode = #tpu.pipeline_mode<synchronous>, transform_indices = @transform_4, window_bounds = array<i64: 1, 128>}, {pipeline_mode = #tpu.pipeline_mode<synchronous>, transform_indices = @transform_5, window_bounds = array<i64: 1, 128>}, {transform_indices = @transform_6, window_bounds = array<i64: 1, 8, 32, 128>}, {transform_indices = @transform_7, window_bounds = array<i64: 1, 1, 2, 128>}]} {
    %c0 = arith.constant 0 : index
    %c0_0 = arith.constant 0 : index
    %0 = vector.load %arg6[%c0, %c0_0] : memref<1x128xf32, #tpu.memory_space<vmem>>, vector<1x128xf32>
    %1 = vector.shape_cast %0 : vector<1x128xf32> to vector<128xf32>
    %c0_1 = arith.constant 0 : index
    %c0_2 = arith.constant 0 : index
    %2 = vector.load %arg7[%c0_1, %c0_2] : memref<1x128xf32, #tpu.memory_space<vmem>>, vector<1x128xf32>
    %3 = vector.shape_cast %2 : vector<1x128xf32> to vector<128xf32>
    %cst = arith.constant 0.000000e+00 : bf16
    %4 = vector.broadcast %cst : bf16 to vector<1x32x128xbf16>
    %c0_3 = arith.constant 0 : index
    %c0_4 = arith.constant 0 : index
    %c0_5 = arith.constant 0 : index
    %c0_6 = arith.constant 0 : index
    %5 = vector.load %arg2[%c0_3, %c0_4, %c0_5, %c0_6] : memref<1x8x32x128xbf16, #tpu.memory_space<vmem>>, vector<1x8x32x128xbf16>
    %6 = vector.shape_cast %5 : vector<1x8x32x128xbf16> to vector<8x32x128xbf16>
    %7 = arith.extf %6 : vector<8x32x128xbf16> to vector<8x32x128xf32>
    %8 = vector.shape_cast %1 : vector<128xf32> to vector<1x1x128xf32>
    %9 = vector.broadcast %8 : vector<1x1x128xf32> to vector<8x32x128xf32>
    %10 = arith.mulf %7, %9 : vector<8x32x128xf32>
    %11 = vector.shape_cast %3 : vector<128xf32> to vector<1x1x128xf32>
    %12 = vector.broadcast %11 : vector<1x1x128xf32> to vector<8x32x128xf32>
    %13 = arith.addf %10, %12 : vector<8x32x128xf32>
    %cst_7 = arith.constant 0.000000e+00 : f32
    %14 = vector.broadcast %cst_7 : f32 to vector<8x32x128xf32>
    %15 = arith.maximumf %13, %14 : vector<8x32x128xf32>
    %16 = arith.truncf %15 : vector<8x32x128xf32> to vector<8x32x128xbf16>
    %c0_i32 = arith.constant 0 : i32
    %17 = arith.cmpi sgt, %arg1, %c0_i32 : i32
    %c0_8 = arith.constant 0 : index
    %c0_9 = arith.constant 0 : index
    %c0_10 = arith.constant 0 : index
    %c0_11 = arith.constant 0 : index
    %18 = vector.load %arg3[%c0_8, %c0_9, %c0_10, %c0_11] : memref<1x1x32x128xbf16, #tpu.memory_space<vmem>>, vector<1x1x32x128xbf16>
    %19 = vector.shape_cast %18 : vector<1x1x32x128xbf16> to vector<1x32x128xbf16>
    %20 = arith.extf %19 : vector<1x32x128xbf16> to vector<1x32x128xf32>
    %21 = vector.shape_cast %1 : vector<128xf32> to vector<1x1x128xf32>
    %22 = vector.broadcast %21 : vector<1x1x128xf32> to vector<1x32x128xf32>
    %23 = arith.mulf %20, %22 : vector<1x32x128xf32>
    %24 = vector.shape_cast %3 : vector<128xf32> to vector<1x1x128xf32>
    %25 = vector.broadcast %24 : vector<1x1x128xf32> to vector<1x32x128xf32>
    %26 = arith.addf %23, %25 : vector<1x32x128xf32>
    %cst_12 = arith.constant 0.000000e+00 : f32
    %27 = vector.broadcast %cst_12 : f32 to vector<1x32x128xf32>
    %28 = arith.maximumf %26, %27 : vector<1x32x128xf32>
    %29 = arith.truncf %28 : vector<1x32x128xf32> to vector<1x32x128xbf16>
    %30 = arith.select %17, %29, %4 : vector<1x32x128xbf16>
    %c3_i32 = arith.constant 3 : i32
    %31 = arith.cmpi slt, %arg1, %c3_i32 : i32
    %c0_13 = arith.constant 0 : index
    %c0_14 = arith.constant 0 : index
    %c0_15 = arith.constant 0 : index
    %c0_16 = arith.constant 0 : index
    %32 = vector.load %arg4[%c0_13, %c0_14, %c0_15, %c0_16] : memref<1x1x32x128xbf16, #tpu.memory_space<vmem>>, vector<1x1x32x128xbf16>
    %33 = vector.shape_cast %32 : vector<1x1x32x128xbf16> to vector<1x32x128xbf16>
    %34 = arith.extf %33 : vector<1x32x128xbf16> to vector<1x32x128xf32>
    %35 = vector.shape_cast %1 : vector<128xf32> to vector<1x1x128xf32>
    %36 = vector.broadcast %35 : vector<1x1x128xf32> to vector<1x32x128xf32>
    %37 = arith.mulf %34, %36 : vector<1x32x128xf32>
    %38 = vector.shape_cast %3 : vector<128xf32> to vector<1x1x128xf32>
    %39 = vector.broadcast %38 : vector<1x1x128xf32> to vector<1x32x128xf32>
    %40 = arith.addf %37, %39 : vector<1x32x128xf32>
    %cst_17 = arith.constant 0.000000e+00 : f32
    %41 = vector.broadcast %cst_17 : f32 to vector<1x32x128xf32>
    %42 = arith.maximumf %40, %41 : vector<1x32x128xf32>
    %43 = arith.truncf %42 : vector<1x32x128xf32> to vector<1x32x128xbf16>
    %44 = arith.select %31, %43, %4 : vector<1x32x128xbf16>
    %45 = tpu.concatenate %30, %16, %44 in 0 : vector<1x32x128xbf16>, vector<8x32x128xbf16>, vector<1x32x128xbf16> -> vector<10x32x128xbf16>
    %cst_18 = arith.constant 0.000000e+00 : bf16
    %46 = vector.broadcast %cst_18 : bf16 to vector<10x1x128xbf16>
    %47 = tpu.concatenate %46, %45, %46 in 1 : vector<10x1x128xbf16>, vector<10x32x128xbf16>, vector<10x1x128xbf16> -> vector<10x34x128xbf16>
    %48 = vector.extract_strided_slice %47 {offsets = [0, 0, 0], sizes = [8, 32, 128], strides = [1, 1, 1]} : vector<10x34x128xbf16> to vector<8x32x128xbf16>
    %49 = vector.extract_strided_slice %47 {offsets = [0, 1, 0], sizes = [8, 32, 128], strides = [1, 1, 1]} : vector<10x34x128xbf16> to vector<8x32x128xbf16>
    %50 = vector.extract_strided_slice %47 {offsets = [0, 2, 0], sizes = [8, 32, 128], strides = [1, 1, 1]} : vector<10x34x128xbf16> to vector<8x32x128xbf16>
    %51 = tpu.concatenate %48, %49, %50 in 2 : vector<8x32x128xbf16>, vector<8x32x128xbf16>, vector<8x32x128xbf16> -> vector<8x32x384xbf16>
    %52 = vector.shape_cast %51 : vector<8x32x384xbf16> to vector<256x384xbf16>
    %c0_19 = arith.constant 0 : index
    %c0_20 = arith.constant 0 : index
    %c0_21 = arith.constant 0 : index
    %53 = vector.load %arg5[%c0_19, %c0_20, %c0_21] : memref<3x384x128xbf16, #tpu.memory_space<vmem>>, vector<1x384x128xbf16>
    %54 = vector.shape_cast %53 : vector<1x384x128xbf16> to vector<384x128xbf16>
    %cst_22 = arith.constant dense<0.000000e+00> : vector<256x128xf32>
    %55 = tpu.matmul %52, %54, %cst_22 {dimension_numbers = #tpu.dot_dimension_numbers<[1], [0], [0], [1], [0, 0, 1, 1], [], []>} : vector<256x384xbf16>, vector<384x128xbf16>, vector<256x128xf32> -> vector<256x128xf32>
    %c0_23 = arith.constant 0 : index
    %c0_24 = arith.constant 0 : index
    %56 = vector.load %arg10[%c0_23, %c0_24] : memref<256x128xf32, #tpu.memory_space<vmem>>, vector<256x128xf32>
    tpu.vector_store %arg10[%c0_23, %c0_24], %55 {strides = array<i32>} : memref<256x128xf32, #tpu.memory_space<vmem>>, vector<256x128xf32>,
    %57 = vector.extract_strided_slice %47 {offsets = [1, 0, 0], sizes = [8, 32, 128], strides = [1, 1, 1]} : vector<10x34x128xbf16> to vector<8x32x128xbf16>
    %58 = vector.extract_strided_slice %47 {offsets = [1, 1, 0], sizes = [8, 32, 128], strides = [1, 1, 1]} : vector<10x34x128xbf16> to vector<8x32x128xbf16>
    %59 = vector.extract_strided_slice %47 {offsets = [1, 2, 0], sizes = [8, 32, 128], strides = [1, 1, 1]} : vector<10x34x128xbf16> to vector<8x32x128xbf16>
    %60 = tpu.concatenate %57, %58, %59 in 2 : vector<8x32x128xbf16>, vector<8x32x128xbf16>, vector<8x32x128xbf16> -> vector<8x32x384xbf16>
    %61 = vector.shape_cast %60 : vector<8x32x384xbf16> to vector<256x384xbf16>
    %c1 = arith.constant 1 : index
    %c0_25 = arith.constant 0 : index
    %c0_26 = arith.constant 0 : index
    %62 = vector.load %arg5[%c1, %c0_25, %c0_26] : memref<3x384x128xbf16, #tpu.memory_space<vmem>>, vector<1x384x128xbf16>
    %63 = vector.shape_cast %62 : vector<1x384x128xbf16> to vector<384x128xbf16>
    %cst_27 = arith.constant dense<0.000000e+00> : vector<256x128xf32>
    %64 = tpu.matmul %61, %63, %cst_27 {dimension_numbers = #tpu.dot_dimension_numbers<[1], [0], [0], [1], [0, 0, 1, 1], [], []>} : vector<256x384xbf16>, vector<384x128xbf16>, vector<256x128xf32> -> vector<256x128xf32>
    %c0_28 = arith.constant 0 : index
    %c0_29 = arith.constant 0 : index
    %65 = vector.load %arg10[%c0_28, %c0_29] : memref<256x128xf32, #tpu.memory_space<vmem>>, vector<256x128xf32>
    %66 = arith.addf %65, %64 : vector<256x128xf32>
    %c0_30 = arith.constant 0 : index
    %c0_31 = arith.constant 0 : index
    %67 = vector.load %arg10[%c0_30, %c0_31] : memref<256x128xf32, #tpu.memory_space<vmem>>, vector<256x128xf32>
    tpu.vector_store %arg10[%c0_30, %c0_31], %66 {strides = array<i32>} : memref<256x128xf32, #tpu.memory_space<vmem>>, vector<256x128xf32>,
    %68 = vector.extract_strided_slice %47 {offsets = [2, 0, 0], sizes = [8, 32, 128], strides = [1, 1, 1]} : vector<10x34x128xbf16> to vector<8x32x128xbf16>
    %69 = vector.extract_strided_slice %47 {offsets = [2, 1, 0], sizes = [8, 32, 128], strides = [1, 1, 1]} : vector<10x34x128xbf16> to vector<8x32x128xbf16>
    %70 = vector.extract_strided_slice %47 {offsets = [2, 2, 0], sizes = [8, 32, 128], strides = [1, 1, 1]} : vector<10x34x128xbf16> to vector<8x32x128xbf16>
    %71 = tpu.concatenate %68, %69, %70 in 2 : vector<8x32x128xbf16>, vector<8x32x128xbf16>, vector<8x32x128xbf16> -> vector<8x32x384xbf16>
    %72 = vector.shape_cast %71 : vector<8x32x384xbf16> to vector<256x384xbf16>
    %c2 = arith.constant 2 : index
    %c0_32 = arith.constant 0 : index
    %c0_33 = arith.constant 0 : index
    %73 = vector.load %arg5[%c2, %c0_32, %c0_33] : memref<3x384x128xbf16, #tpu.memory_space<vmem>>, vector<1x384x128xbf16>
    %74 = vector.shape_cast %73 : vector<1x384x128xbf16> to vector<384x128xbf16>
    %cst_34 = arith.constant dense<0.000000e+00> : vector<256x128xf32>
    %75 = tpu.matmul %72, %74, %cst_34 {dimension_numbers = #tpu.dot_dimension_numbers<[1], [0], [0], [1], [0, 0, 1, 1], [], []>} : vector<256x384xbf16>, vector<384x128xbf16>, vector<256x128xf32> -> vector<256x128xf32>
    %c0_35 = arith.constant 0 : index
    %c0_36 = arith.constant 0 : index
    %76 = vector.load %arg10[%c0_35, %c0_36] : memref<256x128xf32, #tpu.memory_space<vmem>>, vector<256x128xf32>
    %77 = arith.addf %76, %75 : vector<256x128xf32>
    %c0_37 = arith.constant 0 : index
    %c0_38 = arith.constant 0 : index
    %78 = vector.load %arg10[%c0_37, %c0_38] : memref<256x128xf32, #tpu.memory_space<vmem>>, vector<256x128xf32>
    tpu.vector_store %arg10[%c0_37, %c0_38], %77 {strides = array<i32>} : memref<256x128xf32, #tpu.memory_space<vmem>>, vector<256x128xf32>,
    %c0_39 = arith.constant 0 : index
    %c0_40 = arith.constant 0 : index
    %79 = vector.load %arg10[%c0_39, %c0_40] : memref<256x128xf32, #tpu.memory_space<vmem>>, vector<256x128xf32>
    %cst_41 = arith.constant dense<0.000000e+00> : vector<128xf32>
    %80 = vector.multi_reduction <add>, %79, %cst_41 [0] : vector<256x128xf32> to vector<128xf32>
    %81 = vector.shape_cast %80 : vector<128xf32> to vector<1x128xf32>
    %82 = arith.mulf %79, %79 : vector<256x128xf32>
    %cst_42 = arith.constant dense<0.000000e+00> : vector<128xf32>
    %83 = vector.multi_reduction <add>, %82, %cst_42 [0] : vector<256x128xf32> to vector<128xf32>
    %84 = vector.shape_cast %83 : vector<128xf32> to vector<1x128xf32>
    %85 = tpu.concatenate %81, %84 in 0 : vector<1x128xf32>, vector<1x128xf32> -> vector<2x128xf32>
    %c0_43 = arith.constant 0 : index
    %c0_44 = arith.constant 0 : index
    %c0_45 = arith.constant 0 : index
    %c0_46 = arith.constant 0 : index
    %86 = vector.load %arg9[%c0_43, %c0_44, %c0_45, %c0_46] : memref<1x1x2x128xf32, #tpu.memory_space<vmem>>, vector<1x1x2x128xf32>
    %87 = vector.shape_cast %86 : vector<1x1x2x128xf32> to vector<2x128xf32>
    %88 = vector.shape_cast %85 : vector<2x128xf32> to vector<1x1x2x128xf32>
    tpu.vector_store %arg9[%c0_43, %c0_44, %c0_45, %c0_46], %88 {strides = array<i32>} : memref<1x1x2x128xf32, #tpu.memory_space<vmem>>, vector<1x1x2x128xf32>,
    %89 = vector.shape_cast %79 : vector<256x128xf32> to vector<1x8x32x128xf32>
    %90 = arith.truncf %89 : vector<1x8x32x128xf32> to vector<1x8x32x128xbf16>
    %c0_47 = arith.constant 0 : index
    %c0_48 = arith.constant 0 : index
    %c0_49 = arith.constant 0 : index
    %c0_50 = arith.constant 0 : index
    %91 = vector.load %arg8[%c0_47, %c0_48, %c0_49, %c0_50] : memref<1x8x32x128xbf16, #tpu.memory_space<vmem>>, vector<1x8x32x128xbf16>
    tpu.vector_store %arg8[%c0_47, %c0_48, %c0_49, %c0_50], %90 {strides = array<i32>} : memref<1x8x32x128xbf16, #tpu.memory_space<vmem>>, vector<1x8x32x128xbf16>,
    return
  }
  func.func @transform_0(%arg0: i32, %arg1: i32) -> (i32, i32, i32, i32) {
    %c0_i32 = arith.constant 0 : i32
    %c0_i32_0 = arith.constant 0 : i32
    %c0_i32_1 = arith.constant 0 : i32
    return %arg0, %arg1, %c0_i32, %c0_i32_0 : i32, i32, i32, i32
  }
  func.func @transform_1(%arg0: i32, %arg1: i32) -> (i32, i32, i32, i32) {
    %c8_i32 = arith.constant 8 : i32
    %0 = arith.muli %arg1, %c8_i32 : i32
    %c1_i32 = arith.constant 1 : i32
    %1 = arith.subi %0, %c1_i32 : i32
    %c0_i32 = arith.constant 0 : i32
    %2 = arith.maxsi %1, %c0_i32 : i32
    %c0_i32_0 = arith.constant 0 : i32
    %c0_i32_1 = arith.constant 0 : i32
    %c0_i32_2 = arith.constant 0 : i32
    return %arg0, %2, %c0_i32_0, %c0_i32_1 : i32, i32, i32, i32
  }
  func.func @transform_2(%arg0: i32, %arg1: i32) -> (i32, i32, i32, i32) {
    %c1_i32 = arith.constant 1 : i32
    %0 = arith.addi %arg1, %c1_i32 : i32
    %c8_i32 = arith.constant 8 : i32
    %1 = arith.muli %0, %c8_i32 : i32
    %c31_i32 = arith.constant 31 : i32
    %2 = arith.minsi %1, %c31_i32 : i32
    %c0_i32 = arith.constant 0 : i32
    %c0_i32_0 = arith.constant 0 : i32
    %c0_i32_1 = arith.constant 0 : i32
    return %arg0, %2, %c0_i32, %c0_i32_0 : i32, i32, i32, i32
  }
  func.func @transform_3(%arg0: i32, %arg1: i32) -> (i32, i32, i32) {
    %c0_i32 = arith.constant 0 : i32
    %c0_i32_0 = arith.constant 0 : i32
    %c0_i32_1 = arith.constant 0 : i32
    %c0_i32_2 = arith.constant 0 : i32
    return %c0_i32, %c0_i32_0, %c0_i32_1 : i32, i32, i32
  }
  func.func @transform_4(%arg0: i32, %arg1: i32) -> (i32, i32) {
    %c0_i32 = arith.constant 0 : i32
    %c0_i32_0 = arith.constant 0 : i32
    %c0_i32_1 = arith.constant 0 : i32
    return %c0_i32, %c0_i32_0 : i32, i32
  }
  func.func @transform_5(%arg0: i32, %arg1: i32) -> (i32, i32) {
    %c0_i32 = arith.constant 0 : i32
    %c0_i32_0 = arith.constant 0 : i32
    %c0_i32_1 = arith.constant 0 : i32
    return %c0_i32, %c0_i32_0 : i32, i32
  }
  func.func @transform_6(%arg0: i32, %arg1: i32) -> (i32, i32, i32, i32) {
    %c0_i32 = arith.constant 0 : i32
    %c0_i32_0 = arith.constant 0 : i32
    %c0_i32_1 = arith.constant 0 : i32
    return %arg0, %arg1, %c0_i32, %c0_i32_0 : i32, i32, i32, i32
  }
  func.func @transform_7(%arg0: i32, %arg1: i32) -> (i32, i32, i32, i32) {
    %c0_i32 = arith.constant 0 : i32
    %c0_i32_0 = arith.constant 0 : i32
    %c0_i32_1 = arith.constant 0 : i32
    return %arg0, %arg1, %c0_i32, %c0_i32_0 : i32, i32, i32, i32
  }
}

module attributes {stable_mosaic.version = 11 : i64} {
  func.func @kernel(%arg0: i32, %arg1: i32, %arg2: memref<1x8x32x128xbf16, #tpu.memory_space<vmem>>, %arg3: memref<1x128xf32, #tpu.memory_space<vmem>>, %arg4: memref<1x128xf32, #tpu.memory_space<vmem>>, %arg5: memref<1x8x32x128xf32, #tpu.memory_space<vmem>>, %arg6: memref<1x4x16x128xf32, #tpu.memory_space<vmem>>) attributes {dimension_semantics = [#tpu.dimension_semantics<parallel>, #tpu.dimension_semantics<parallel>], iteration_bounds = array<i64: 2, 4>, scalar_prefetch = 0 : i64, scratch_operands = 0 : i64, tpu.core_type = #tpu.core_type<tc>, window_params = [{transform_indices = @transform_0, window_bounds = array<i64: 1, 8, 32, 128>}, {pipeline_mode = #tpu.pipeline_mode<synchronous>, transform_indices = @transform_1, window_bounds = array<i64: 1, 128>}, {pipeline_mode = #tpu.pipeline_mode<synchronous>, transform_indices = @transform_2, window_bounds = array<i64: 1, 128>}, {transform_indices = @transform_3, window_bounds = array<i64: 1, 8, 32, 128>}, {transform_indices = @transform_4, window_bounds = array<i64: 1, 4, 16, 128>}]} {
    %c0 = arith.constant 0 : index
    %c0_0 = arith.constant 0 : index
    %c0_1 = arith.constant 0 : index
    %c0_2 = arith.constant 0 : index
    %0 = vector.load %arg2[%c0, %c0_0, %c0_1, %c0_2] : memref<1x8x32x128xbf16, #tpu.memory_space<vmem>>, vector<1x8x32x128xbf16>
    %1 = vector.shape_cast %0 : vector<1x8x32x128xbf16> to vector<8x32x128xbf16>
    %c0_3 = arith.constant 0 : index
    %c0_4 = arith.constant 0 : index
    %2 = vector.load %arg3[%c0_3, %c0_4] : memref<1x128xf32, #tpu.memory_space<vmem>>, vector<1x128xf32>
    %3 = vector.shape_cast %2 : vector<1x128xf32> to vector<128xf32>
    %4 = arith.extf %1 : vector<8x32x128xbf16> to vector<8x32x128xf32>
    %5 = vector.shape_cast %3 : vector<128xf32> to vector<1x1x128xf32>
    %6 = vector.broadcast %5 : vector<1x1x128xf32> to vector<8x32x128xf32>
    %7 = arith.mulf %4, %6 : vector<8x32x128xf32>
    %c0_5 = arith.constant 0 : index
    %c0_6 = arith.constant 0 : index
    %8 = vector.load %arg4[%c0_5, %c0_6] : memref<1x128xf32, #tpu.memory_space<vmem>>, vector<1x128xf32>
    %9 = vector.shape_cast %8 : vector<1x128xf32> to vector<128xf32>
    %10 = vector.shape_cast %9 : vector<128xf32> to vector<1x1x128xf32>
    %11 = vector.broadcast %10 : vector<1x1x128xf32> to vector<8x32x128xf32>
    %12 = arith.addf %7, %11 : vector<8x32x128xf32>
    %cst = arith.constant 0.000000e+00 : f32
    %13 = vector.broadcast %cst : f32 to vector<8x32x128xf32>
    %14 = arith.maximumf %12, %13 : vector<8x32x128xf32>
    %15 = vector.shape_cast %14 : vector<8x32x128xf32> to vector<1x8x32x128xf32>
    %c0_7 = arith.constant 0 : index
    %c0_8 = arith.constant 0 : index
    %c0_9 = arith.constant 0 : index
    %c0_10 = arith.constant 0 : index
    %16 = vector.load %arg5[%c0_7, %c0_8, %c0_9, %c0_10] : memref<1x8x32x128xf32, #tpu.memory_space<vmem>>, vector<1x8x32x128xf32>
    tpu.vector_store %arg5[%c0_7, %c0_8, %c0_9, %c0_10], %15 {strides = array<i32>} : memref<1x8x32x128xf32, #tpu.memory_space<vmem>>, vector<1x8x32x128xf32>,
    %17 = vector.shape_cast %14 : vector<8x32x128xf32> to vector<4x2x32x128xf32>
    %18 = vector.extract_strided_slice %17 {offsets = [0, 0, 0, 0], sizes = [4, 1, 32, 128], strides = [1, 1, 1, 1]} : vector<4x2x32x128xf32> to vector<4x1x32x128xf32>
    %19 = vector.shape_cast %18 : vector<4x1x32x128xf32> to vector<4x32x128xf32>
    %20 = vector.extract_strided_slice %17 {offsets = [0, 1, 0, 0], sizes = [4, 1, 32, 128], strides = [1, 1, 1, 1]} : vector<4x2x32x128xf32> to vector<4x1x32x128xf32>
    %21 = vector.shape_cast %20 : vector<4x1x32x128xf32> to vector<4x32x128xf32>
    %22 = arith.maximumf %19, %21 : vector<4x32x128xf32>
    %23 = vector.shape_cast %22 : vector<4x32x128xf32> to vector<4x16x2x128xf32>
    %24 = vector.extract_strided_slice %23 {offsets = [0, 0, 0, 0], sizes = [4, 16, 1, 128], strides = [1, 1, 1, 1]} : vector<4x16x2x128xf32> to vector<4x16x1x128xf32>
    %25 = vector.shape_cast %24 : vector<4x16x1x128xf32> to vector<4x16x128xf32>
    %26 = vector.extract_strided_slice %23 {offsets = [0, 0, 1, 0], sizes = [4, 16, 1, 128], strides = [1, 1, 1, 1]} : vector<4x16x2x128xf32> to vector<4x16x1x128xf32>
    %27 = vector.shape_cast %26 : vector<4x16x1x128xf32> to vector<4x16x128xf32>
    %28 = arith.maximumf %25, %27 : vector<4x16x128xf32>
    %29 = vector.shape_cast %28 : vector<4x16x128xf32> to vector<1x4x16x128xf32>
    %c0_11 = arith.constant 0 : index
    %c0_12 = arith.constant 0 : index
    %c0_13 = arith.constant 0 : index
    %c0_14 = arith.constant 0 : index
    %30 = vector.load %arg6[%c0_11, %c0_12, %c0_13, %c0_14] : memref<1x4x16x128xf32, #tpu.memory_space<vmem>>, vector<1x4x16x128xf32>
    tpu.vector_store %arg6[%c0_11, %c0_12, %c0_13, %c0_14], %29 {strides = array<i32>} : memref<1x4x16x128xf32, #tpu.memory_space<vmem>>, vector<1x4x16x128xf32>,
    return
  }
  func.func @transform_0(%arg0: i32, %arg1: i32) -> (i32, i32, i32, i32) {
    %c0_i32 = arith.constant 0 : i32
    %c0_i32_0 = arith.constant 0 : i32
    %c0_i32_1 = arith.constant 0 : i32
    return %arg0, %arg1, %c0_i32, %c0_i32_0 : i32, i32, i32, i32
  }
  func.func @transform_1(%arg0: i32, %arg1: i32) -> (i32, i32) {
    %c0_i32 = arith.constant 0 : i32
    %c0_i32_0 = arith.constant 0 : i32
    %c0_i32_1 = arith.constant 0 : i32
    return %c0_i32, %c0_i32_0 : i32, i32
  }
  func.func @transform_2(%arg0: i32, %arg1: i32) -> (i32, i32) {
    %c0_i32 = arith.constant 0 : i32
    %c0_i32_0 = arith.constant 0 : i32
    %c0_i32_1 = arith.constant 0 : i32
    return %c0_i32, %c0_i32_0 : i32, i32
  }
  func.func @transform_3(%arg0: i32, %arg1: i32) -> (i32, i32, i32, i32) {
    %c0_i32 = arith.constant 0 : i32
    %c0_i32_0 = arith.constant 0 : i32
    %c0_i32_1 = arith.constant 0 : i32
    return %arg0, %arg1, %c0_i32, %c0_i32_0 : i32, i32, i32, i32
  }
  func.func @transform_4(%arg0: i32, %arg1: i32) -> (i32, i32, i32, i32) {
    %c0_i32 = arith.constant 0 : i32
    %c0_i32_0 = arith.constant 0 : i32
    %c0_i32_1 = arith.constant 0 : i32
    return %arg0, %arg1, %c0_i32, %c0_i32_0 : i32, i32, i32, i32
  }
}

</mosaic_0001>

<bundles_post_ra>
// kernel: encoder_block_forward.3
= control target key start
LH: loop header
LB: loop body
LE: loop exit
PB: predicated region body
PF: predicated region fallthrough
CT: control target
= control target key end

     0   :  { %s1417_s12 = smov 0   ;;  %s1419_s13 = smov 0   ;;  %s1637_s0 = inlined_call_operand.vmem [shape: bf16[2,32,32,128], index: 0, kind: input, shape index: {}]   ;;  %s1638_s1 = inlined_call_operand.vmem [shape: bf16[128,128], index: 1, kind: input, shape index: {}]   ;;  %s1639_s2 = inlined_call_operand.vmem [shape: bf16[2,32,32,128], index: 2, kind: output, shape index: {0}]   ;;  %s1640_s3 = inlined_call_operand.vmem [shape: f32[2,4,2,128], index: 3, kind: output, shape index: {1}]  }
   0x1   :  { %s1421_s14 = smov 0   ;;  %s1423_s15 = smov 0  }
   0x2   :  { %s1425_s16 = smov 0  }
   0x3 LB: > { %s23_s17 = sadd.s32 1, %s1387_s14  ;;  %s26_s18 = sadd.s32 1, %s1391_s15  ;;  %s1395_s16 = sphi %s1425_s16, %s14_s16   ;;  %s1391_s15 = sphi %s1423_s15, %s1644_s15   ;;  %s1387_s14 = sphi %s1421_s14, %s1643_s14   ;;  %s1383_s13 = sphi %s1419_s13, %s1642_s13   ;;  %s1379_s12 = sphi %s1417_s12, %s1641_s12  }
   0x4   : > { %p24_p0 = scmp.ge.s32.totalorder %s23_s17, 4  ;;  %p1009_p1 = scmp.ge.s32.totalorder %s1395_s16, 1 }
   0x5   : > { %p164_p2 = scmp.lt.s32.totalorder %s1395_s16, 9 }
   0x6   : > { %s1646_s17 = smov (%p24_p0, %s23_s17), 0  ;;  %s1648_s18 = smov (!%p24_p0, %s26_s18), %s1391_s15 }
   0x7   : > { %p165_p3 = pnand %p1009_p1, %p164_p2  ;;  %p28_p4 = scmp.ge.s32.totalorder %s1648_s18, 2 }
   0x8   : > { %s1010_s21 = sshll.u32 (!%p165_p3), %s1379_s12, 3  ;;  %p207_p5 = scmp.lt.s32.totalorder (!%p165_p3), %s1383_s13, 1 }
   0x9   : > { %s1650_s18 = smov (%p28_p4, %s1648_s18), 0  ;;  %168 = sbr.rel (%p165_p3) target bundleno = 324 (0x144), region = 28 }
   0xa   : > { %p209_p6 = scmp.lt.s32.totalorder (!%p165_p3), %s1010_s21, 31  ;;  %p230_p7 = scmp.lt.s32.totalorder (!%p165_p3), %s1379_s12, 3 }
   0xe   : > { %v1333_v0 = vld [vmem:[%s1638_s1 + $0x38] sm:$0xff]   ;;  %v1334_v1 = vld [vmem:[%s1638_s1 + $0x30] sm:$0xff]   ;;  %s1652_s13 = smov (!%p207_p5, %s1383_s13), 1  ;;  %v1335_v2 = vld [vmem:[%s1638_s1 + $0x28] sm:$0xff]   ;;  %s1654_s21 = smov (!%p209_p6, %s1010_s21), 31  ;;  %vm696_vm0 = vcmask 1040384  }
   0xf   : > { %1229 = vmatprep.subr.bf16.mxu0 %v1333_v0  ;;  %1277 = vmatprep.subr.bf16.mxu1 %v1333_v0  ;;  %s1012_s26 = sshll.u32 %s1652_s13, 7  ;;  %s1011_s27 = sshll.u32 %s1654_s21, 2  ;;  %v1336_v3 = vld [vmem:[%s1638_s1 + $0x20] sm:$0xff]   ;;  %v1337_v5 = vld [vmem:[%s1638_s1 + $0x18] sm:$0xff]   ;;  %v1338_v6 = vld [vmem:[%s1638_s1 + $0x10] sm:$0xff]  }
  0x10   : > { %1230 = vmatpush3.bf16.msra.mxu0 %v1333_v0  ;;  %1285 = vmatpush3.bf16.msra.mxu1 %v1333_v0  ;;  %s1462_s28 = sadd.s32 %s1012_s26, %s1011_s27  ;;  %v1339_v8 = vld [vmem:[%s1638_s1 + $0x8] sm:$0xff]   ;;  %v1340_v9 = vld [vmem:[%s1638_s1] sm:$0xff]   ;;  %s1656_s12 = smov (!%p230_p7, %s1379_s12), 3 }
  0x11   : > { %1231 = vmatprep.subr.bf16.mxu0 %v1334_v1  ;;  %1278 = vmatprep.subr.bf16.mxu1 %v1334_v1  ;;  %s1013_s4 = sshll.u32 %s1462_s28, 2  ;;  %s1018_s26 = sshll.u32 %s1652_s13, 2 }
  0x12   : > { %s1473_s7 = scalar_lea.vmem %s1637_s0, %s1013_s4  ;;  %s1512_s25 = scalar_lea.vmem %s1639_s2, %s1013_s4 }
  0x13   : > { %v1341_v4 = vld [vmem:[%s1473_s7] sm:$0xff]   ;;  %v1342_v10 = vld [vmem:[%s1473_s7 + $0x8] sm:$0xff]   ;;  %v1343_v12 = vld [vmem:[%s1473_s7 + $0x10] sm:$0xff]   ;;  %s233_s27 = sadd.s32 %s1018_s26, %s1656_s12 }
  0x14   : > { %1232 = vmatpush3.bf16.msra.mxu0 %v1334_v1  ;;  %1286 = vmatpush3.bf16.msra.mxu1 %v1334_v1  ;;  %v1349_v7 = vld [vmem:[%s1473_s7 + $0x40] sm:$0xff]   ;;  %v1350_v11 = vld [vmem:[%s1473_s7 + $0x48] sm:$0xff]   ;;  %v1351_v13 = vld [vmem:[%s1473_s7 + $0x50] sm:$0xff]   ;;  %s1019_s28 = sshll.u32 %s233_s27, 1 }
  0x15   : > { %1233 = vmatprep.subr.bf16.mxu0 %v1335_v2  ;;  %1279 = vmatprep.subr.bf16.mxu1 %v1335_v2  ;;  %v1344_v14 = vld [vmem:[%s1473_s7 + $0x18] sm:$0xff]   ;;  %v1345_v16 = vld [vmem:[%s1473_s7 + $0x20] sm:$0xff]   ;;  %v1346_v18 = vld [vmem:[%s1473_s7 + $0x28] sm:$0xff]   ;;  %s235_s4 = scalar_lea.vmem %s1640_s3, %s1019_s28 }
  0x16   : > { %1245 = vmatprep.mubr.bf16.mxu0 %v1341_v4  ;;  %1261 = vmatprep.mubr.bf16.mxu1 %v1349_v7  ;;  %v1352_v15 = vld [vmem:[%s1473_s7 + $0x58] sm:$0xff]   ;;  %v1353_v17 = vld [vmem:[%s1473_s7 + $0x60] sm:$0xff]   ;;  %v1354_v19 = vld [vmem:[%s1473_s7 + $0x68] sm:$0xff]  }
  0x17   : > { %v1347_v20 = vld [vmem:[%s1473_s7 + $0x30] sm:$0xff]   ;;  %v1348_v22 = vld [vmem:[%s1473_s7 + $0x38] sm:$0xff]  }
  0x18   : > { %1234 = vmatpush3.bf16.msra.mxu0 %v1335_v2  ;;  %1287 = vmatpush3.bf16.msra.mxu1 %v1335_v2  ;;  %v1355_v21 = vld [vmem:[%s1473_s7 + $0x70] sm:$0xff]   ;;  %v1356_v23 = vld [vmem:[%s1473_s7 + $0x78] sm:$0xff]  }
  0x19   : > { %1235 = vmatprep.subr.bf16.mxu0 %v1336_v3  ;;  %1280 = vmatprep.subr.bf16.mxu1 %v1336_v3 }
  0x1c   : > { %1236 = vmatpush3.bf16.msra.mxu0 %v1336_v3  ;;  %1288 = vmatpush3.bf16.msra.mxu1 %v1336_v3 }
  0x1d   : > { %1237 = vmatprep.subr.bf16.mxu0 %v1337_v5  ;;  %1281 = vmatprep.subr.bf16.mxu1 %v1337_v5 }
  0x20   : > { %1238 = vmatpush3.bf16.msra.mxu0 %v1337_v5  ;;  %1289 = vmatpush3.bf16.msra.mxu1 %v1337_v5 }
  0x21   : > { %1239 = vmatprep.subr.bf16.mxu0 %v1338_v6  ;;  %1282 = vmatprep.subr.bf16.mxu1 %v1338_v6 }
  0x24   : > { %1240 = vmatpush3.bf16.msra.mxu0 %v1338_v6  ;;  %1290 = vmatpush3.bf16.msra.mxu1 %v1338_v6 }
  0x25   : > { %1241 = vmatprep.subr.bf16.mxu0 %v1339_v8  ;;  %1283 = vmatprep.subr.bf16.mxu1 %v1339_v8 }
  0x28   : > { %1242 = vmatpush3.bf16.msra.mxu0 %v1339_v8  ;;  %1291 = vmatpush3.bf16.msra.mxu1 %v1339_v8 }
  0x29   : > { %1243 = vmatprep.subr.bf16.mxu0 %v1340_v9  ;;  %1284 = vmatprep.subr.bf16.mxu1 %v1340_v9 }
  0x2c   : > { %1244 = vmatpush3.bf16.msra.mxu0 %v1340_v9  ;;  %1292 = vmatpush3.bf16.msra.mxu1 %v1340_v9 }
  0x2f   : > { %1246 = vmatmul.mubr.bf16.vlgmr.msra.gmra.mxu0 %v1342_v10  ;;  %1262 = vmatmul.mubr.bf16.vlgmr.msra.gmra.mxu1 %v1350_v11 }
  0x30   : > { %1249 = vmatprep.mubr.bf16.mxu0 %v1343_v12  ;;  %1265 = vmatprep.mubr.bf16.mxu1 %v1351_v13 }
  0x37   : > { %1250 = vmatmul.mubr.bf16.gmra.mxu0 %v1344_v14  ;;  %1266 = vmatmul.mubr.bf16.gmra.mxu1 %v1352_v15 }
  0x38   : > { %1253 = vmatprep.mubr.bf16.mxu0 %v1345_v16  ;;  %1269 = vmatprep.mubr.bf16.mxu1 %v1353_v17 }
  0x3f   : > { %1254 = vmatmul.mubr.bf16.gmra.mxu0 %v1346_v18  ;;  %1270 = vmatmul.mubr.bf16.gmra.mxu1 %v1354_v19 }
  0x40   : > { %1257 = vmatprep.mubr.bf16.mxu0 %v1347_v20  ;;  %1273 = vmatprep.mubr.bf16.mxu1 %v1355_v21 }
  0x47   : > { %1258 = vmatmul.mubr.bf16.gmra.mxu0 %v1348_v22  ;;  %1274 = vmatmul.mubr.bf16.gmra.mxu1 %v1356_v23 }
  0xef   : > { %v1247_v24 = vpop.f32.mrf.mxu0  ;;  %v1503_v25 = vpop.f32.mrf.mxu1 }
  0xf0   : > { %v629_v41 = vmul.f32 %v1247_v24, %v1247_v24 }
  0xf1   : > { %v463_v26 = vpop.f32.mrf.mxu0  ;;  %v1505_v27 = vpop.f32.mrf.mxu1 }
  0xf2   : > { %v627_v34 = vmul.f32 %v463_v26, %v463_v26 }
  0xf3   : > { %v1248_v28 = vpop.f32.mrf.mxu0  ;;  %v1514_v29 = vpop.f32.mrf.mxu1 }
  0xf4   : > { %v1118_v30 = vpack.c.bf16 %v1248_v28, %v1247_v24  ;;  %v1158_v31 = vpack.c.bf16 %v1514_v29, %v1503_v25  ;;  %v630_v46 = vmul.f32 %v1248_v28, %v1248_v28 }
  0xf5   : > { %v466_v32 = vpop.f32.mrf.mxu0  ;;  %v1518_v33 = vpop.f32.mrf.mxu1 }
  0xf6   : > { %1190 = vst [vmem:[%s1512_s25 + $0x8] sm:$0xff] %v1118_v30   ;;  %v590_v35 = vadd.f32 %v466_v32, %v463_v26  ;;  %v628_v36 = vmul.f32 %v466_v32, %v466_v32  ;;  %v1113_v37 = vpack.c.bf16 %v466_v32, %v463_v26  ;;  %1198 = vst [vmem:[%s1512_s25 + $0x48] sm:$0xff] %v1158_v31  }
  0xf7   : > { %v1251_v38 = vpop.f32.mrf.mxu0  ;;  %v1153_v39 = vpack.c.bf16 %v1518_v33, %v1505_v27  ;;  %v1524_v40 = vpop.f32.mrf.mxu1 }
  0xf8   : > { %v591_v42 = vadd.f32 %v1247_v24, %v590_v35  ;;  %v659_v43 = vadd.f32 %v628_v36, %v627_v34  ;;  %1114 = vst [vmem:[%s1512_s25] sm:$0xff] %v1113_v37   ;;  %v633_v1 = vmul.f32 %v1251_v38, %v1251_v38 }
  0xf9   : > { %v479_v44 = vpop.f32.mrf.mxu0  ;;  %1197 = vst [vmem:[%s1512_s25 + $0x40] sm:$0xff] %v1153_v39   ;;  %v1528_v45 = vpop.f32.mrf.mxu1 }
  0xfa   : > { %v660_v47 = vadd.f32 %v659_v43, %v629_v41  ;;  %v592_v48 = vadd.f32 %v1248_v28, %v591_v42  ;;  %v631_v52 = vmul.f32 %v479_v44, %v479_v44 }
  0xfb   : > { %v1252_v49 = vpop.f32.mrf.mxu0  ;;  %v1530_v50 = vpop.f32.mrf.mxu1 }
  0xfc   : > { %v593_v51 = vadd.f32 %v592_v48, %v479_v44  ;;  %v661_v53 = vadd.f32 %v660_v47, %v630_v46  ;;  %v1128_v54 = vpack.c.bf16 %v1252_v49, %v1251_v38  ;;  %v1168_v56 = vpack.c.bf16 %v1530_v50, %v1524_v40 }
  0xfd   : > { %v482_v55 = vpop.f32.mrf.mxu0  ;;  %v1534_v57 = vpop.f32.mrf.mxu1  ;;  %v634_v6 = vmul.f32 %v1252_v49, %v1252_v49 }
  0xfe   : > { %v662_v58 = vadd.f32 %v661_v53, %v631_v52  ;;  %1192 = vst [vmem:[%s1512_s25 + $0x18] sm:$0xff] %v1128_v54   ;;  %v594_v59 = vadd.f32 %v593_v51, %v482_v55  ;;  %v632_v60 = vmul.f32 %v482_v55, %v482_v55  ;;  %v1123_v61 = vpack.c.bf16 %v482_v55, %v479_v44 }
  0xff   : > { %v1255_v62 = vpop.f32.mrf.mxu0  ;;  %1200 = vst [vmem:[%s1512_s25 + $0x58] sm:$0xff] %v1168_v56   ;;  %v1163_v63 = vpack.c.bf16 %v1534_v57, %v1528_v45  ;;  %v1540_v0 = vpop.f32.mrf.mxu1 }
 0x100   : > { %v595_v2 = vadd.f32 %v1251_v38, %v594_v59  ;;  %v663_v3 = vadd.f32 %v662_v58, %v632_v60  ;;  %1191 = vst [vmem:[%s1512_s25 + $0x10] sm:$0xff] %v1123_v61   ;;  %v637_v26 = vmul.f32 %v1255_v62, %v1255_v62  ;;  %v643_v61 = vmul.f32 %v1505_v27, %v1505_v27 }
 0x101   : > { %v495_v4 = vpop.f32.mrf.mxu0  ;;  %1199 = vst [vmem:[%s1512_s25 + $0x50] sm:$0xff] %v1163_v63   ;;  %v1544_v5 = vpop.f32.mrf.mxu1 }
 0x102   : > { %v664_v7 = vadd.f32 %v663_v3, %v633_v1  ;;  %v596_v8 = vadd.f32 %v1252_v49, %v595_v2  ;;  %v635_v12 = vmul.f32 %v495_v4, %v495_v4  ;;  %v644_v2 = vmul.f32 %v1518_v33, %v1518_v33 }
 0x103   : > { %v1256_v9 = vpop.f32.mrf.mxu0  ;;  %v1546_v10 = vpop.f32.mrf.mxu1 }
 0x104   : > { %v597_v11 = vadd.f32 %v596_v8, %v495_v4  ;;  %v665_v13 = vadd.f32 %v664_v7, %v634_v6  ;;  %v1138_v14 = vpack.c.bf16 %v1256_v9, %v1255_v62  ;;  %v1178_v16 = vpack.c.bf16 %v1546_v10, %v1540_v0 }
 0x105   : > { %v498_v15 = vpop.f32.mrf.mxu0  ;;  %v1550_v17 = vpop.f32.mrf.mxu1  ;;  %v638_v34 = vmul.f32 %v1256_v9, %v1256_v9  ;;  %v646_v8 = vmul.f32 %v1514_v29, %v1514_v29 }
 0x106   : > { %v666_v18 = vadd.f32 %v665_v13, %v635_v12  ;;  %1194 = vst [vmem:[%s1512_s25 + $0x28] sm:$0xff] %v1138_v14   ;;  %v598_v19 = vadd.f32 %v597_v11, %v498_v15  ;;  %v636_v20 = vmul.f32 %v498_v15, %v498_v15  ;;  %v1133_v21 = vpack.c.bf16 %v498_v15, %v495_v4 }
 0x107   : > { %v1259_v22 = vpop.f32.mrf.mxu0  ;;  %1202 = vst [vmem:[%s1512_s25 + $0x68] sm:$0xff] %v1178_v16   ;;  %v1173_v23 = vpack.c.bf16 %v1550_v17, %v1544_v5  ;;  %v1556_v24 = vpop.f32.mrf.mxu1  ;;  %v645_v4 = vmul.f32 %v1503_v25, %v1503_v25  ;;  %v647_v12 = vmul.f32 %v1528_v45, %v1528_v45  ;;  %v648_v15 = vmul.f32 %v1534_v57, %v1534_v57 }
 0x108   : > { %v599_v28 = vadd.f32 %v1255_v62, %v598_v19  ;;  %v667_v30 = vadd.f32 %v666_v18, %v636_v20  ;;  %1193 = vst [vmem:[%s1512_s25 + $0x20] sm:$0xff] %v1133_v21   ;;  %v641_v54 = vmul.f32 %v1259_v22, %v1259_v22  ;;  %v651_v21 = vmul.f32 %v1544_v5, %v1544_v5 }
 0x109   : > { %v511_v31 = vpop.f32.mrf.mxu0  ;;  %1201 = vst [vmem:[%s1512_s25 + $0x60] sm:$0xff] %v1173_v23   ;;  %v1560_v32 = vpop.f32.mrf.mxu1 }
 0x10a   : > { %v668_v35 = vadd.f32 %v667_v30, %v637_v26  ;;  %v600_v36 = vadd.f32 %v1256_v9, %v599_v28  ;;  %v639_v41 = vmul.f32 %v511_v31, %v511_v31  ;;  %v652_v26 = vmul.f32 %v1550_v17, %v1550_v17 }
 0x10b   : > { %v1260_v37 = vpop.f32.mrf.mxu0  ;;  %v1562_v38 = vpop.f32.mrf.mxu1 }
 0x10c   : > { %v601_v39 = vadd.f32 %v600_v36, %v511_v31  ;;  %v669_v42 = vadd.f32 %v668_v35, %v638_v34  ;;  %v1148_v43 = vpack.c.bf16 %v1260_v37, %v1259_v22  ;;  %v1188_v46 = vpack.c.bf16 %v1562_v38, %v1556_v24 }
 0x10d   : > { %v514_v44 = vpop.f32.mrf.mxu0  ;;  %v578_v47 = vpop.f32.mrf.mxu1  ;;  %v642_v58 = vmul.f32 %v1260_v37, %v1260_v37  ;;  %v655_v35 = vmul.f32 %v1560_v32, %v1560_v32 }
 0x10e   : > { %v670_v48 = vadd.f32 %v669_v42, %v639_v41  ;;  %1196 = vst [vmem:[%s1512_s25 + $0x38] sm:$0xff] %v1148_v43   ;;  %v602_v49 = vadd.f32 %v601_v39, %v514_v44  ;;  %v640_v51 = vmul.f32 %v514_v44, %v514_v44  ;;  %v1143_v52 = vpack.c.bf16 %v514_v44, %v511_v31 }
 0x10f   : > { %1204 = vst [vmem:[%s1512_s25 + $0x78] sm:$0xff] %v1188_v46   ;;  %v1183_v53 = vpack.c.bf16 %v578_v47, %v1560_v32  ;;  %v656_v39 = vmul.f32 %v578_v47, %v578_v47 }
 0x110   : > { %v603_v55 = vadd.f32 %v1259_v22, %v602_v49  ;;  %v671_v56 = vadd.f32 %v670_v48, %v640_v51  ;;  %1195 = vst [vmem:[%s1512_s25 + $0x30] sm:$0xff] %v1143_v52  }
 0x111   : > { %1203 = vst [vmem:[%s1512_s25 + $0x70] sm:$0xff] %v1183_v53  }
 0x112   : > { %v604_v59 = vadd.f32 %v1260_v37, %v603_v55  ;;  %v672_v60 = vadd.f32 %v671_v56, %v641_v54 }
 0x114   : > { %v673_v62 = vadd.f32 %v672_v60, %v642_v58  ;;  %v605_v63 = vadd.f32 %v604_v59, %v1505_v27 }
 0x116   : > { %v606_v1 = vadd.f32 %v605_v63, %v1518_v33  ;;  %v674_v3 = vadd.f32 %v673_v62, %v643_v61 }
 0x118   : > { %v607_v6 = vadd.f32 %v1503_v25, %v606_v1  ;;  %v675_v7 = vadd.f32 %v674_v3, %v644_v2  ;;  %v649_v25 = vmul.f32 %v1524_v40, %v1524_v40 }
 0x11a   : > { %v676_v9 = vadd.f32 %v675_v7, %v645_v4  ;;  %v608_v11 = vadd.f32 %v1514_v29, %v607_v6  ;;  %v650_v29 = vmul.f32 %v1530_v50, %v1530_v50 }
 0x11c   : > { %v609_v27 = vadd.f32 %v608_v11, %v1528_v45  ;;  %v677_v13 = vadd.f32 %v676_v9, %v646_v8 }
 0x11e   : > { %v678_v33 = vadd.f32 %v677_v13, %v647_v12  ;;  %v610_v14 = vadd.f32 %v609_v27, %v1534_v57 }
 0x120   : > { %v611_v16 = vadd.f32 %v1524_v40, %v610_v14  ;;  %v679_v18 = vadd.f32 %v678_v33, %v648_v15  ;;  %v653_v40 = vmul.f32 %v1540_v0, %v1540_v0 }
 0x122   : > { %v680_v19 = vadd.f32 %v679_v18, %v649_v25  ;;  %v612_v20 = vadd.f32 %v1530_v50, %v611_v16  ;;  %v654_v50 = vmul.f32 %v1546_v10, %v1546_v10 }
 0x124   : > { %v613_v45 = vadd.f32 %v612_v20, %v1544_v5  ;;  %v681_v22 = vadd.f32 %v680_v19, %v650_v29 }
 0x126   : > { %v682_v23 = vadd.f32 %v681_v22, %v651_v21  ;;  %v614_v57 = vadd.f32 %v613_v45, %v1550_v17 }
 0x128   : > { %v615_v28 = vadd.f32 %v1540_v0, %v614_v57  ;;  %v683_v30 = vadd.f32 %v682_v23, %v652_v26  ;;  %v657_v0 = vmul.f32 %v1556_v24, %v1556_v24 }
 0x12a   : > { %v684_v31 = vadd.f32 %v683_v30, %v653_v40  ;;  %v616_v5 = vadd.f32 %v1546_v10, %v615_v28  ;;  %v658_v10 = vmul.f32 %v1562_v38, %v1562_v38 }
 0x12c   : > { %v617_v34 = vadd.f32 %v616_v5, %v1560_v32  ;;  %v685_v17 = vadd.f32 %v684_v31, %v654_v50 }
 0x12e   : > { %v686_v36 = vadd.f32 %v685_v17, %v655_v35  ;;  %v618_v37 = vadd.f32 %v617_v34, %v578_v47 }
 0x130   : > { %v619_v41 = vadd.f32 %v1556_v24, %v618_v37  ;;  %v687_v42 = vadd.f32 %v686_v36, %v656_v39 }
 0x132   : > { %v620_v43 = vadd.f32 %v1562_v38, %v619_v41  ;;  %v688_v44 = vadd.f32 %v687_v42, %v657_v0 }
 0x134   : > { %v621_v46 = vrot.slane %v620_v43, 4  ;;  %v689_v32 = vadd.f32 %v688_v44, %v658_v10 }
 0x136   : > { %v622_v48 = vadd.f32 %v621_v46, %v620_v43  ;;  %v690_v49 = vrot.slane %v689_v32, 4 }
 0x138   : > { %v623_v47 = vrot.slane %v622_v48, 2  ;;  %v691_v51 = vadd.f32 %v690_v49, %v689_v32 }
 0x13a   : > { %v624_v52 = vadd.f32 %v623_v47, %v622_v48  ;;  %v692_v53 = vrot.slane %v691_v51, 2 }
 0x13c   : > { %v625_v24 = vrot.slane %v624_v52, 1  ;;  %v693_v54 = vadd.f32 %v692_v53, %v691_v51 }
 0x13e   : > { %v694_v55 = vrot.slane %v693_v54, 1  ;;  %v626_v38 = vadd.f32 %v625_v24, %v624_v52 }
 0x140   : > { %v695_v56 = vadd.f32 %v694_v55, %v693_v54 }
 0x142   : > { %v697_v58 = vsel %vm696_vm0, %v626_v38, %v695_v56 }
 0x143   : > { %698 = vst [vmem:[%s235_s4] sm:$0x3] %v697_v58 }
 0x144 PF: > { %s14_s16 = sadd.s32 1, %s1395_s16   ;;  %s1641_s12 = smov %s1387_s14 }
 0x145   : > { %p11_p8 = scmp.ge.s32.totalorder %s14_s16, 10   ;;  %s1642_s13 = smov %s1391_s15 }
 0x146   : > { %s1643_s14 = smov %s1646_s17  ;;  %s1644_s15 = smov %s1650_s18 }
 0x147   :  { %13 = sbr.rel (!%p11_p8) target bundleno = 3 (0x3), region = 70 }

// kernel: encoder_block_forward.5
= control target key start
LH: loop header
LB: loop body
LE: loop exit
PB: predicated region body
PF: predicated region fallthrough
CT: control target
= control target key end

     0   :  { %s1923_s15 = smov 0   ;;  %s1925_s16 = smov 0   ;;  %s2662_s0 = inlined_call_operand.vmem [shape: bf16[2,32,32,128], index: 0, kind: input, shape index: {}]   ;;  %s2663_s1 = inlined_call_operand.vmem [shape: f32[1,128], index: 1, kind: input, shape index: {}]   ;;  %s2664_s2 = inlined_call_operand.vmem [shape: f32[1,128], index: 2, kind: input, shape index: {}]   ;;  %s2665_s3 = inlined_call_operand.vmem [shape: f32[2,32,32,128], index: 3, kind: output, shape index: {0}]   ;;  %s2666_s4 = inlined_call_operand.vmem [shape: f32[2,16,16,128], index: 4, kind: output, shape index: {1}]  }
   0x1   :  { %s1927_s17 = smov 0   ;;  %s1929_s18 = smov 0  }
   0x2   :  { %s1931_s19 = smov 0  }
   0x3 LB: > { %s24_s20 = sadd.s32 1, %s1887_s17  ;;  %s27_s21 = sadd.s32 1, %s1891_s18  ;;  %s1895_s19 = sphi %s1931_s19, %s15_s19   ;;  %s1891_s18 = sphi %s1929_s18, %s2730_s18   ;;  %s1887_s17 = sphi %s1927_s17, %s2729_s17   ;;  %s1883_s16 = sphi %s1925_s16, %s2728_s16   ;;  %s1879_s15 = sphi %s1923_s15, %s2727_s15  }
   0x4   : > { %p25_p0 = scmp.ge.s32.totalorder %s24_s20, 4  ;;  %p1656_p1 = scmp.ge.s32.totalorder %s1895_s19, 1 }
   0x5   : > { %p189_p2 = scmp.lt.s32.totalorder %s1895_s19, 9 }
   0x6   : > { %s2732_s20 = smov (%p25_p0, %s24_s20), 0  ;;  %s2734_s21 = smov (!%p25_p0, %s27_s21), %s1891_s18 }
   0x7   : > { %p190_p3 = pnand %p1656_p1, %p189_p2  ;;  %p29_p4 = scmp.ge.s32.totalorder %s2734_s21, 2 }
   0x9   : > { %s2736_s21 = smov (%p29_p4, %s2734_s21), 0  ;;  %193 = sbr.rel (%p190_p3) target bundleno = 148 (0x94), region = 32 }
   0xe   : > { %s1657_s22 = sshll.u32 %s1879_s15, 3  ;;  %p236_p5 = scmp.lt.s32.totalorder %s1883_s16, 1  ;;  %v510_v0 = vlaneseq  ;;  %v1897_v1 = vmov 1983009808   ;;  %v1970_v5 = vld [vmem:[%s2663_s1] ss:$0 sm:$0xff] }
   0xf   : > { %p238_p6 = scmp.lt.s32.totalorder %s1657_s22, 31  ;;  %v508_v2 = vunpack.c.l.s4 %v1897_v1  ;;  %v1983_v16 = vld [vmem:[%s2664_s2] ss:$0 sm:$0xff]  ;;  %vm1418_vm0 = vcmask 1041409   ;;  %vm1420_vm1 = vcmask 1042434   ;;  %s1665_s12 = sshll.u32 %s1879_s15, 2 }
  0x10   : > { %s2738_s16 = smov (!%p236_p5, %s1883_s16), 1  ;;  %v511_v4 = vshrl.u32 %v510_v0, 7  ;;  %p2303_p7 = scmp.lt.s32.totalorder %s1665_s12, 15  ;;  %vm1422_vm2 = vcmask 1043459   ;;  %vm1424_vm3 = vcmask 1044484   ;;  %vm1426_vm4 = vcmask 1045509  }
  0x11   : > { %s2740_s22 = smov (!%p238_p6, %s1657_s22), 31  ;;  %s1659_s23 = sshll.u32 %s2738_s16, 7  ;;  %v509_v3 = vunpack.c.0.s8 %v508_v2  ;;  %vm1428_vm5 = vcmask 1046534   ;;  %vm1430_vm6 = vcmask 1047559  }
  0x12   : > { %s1658_s24 = sshll.u32 %s2740_s22, 2  ;;  %v1977_v10 = vsub.s32 0, %v511_v4  ;;  %s2742_s12 = smov (!%p2303_p7, %s1665_s12), 15 }
  0x13   : > { %s1959_s25 = sadd.s32 %s1659_s23, %s1658_s24  ;;  %v1975_v9 = vsub.s32 %v509_v3, %v511_v4  ;;  %s1666_s14 = sshll.u32 %s2742_s12, 1 }
  0x14   : > { %s1660_s26 = sshll.u32 %s1959_s25, 2  ;;  %s1664_s8 = sshll.u32 %s1959_s25, 3 }
  0x15   : > { %s1965_s29 = scalar_lea.vmem %s2662_s0, %s1660_s26  ;;  %s2001_s11 = scalar_lea.vmem %s2665_s3, %s1664_s8 }
  0x16   : > { %v1738_v6 = vld [vmem:[%s1965_s29] sm:$0xff]   ;;  %v1801_v7 = vld [vmem:[%s1965_s29 + $0x8] sm:$0xff]   ;;  %v1802_v8 = vld [vmem:[%s1965_s29 + $0x10] sm:$0xff]   ;;  %s1667_s15 = sshll.u32 %s2738_s16, 5 }
  0x17   : > { %v1739_v11 = vunpack.c.l.bf16 %v1738_v6  ;;  %v1740_v12 = vunpack.c.h.bf16 %v1738_v6  ;;  %v1743_v13 = vunpack.c.l.bf16 %v1801_v7  ;;  %v1744_v14 = vunpack.c.h.bf16 %v1801_v7  ;;  %v1803_v15 = vld [vmem:[%s1965_s29 + $0x18] sm:$0xff]   ;;  %v1804_v37 = vld [vmem:[%s1965_s29 + $0x20] sm:$0xff]   ;;  %v1805_v38 = vld [vmem:[%s1965_s29 + $0x28] sm:$0xff]   ;;  %s264_s16 = sadd.s32 %s1667_s15, %s1666_s14 }
  0x18   : > { %v1747_v17 = vunpack.c.l.bf16 %v1802_v8  ;;  %v1748_v18 = vunpack.c.h.bf16 %v1802_v8  ;;  %v1751_v19 = vunpack.c.l.bf16 %v1803_v15  ;;  %v1752_v20 = vunpack.c.h.bf16 %v1803_v15  ;;  %s1668_s22 = sshll.u32 %s264_s16, 3 }
  0x19   : > { %v339_v21 = vmul.f32 %v1739_v11, %v1970_v5  ;;  %v340_v22 = vmul.f32 %v1740_v12, %v1970_v5  ;;  %v341_v23 = vmul.f32 %v1743_v13, %v1970_v5  ;;  %v342_v24 = vmul.f32 %v1744_v14, %v1970_v5  ;;  %s2422_s25 = scalar_lea.vmem %s2666_s4, %s1668_s22 }
  0x1a   : > { %v343_v25 = vmul.f32 %v1747_v17, %v1970_v5  ;;  %v344_v26 = vmul.f32 %v1748_v18, %v1970_v5  ;;  %v345_v27 = vmul.f32 %v1751_v19, %v1970_v5  ;;  %v346_v28 = vmul.f32 %v1752_v20, %v1970_v5 }
  0x1b   : > { %v378_v29 = vadd.f32 %v1983_v16, %v339_v21  ;;  %v379_v30 = vadd.f32 %v1983_v16, %v340_v22  ;;  %v380_v31 = vadd.f32 %v1983_v16, %v341_v23  ;;  %v381_v32 = vadd.f32 %v1983_v16, %v342_v24 }
  0x1c   : > { %v382_v33 = vadd.f32 %v1983_v16, %v343_v25  ;;  %v383_v34 = vadd.f32 %v1983_v16, %v344_v26  ;;  %v384_v35 = vadd.f32 %v1983_v16, %v345_v27  ;;  %v385_v36 = vadd.f32 %v1983_v16, %v346_v28 }
  0x1d   : > { %v410_v39 = vmax.f32 %v378_v29, 0.0  ;;  %v411_v40 = vmax.f32 %v379_v30, 0.0  ;;  %v412_v41 = vmax.f32 %v380_v31, 0.0  ;;  %v413_v42 = vmax.f32 %v381_v32, 0.0  ;;  %v1814_v32 = vld [vmem:[%s1965_s29 + $0x70] sm:$0xff]  }
  0x1e   : > { %v414_v43 = vmax.f32 %v382_v33, 0.0  ;;  %v415_v44 = vmax.f32 %v383_v34, 0.0  ;;  %v416_v45 = vmax.f32 %v384_v35, 0.0  ;;  %v417_v46 = vmax.f32 %v385_v36, 0.0 }
  0x1f   : > { %442 = vst [vmem:[%s2001_s11] sm:$0xff] %v410_v39  ;;  %443 = vst [vmem:[%s2001_s11 + $0x8] sm:$0xff] %v411_v40  ;;  %v1755_v47 = vunpack.c.l.bf16 %v1804_v37  ;;  %v1756_v48 = vunpack.c.h.bf16 %v1804_v37  ;;  %v1759_v49 = vunpack.c.l.bf16 %v1805_v38  ;;  %v1760_v50 = vunpack.c.h.bf16 %v1805_v38 }
  0x20   : > { %444 = vst [vmem:[%s2001_s11 + $0x10] sm:$0xff] %v412_v41  ;;  %445 = vst [vmem:[%s2001_s11 + $0x18] sm:$0xff] %v413_v42  ;;  %v474_v51 = vmax.f32 %v410_v39, %v414_v43  ;;  %v475_v52 = vmax.f32 %v411_v40, %v415_v44  ;;  %v476_v53 = vmax.f32 %v412_v41, %v416_v45 }
  0x21   : > { %446 = vst [vmem:[%s2001_s11 + $0x20] sm:$0xff] %v414_v43  ;;  %447 = vst [vmem:[%s2001_s11 + $0x28] sm:$0xff] %v415_v44  ;;  %v477_v54 = vmax.f32 %v413_v42, %v417_v46  ;;  %v347_v55 = vmul.f32 %v1755_v47, %v1970_v5  ;;  %v348_v56 = vmul.f32 %v1756_v48, %v1970_v5  ;;  %v1806_v43 = vld [vmem:[%s1965_s29 + $0x30] sm:$0xff]   ;;  %v1807_v48 = vld [vmem:[%s1965_s29 + $0x38] sm:$0xff]  }
  0x22   : > { %448 = vst [vmem:[%s2001_s11 + $0x30] sm:$0xff] %v416_v45  ;;  %449 = vst [vmem:[%s2001_s11 + $0x38] sm:$0xff] %v417_v46  ;;  %v349_v57 = vmul.f32 %v1759_v49, %v1970_v5  ;;  %v350_v58 = vmul.f32 %v1760_v50, %v1970_v5  ;;  %v506_v59 = vcombine.high %v474_v51, %v474_v51  ;;  %v1808_v49 = vld [vmem:[%s1965_s29 + $0x40] sm:$0xff]  }
  0x23   : > { %v513_v60 = vrot.slane %v474_v51, %v1975_v9  ;;  %v523_v61 = vcombine.high %v475_v52, %v475_v52  ;;  %v530_v62 = vrot.slane %v475_v52, %v1975_v9  ;;  %v540_v63 = vcombine.high %v476_v53, %v476_v53 }
  0x24   : > { %v547_v0 = vrot.slane %v476_v53, %v1975_v9  ;;  %v557_v1 = vcombine.high %v477_v54, %v477_v54  ;;  %v564_v2 = vrot.slane %v477_v54, %v1975_v9  ;;  %v520_v3 = vrot.slane %v506_v59, %v1975_v9  ;;  %v1809_v54 = vld [vmem:[%s1965_s29 + $0x48] sm:$0xff]  }
  0x25   : > { %v521_v4 = vcombine.high %v513_v60, %v513_v60  ;;  %v1671_v6 = vrot.slane %v513_v60, 9  ;;  %v2027_v7 = vrot.slane %v523_v61, %v1975_v9  ;;  %v2029_v8 = vcombine.high %v530_v62, %v530_v62 }
  0x26   : > { %v1675_v11 = vrot.slane %v530_v62, 9  ;;  %v554_v12 = vrot.slane %v540_v63, %v1975_v9  ;;  %v555_v13 = vcombine.high %v547_v0, %v547_v0  ;;  %v522_v14 = vcombine.high %v520_v3, %v520_v3 }
  0x27   : > { %v1672_v15 = vrot.slane %v521_v4, 9  ;;  %v1673_v17 = vrot.slane %v520_v3, 9  ;;  %v2032_v18 = vmax.f32 %v513_v60, %v1671_v6  ;;  %v1676_v19 = vrot.slane %v2029_v8, 9 }
  0x28   : > { %v2035_v20 = vmax.f32 %v530_v62, %v1675_v11  ;;  %v556_v21 = vcombine.high %v554_v12, %v554_v12  ;;  %v1679_v22 = vrot.slane %v547_v0, 9  ;;  %v1674_v23 = vrot.slane %v522_v14, 9 }
  0x29   : > { %v2037_v24 = vmax.f32 %v521_v4, %v1672_v15  ;;  %v2039_v25 = vmax.f32 %v520_v3, %v1673_v17  ;;  %v1680_v27 = vrot.slane %v555_v13, 9  ;;  %v1681_v28 = vrot.slane %v554_v12, 9 }
  0x2a   : > { %v1682_v29 = vrot.slane %v556_v21, 9  ;;  %v2043_v30 = vmax.f32 %v547_v0, %v1679_v22  ;;  %v2045_v31 = vmax.f32 %v522_v14, %v1674_v23  ;;  %v2052_v34 = vrot.slane %v557_v1, %v1975_v9 }
  0x2b   : > { %v2054_v35 = vmax.f32 %v555_v13, %v1680_v27  ;;  %v2056_v36 = vmax.f32 %v554_v12, %v1681_v28  ;;  %v2062_v39 = vcombine.high %v564_v2, %v564_v2  ;;  %v1683_v40 = vrot.slane %v564_v2, 9 }
  0x2c   : > { %v2058_v37 = vmax.f32 %v556_v21, %v1682_v29  ;;  %v386_v41 = vadd.f32 %v1983_v16, %v347_v55  ;;  %v387_v42 = vadd.f32 %v1983_v16, %v348_v56  ;;  %v388_v46 = vadd.f32 %v1983_v16, %v349_v57 }
  0x2d   : > { %v389_v47 = vadd.f32 %v1983_v16, %v350_v58  ;;  %v2076_v51 = vmax.f32 %v564_v2, %v1683_v40  ;;  %v1763_v59 = vunpack.c.l.bf16 %v1806_v43  ;;  %v1764_v60 = vunpack.c.h.bf16 %v1806_v43 }
  0x2e   : > { %v418_v52 = vmax.f32 %v386_v41, 0.0  ;;  %v419_v53 = vmax.f32 %v387_v42, 0.0  ;;  %v420_v55 = vmax.f32 %v388_v46, 0.0  ;;  %v1767_v57 = vunpack.c.l.bf16 %v1807_v48  ;;  %v2108_v41 = vld [vmem:[%s1965_s29 + $0x50] sm:$0xff]  }
  0x2f   : > { %v421_v56 = vmax.f32 %v389_v47, 0.0  ;;  %v1768_v61 = vunpack.c.h.bf16 %v1807_v48  ;;  %v1771_v58 = vunpack.c.l.bf16 %v1808_v49  ;;  %v1772_v62 = vunpack.c.h.bf16 %v1808_v49 }
  0x30   : > { %450 = vst [vmem:[%s2001_s11 + $0x40] sm:$0xff] %v418_v52  ;;  %451 = vst [vmem:[%s2001_s11 + $0x48] sm:$0xff] %v419_v53  ;;  %v351_v63 = vmul.f32 %v1763_v59, %v1970_v5  ;;  %v352_v0 = vmul.f32 %v1764_v60, %v1970_v5  ;;  %v1775_v1 = vunpack.c.l.bf16 %v1809_v54  ;;  %v1776_v2 = vunpack.c.h.bf16 %v1809_v54 }
  0x31   : > { %452 = vst [vmem:[%s2001_s11 + $0x50] sm:$0xff] %v420_v55  ;;  %453 = vst [vmem:[%s2001_s11 + $0x58] sm:$0xff] %v421_v56  ;;  %v353_v3 = vmul.f32 %v1767_v57, %v1970_v5  ;;  %v354_v4 = vmul.f32 %v1768_v61, %v1970_v5  ;;  %v355_v6 = vmul.f32 %v1771_v58, %v1970_v5  ;;  %v1780_v61 = vunpack.c.h.bf16 %v2108_v41 }
  0x32   : > { %v356_v11 = vmul.f32 %v1772_v62, %v1970_v5  ;;  %v390_v12 = vadd.f32 %v1983_v16, %v351_v63  ;;  %v391_v13 = vadd.f32 %v1983_v16, %v352_v0  ;;  %v357_v14 = vmul.f32 %v1775_v1, %v1970_v5 }
  0x33   : > { %v358_v15 = vmul.f32 %v1776_v2, %v1970_v5  ;;  %v392_v17 = vadd.f32 %v1983_v16, %v353_v3  ;;  %v393_v21 = vadd.f32 %v1983_v16, %v354_v4  ;;  %v2096_v22 = vadd.f32 %v1983_v16, %v355_v6 }
  0x34   : > { %v2099_v23 = vadd.f32 %v1983_v16, %v356_v11  ;;  %v422_v27 = vmax.f32 %v390_v12, 0.0  ;;  %v423_v28 = vmax.f32 %v391_v13, 0.0  ;;  %v2102_v29 = vadd.f32 %v1983_v16, %v357_v14 }
  0x35   : > { %v2105_v40 = vadd.f32 %v1983_v16, %v358_v15  ;;  %v424_v42 = vmax.f32 %v392_v17, 0.0  ;;  %v425_v43 = vmax.f32 %v393_v21, 0.0  ;;  %v426_v46 = vmax.f32 %v2096_v22, 0.0 }
  0x36   : > { %v427_v47 = vmax.f32 %v2099_v23, 0.0  ;;  %454 = vst [vmem:[%s2001_s11 + $0x60] sm:$0xff] %v422_v27  ;;  %v478_v48 = vmax.f32 %v418_v52, %v422_v27  ;;  %455 = vst [vmem:[%s2001_s11 + $0x68] sm:$0xff] %v423_v28  ;;  %v479_v49 = vmax.f32 %v419_v53, %v423_v28  ;;  %v428_v54 = vmax.f32 %v2102_v29, 0.0 }
  0x37   : > { %v429_v59 = vmax.f32 %v2105_v40, 0.0  ;;  %456 = vst [vmem:[%s2001_s11 + $0x70] sm:$0xff] %v424_v42  ;;  %v480_v60 = vmax.f32 %v420_v55, %v424_v42  ;;  %457 = vst [vmem:[%s2001_s11 + $0x78] sm:$0xff] %v425_v43  ;;  %v481_v57 = vmax.f32 %v421_v56, %v425_v43  ;;  %v1779_v52 = vunpack.c.l.bf16 %v2108_v41 }
  0x38   : > { %458 = vst [vmem:[%s2001_s11 + $0x80] sm:$0xff] %v426_v46  ;;  %459 = vst [vmem:[%s2001_s11 + $0x88] sm:$0xff] %v427_v47  ;;  %v574_v53 = vcombine.high %v478_v48, %v478_v48  ;;  %v581_v58 = vrot.slane %v478_v48, %v1975_v9  ;;  %v591_v62 = vcombine.high %v479_v49, %v479_v49 }
  0x39   : > { %v598_v63 = vrot.slane %v479_v49, %v1975_v9  ;;  %460 = vst [vmem:[%s2001_s11 + $0x90] sm:$0xff] %v428_v54  ;;  %461 = vst [vmem:[%s2001_s11 + $0x98] sm:$0xff] %v429_v59  ;;  %v608_v55 = vcombine.high %v480_v60, %v480_v60  ;;  %v615_v56 = vrot.slane %v480_v60, %v1975_v9 }
  0x3a   : > { %v625_v0 = vcombine.high %v481_v57, %v481_v57  ;;  %v632_v1 = vrot.slane %v481_v57, %v1975_v9  ;;  %v588_v2 = vrot.slane %v574_v53, %v1975_v9  ;;  %v589_v3 = vcombine.high %v581_v58, %v581_v58 }
  0x3b   : > { %v1687_v4 = vrot.slane %v581_v58, 9  ;;  %v2138_v6 = vrot.slane %v591_v62, %v1975_v9  ;;  %v2140_v11 = vcombine.high %v598_v63, %v598_v63  ;;  %v1691_v12 = vrot.slane %v598_v63, 9 }
  0x3c   : > { %v622_v13 = vrot.slane %v608_v55, %v1975_v9  ;;  %v623_v14 = vcombine.high %v615_v56, %v615_v56  ;;  %v590_v15 = vcombine.high %v588_v2, %v588_v2  ;;  %v1688_v17 = vrot.slane %v589_v3, 9 }
  0x3d   : > { %v1689_v21 = vrot.slane %v588_v2, 9  ;;  %v2143_v27 = vmax.f32 %v581_v58, %v1687_v4  ;;  %v2146_v41 = vmax.f32 %v598_v63, %v1691_v12  ;;  %v1695_v43 = vrot.slane %v615_v56, 9  ;;  %v1811_v12 = vld [vmem:[%s1965_s29 + $0x58] sm:$0xff]   ;;  %v1812_v63 = vld [vmem:[%s1965_s29 + $0x60] sm:$0xff]  }
  0x3e   : > { %v624_v42 = vcombine.high %v622_v13, %v622_v13  ;;  %v1690_v48 = vrot.slane %v590_v15, 9  ;;  %v2148_v49 = vmax.f32 %v589_v3, %v1688_v17  ;;  %v1696_v53 = vrot.slane %v623_v14, 9 }
  0x3f   : > { %v2150_v60 = vmax.f32 %v588_v2, %v1689_v21  ;;  %v1697_v62 = vrot.slane %v622_v13, 9  ;;  %v2154_v55 = vmax.f32 %v615_v56, %v1695_v43  ;;  %v2163_v2 = vrot.slane %v625_v0, %v1975_v9 }
  0x40   : > { %v1698_v58 = vrot.slane %v624_v42, 9  ;;  %v2156_v4 = vmax.f32 %v590_v15, %v1690_v48  ;;  %v2166_v17 = vmax.f32 %v623_v14, %v1696_v53  ;;  %v2174_v15 = vcombine.high %v632_v1, %v632_v1  ;;  %v1813_v53 = vld [vmem:[%s1965_s29 + $0x68] sm:$0xff]  }
  0x41   : > { %v2168_v21 = vmax.f32 %v622_v13, %v1697_v62  ;;  %v1699_v43 = vrot.slane %v632_v1, 9  ;;  %v359_v48 = vmul.f32 %v1779_v52, %v1970_v5  ;;  %v360_v3 = vmul.f32 %v1780_v61, %v1970_v5 }
  0x42   : > { %v2170_v57 = vmax.f32 %v624_v42, %v1698_v58  ;;  %v1783_v14 = vunpack.c.l.bf16 %v1811_v12  ;;  %v1784_v42 = vunpack.c.h.bf16 %v1811_v12  ;;  %v1787_v28 = vunpack.c.l.bf16 %v1812_v63 }
  0x43   : > { %v2185_v58 = vmax.f32 %v632_v1, %v1699_v43  ;;  %v398_v56 = vadd.f32 %v1983_v16, %v359_v48  ;;  %v399_v52 = vadd.f32 %v1983_v16, %v360_v3  ;;  %v1788_v45 = vunpack.c.h.bf16 %v1812_v63 }
  0x44   : > { %v361_v61 = vmul.f32 %v1783_v14, %v1970_v5  ;;  %v362_v0 = vmul.f32 %v1784_v42, %v1970_v5  ;;  %v1791_v12 = vunpack.c.l.bf16 %v1813_v53  ;;  %v1792_v38 = vunpack.c.h.bf16 %v1813_v53 }
  0x45   : > { %v430_v13 = vmax.f32 %v398_v56, 0.0  ;;  %v431_v44 = vmax.f32 %v399_v52, 0.0  ;;  %v363_v43 = vmul.f32 %v1787_v28, %v1970_v5  ;;  %v364_v48 = vmul.f32 %v1788_v45, %v1970_v5 }
  0x46   : > { %v400_v62 = vadd.f32 %v1983_v16, %v361_v61  ;;  %v401_v1 = vadd.f32 %v1983_v16, %v362_v0  ;;  %v365_v56 = vmul.f32 %v1791_v12, %v1970_v5  ;;  %v366_v14 = vmul.f32 %v1792_v38, %v1970_v5 }
  0x47   : > { %462 = vst [vmem:[%s2001_s11 + $0xa0] sm:$0xff] %v430_v13  ;;  %v482_v3 = vmax.f32 %v426_v46, %v430_v13  ;;  %463 = vst [vmem:[%s2001_s11 + $0xa8] sm:$0xff] %v431_v44  ;;  %v483_v63 = vmax.f32 %v427_v47, %v431_v44  ;;  %v2204_v28 = vadd.f32 %v1983_v16, %v363_v43 }
  0x48   : > { %v432_v42 = vmax.f32 %v400_v62, 0.0  ;;  %v433_v0 = vmax.f32 %v401_v1, 0.0  ;;  %v2207_v45 = vadd.f32 %v1983_v16, %v364_v48 }
  0x49   : > { %v642_v53 = vcombine.high %v482_v3, %v482_v3  ;;  %v649_v22 = vrot.slane %v482_v3, %v1975_v9  ;;  %v659_v46 = vcombine.high %v483_v63, %v483_v63  ;;  %v666_v23 = vrot.slane %v483_v63, %v1975_v9 }
  0x4a   : > { %464 = vst [vmem:[%s2001_s11 + $0xb0] sm:$0xff] %v432_v42  ;;  %v484_v38 = vmax.f32 %v428_v54, %v432_v42  ;;  %465 = vst [vmem:[%s2001_s11 + $0xb8] sm:$0xff] %v433_v0  ;;  %v485_v44 = vmax.f32 %v429_v59, %v433_v0  ;;  %v2668_v47 = vmax.f32 %v2204_v28, 0.0  ;;  %v2667_v13 = vmax.f32 %v2207_v45, 0.0 }
  0x4b   : > { %v656_v62 = vrot.slane %v642_v53, %v1975_v9  ;;  %v657_v52 = vcombine.high %v649_v22, %v649_v22  ;;  %v1703_v61 = vrot.slane %v649_v22, 9  ;;  %v2221_v12 = vrot.slane %v659_v46, %v1975_v9 }
  0x4c   : > { %v2223_v1 = vcombine.high %v666_v23, %v666_v23  ;;  %v1707_v43 = vrot.slane %v666_v23, 9  ;;  %v676_v29 = vcombine.high %v484_v38, %v484_v38  ;;  %v683_v54 = vrot.slane %v484_v38, %v1975_v9  ;;  %466 = vst [vmem:[%s2001_s11 + $0xc0] sm:$0xff] %v2668_v47  ;;  %467 = vst [vmem:[%s2001_s11 + $0xc8] sm:$0xff] %v2667_v13 }
  0x4d   : > { %v658_v40 = vcombine.high %v656_v62, %v656_v62  ;;  %v1704_v59 = vrot.slane %v657_v52, 9  ;;  %v1705_v48 = vrot.slane %v656_v62, 9  ;;  %v2232_v3 = vmax.f32 %v649_v22, %v1703_v61 }
  0x4e   : > { %v2235_v42 = vmax.f32 %v666_v23, %v1707_v43  ;;  %v690_v0 = vrot.slane %v676_v29, %v1975_v9  ;;  %v691_v53 = vcombine.high %v683_v54, %v683_v54  ;;  %v1711_v47 = vrot.slane %v683_v54, 9 }
  0x4f   : > { %v1706_v46 = vrot.slane %v658_v40, 9  ;;  %v2238_v38 = vmax.f32 %v657_v52, %v1704_v59  ;;  %v2240_v50 = vmax.f32 %v656_v62, %v1705_v48  ;;  %v693_v43 = vcombine.high %v485_v44, %v485_v44  ;;  %v1815_v52 = vld [vmem:[%s1965_s29 + $0x78] sm:$0xff]  }
  0x50   : > { %v692_v13 = vcombine.high %v690_v0, %v690_v0  ;;  %v1712_v22 = vrot.slane %v691_v53, 9  ;;  %v1713_v61 = vrot.slane %v690_v0, 9  ;;  %v2250_v29 = vmax.f32 %v683_v54, %v1711_v47 }
  0x51   : > { %2677 = vst [vmem:[#allocation2_spill] sm:$0xff] %v2240_v50  ;;  %v2244_v63 = vmax.f32 %v658_v40, %v1706_v46  ;;  %v700_v33 = vrot.slane %v485_v44, %v1975_v9  ;;  %v2258_v40 = vrot.slane %v693_v43, %v1975_v9  ;;  %v404_v46 = vadd.f32 %v1983_v16, %v365_v56 }
  0x52   : > { %v1714_v62 = vrot.slane %v692_v13, 9  ;;  %2678 = vst [vmem:[#allocation3_spill] sm:$0xff] %v2250_v29  ;;  %v2252_v59 = vmax.f32 %v691_v53, %v1712_v22  ;;  %v2254_v48 = vmax.f32 %v690_v0, %v1713_v61  ;;  %v405_v23 = vadd.f32 %v1983_v16, %v366_v14 }
  0x53   : > { %2681 = vst [vmem:[#allocation6_spill] sm:$0xff] %v2258_v40  ;;  %v2272_v0 = vcombine.high %v700_v33, %v700_v33  ;;  %v1715_v56 = vrot.slane %v700_v33, 9  ;;  %v436_v14 = vmax.f32 %v404_v46, 0.0  ;;  %v1795_v22 = vunpack.c.l.bf16 %v1814_v32 }
  0x54   : > { %2679 = vst [vmem:[#allocation4_spill] sm:$0xff] %v2252_v59  ;;  %2680 = vst [vmem:[#allocation5_spill] sm:$0xff] %v2254_v48  ;;  %v2264_v26 = vmax.f32 %v692_v13, %v1714_v62  ;;  %v437_v53 = vmax.f32 %v405_v23, 0.0  ;;  %v1796_v13 = vunpack.c.h.bf16 %v1814_v32  ;;  %v1799_v61 = vunpack.c.l.bf16 %v1815_v52 }
  0x55   : > { %2683 = vst [vmem:[#allocation8_spill] sm:$0xff] %v2272_v0  ;;  %v1800_v43 = vunpack.c.h.bf16 %v1815_v52  ;;  %v2275_v47 = vmax.f32 %v700_v33, %v1715_v56  ;;  %468 = vst [vmem:[%s2001_s11 + $0xd0] sm:$0xff] %v436_v14  ;;  %v539_v44 = vcombine.high %v2027_v7, %v2027_v7  ;;  %v1677_v54 = vrot.slane %v2027_v7, 9 }
  0x56   : > { %2682 = vst [vmem:[#allocation7_spill] sm:$0xff] %v2264_v26  ;;  %469 = vst [vmem:[%s2001_s11 + $0xd8] sm:$0xff] %v437_v53  ;;  %v367_v46 = vmul.f32 %v1795_v22, %v1970_v5  ;;  %v368_v23 = vmul.f32 %v1796_v13, %v1970_v5  ;;  %v369_v32 = vmul.f32 %v1799_v61, %v1970_v5 }
  0x57   : > { %2684 = vst [vmem:[#allocation9_spill] sm:$0xff] %v2275_v47  ;;  %v370_v52 = vmul.f32 %v1800_v43, %v1970_v5  ;;  %v1678_v62 = vrot.slane %v539_v44, 9  ;;  %v2290_v33 = vmax.f32 %v2029_v8, %v1676_v19  ;;  %v2293_v56 = vmax.f32 %v2027_v7, %v1677_v54 }
  0x58   : > { %v406_v22 = vadd.f32 %v1983_v16, %v367_v46  ;;  %v407_v13 = vadd.f32 %v1983_v16, %v368_v23  ;;  %v408_v5 = vadd.f32 %v1983_v16, %v369_v32  ;;  %v2687_v32 = vrot.slane %v2037_v24, %v1977_v10 }
  0x59   : > { %v409_v61 = vadd.f32 %v1983_v16, %v370_v52  ;;  %v2307_v7 = vmax.f32 %v539_v44, %v1678_v62  ;;  %v2686_v62 = vrot.slane %v2032_v18, %v1977_v10  ;;  %v2326_v54 = vcombine.high %v2052_v34, %v2052_v34 }
  0x5a   : > { %v438_v16 = vmax.f32 %v406_v22, 0.0  ;;  %v439_v43 = vmax.f32 %v407_v13, 0.0  ;;  %v440_v46 = vmax.f32 %v408_v5, 0.0  ;;  %v1685_v22 = vrot.slane %v2052_v34, 9 }
  0x5b   : > { %v441_v23 = vmax.f32 %v409_v61, 0.0  ;;  %v1419_v52 = vsel %vm1418_vm0, %v2687_v32, %v2686_v62  ;;  %v2688_v13 = vmax.f32 %v2204_v28, 0.0  ;;  %v2689_v61 = vmax.f32 %v2207_v45, 0.0 }
  0x5c   : > { %470 = vst [vmem:[%s2001_s11 + $0xe0] sm:$0xff] %v438_v16  ;;  %471 = vst [vmem:[%s2001_s11 + $0xe8] sm:$0xff] %v439_v43  ;;  %v488_v18 = vmax.f32 %v436_v14, %v440_v46  ;;  %v2690_v62 = vrot.slane %v2039_v25, %v1977_v10  ;;  %v1686_v28 = vrot.slane %v2326_v54, 9  ;;  %v2354_v14 = vmax.f32 %v2052_v34, %v1685_v22 }
  0x5d   : > { %v486_v5 = vmax.f32 %v2688_v13, %v438_v16  ;;  %v487_v44 = vmax.f32 %v2689_v61, %v439_v43  ;;  %472 = vst [vmem:[%s2001_s11 + $0xf0] sm:$0xff] %v440_v46  ;;  %473 = vst [vmem:[%s2001_s11 + $0xf8] sm:$0xff] %v441_v23  ;;  %v489_v24 = vmax.f32 %v437_v53, %v441_v23  ;;  %v2691_v16 = vrot.slane %v2062_v39, 9 }
  0x5e   : > { %v1421_v32 = vsel %vm1420_vm1, %v2690_v62, %v1419_v52  ;;  %v744_v25 = vcombine.high %v488_v18, %v488_v18  ;;  %v751_v52 = vrot.slane %v488_v18, %v1975_v9 }
  0x5f   : > { %v2351_v45 = vmax.f32 %v2062_v39, %v2691_v16  ;;  %v710_v53 = vcombine.high %v486_v5, %v486_v5  ;;  %v717_v43 = vrot.slane %v486_v5, %v1975_v9  ;;  %v727_v46 = vcombine.high %v487_v44, %v487_v44 }
  0x60   : > { %v734_v23 = vrot.slane %v487_v44, %v1975_v9  ;;  %v761_v13 = vcombine.high %v489_v24, %v489_v24  ;;  %v768_v61 = vrot.slane %v489_v24, %v1975_v9  ;;  %v758_v16 = vrot.slane %v744_v25, %v1975_v9 }
  0x61   : > { %v724_v39 = vrot.slane %v710_v53, %v1975_v9  ;;  %v725_v34 = vcombine.high %v717_v43, %v717_v43  ;;  %v1719_v22 = vrot.slane %v717_v43, 9  ;;  %v2362_v62 = vrot.slane %v727_v46, %v1975_v9 }
  0x62   : > { %v2364_v5 = vcombine.high %v734_v23, %v734_v23  ;;  %v1723_v44 = vrot.slane %v734_v23, 9  ;;  %v759_v19 = vcombine.high %v751_v52, %v751_v52  ;;  %v760_v46 = vcombine.high %v758_v16, %v758_v16 }
  0x63   : > { %2692 = vst [vmem:[#allocation10_spill] sm:$0xff] %v2362_v62  ;;  %v726_v18 = vcombine.high %v724_v39, %v724_v39  ;;  %v1720_v24 = vrot.slane %v725_v34, 9  ;;  %v1721_v8 = vrot.slane %v724_v39, 9  ;;  %v2369_v48 = vmax.f32 %v717_v43, %v1719_v22 }
  0x64   : > { %v1724_v53 = vrot.slane %v2364_v5, 9  ;;  %v2372_v59 = vmax.f32 %v734_v23, %v1723_v44  ;;  %v1727_v62 = vrot.slane %v751_v52, 9  ;;  %v1728_v0 = vrot.slane %v759_v19, 9 }
  0x65   : > { %v1722_v29 = vrot.slane %v726_v18, 9  ;;  %v2374_v47 = vmax.f32 %v725_v34, %v1720_v24  ;;  %v2376_v26 = vmax.f32 %v724_v39, %v1721_v8  ;;  %v1357_v25 = vrot.slane %v2369_v48, %v1977_v10 }
  0x66   : > { %v1729_v40 = vrot.slane %v758_v16, 9  ;;  %v1730_v50 = vrot.slane %v760_v46, 9  ;;  %v2380_v43 = vmax.f32 %v751_v52, %v1727_v62  ;;  %v2389_v8 = vrot.slane %v761_v13, %v1975_v9 }
  0x67   : > { %v2382_v22 = vmax.f32 %v726_v18, %v1722_v29  ;;  %v1361_v23 = vrot.slane %v2374_v47, %v1977_v10  ;;  %v2391_v39 = vmax.f32 %v759_v19, %v1728_v0  ;;  %v2399_v29 = vcombine.high %v768_v61, %v768_v61 }
  0x68   : > { %v2393_v44 = vmax.f32 %v758_v16, %v1729_v40  ;;  %v2395_v24 = vmax.f32 %v760_v46, %v1730_v50  ;;  %v1389_v52 = vrot.slane %v2380_v43, %v1977_v10  ;;  %v1731_v62 = vrot.slane %v768_v61, 9 }
  0x69   : > { %v2693_v18 = vrot.slane %v2045_v31, %v1977_v10  ;;  %v1049_v9 = vmax.f32 %v2326_v54, %v1686_v28  ;;  %v1393_v40 = vrot.slane %v2391_v39, %v1977_v10  ;;  %v2694_v0 = vrot.slane %v2035_v20, %v1977_v10 }
  0x6a   : > { %v1397_v50 = vrot.slane %v2393_v44, %v1977_v10  ;;  %v1209_v13 = vrot.slane %v2058_v37, %v1977_v10  ;;  %v1732_v31 = vrot.slane %v2399_v29, 9  ;;  %v2417_v16 = vmax.f32 %v768_v61, %v1731_v62 }
  0x6b   : > { %v1423_v34 = vsel %vm1422_vm2, %v2693_v18, %v1421_v32  ;;  %v2695_v54 = vrot.slane %v2290_v33, %v1977_v10  ;;  %v1213_v32 = vrot.slane %v2076_v51, %v1977_v10  ;;  %v2696_v37 = vrot.slane %v2293_v56, %v1977_v10 }
  0x6c   : > { %v1425_v19 = vsel %vm1424_vm3, %v2694_v0, %v1423_v34  ;;  %v1217_v61 = vrot.slane %v2351_v45, %v1977_v10  ;;  %v1221_v46 = vrot.slane %v2354_v14, %v1977_v10  ;;  %v1225_v34 = vrot.slane %v1049_v9, %v1977_v10 }
  0x6d   : > { %v1427_v20 = vsel %vm1426_vm4, %v2695_v54, %v1425_v19  ;;  %v2697_v33 = vrot.slane %v2307_v7, %v1977_v10  ;;  %v2698_v51 = vrot.slane %v2043_v30, %v1977_v10  ;;  %v2699_v56 = vrot.slane %v2054_v35, %v1977_v10 }
  0x6e   : > { %v1429_v28 = vsel %vm1428_vm5, %v2696_v37, %v1427_v20  ;;  %v607_v45 = vcombine.high %v2138_v6, %v2138_v6  ;;  %v1693_v14 = vrot.slane %v2138_v6, 9  ;;  %v2700_v9 = vrot.slane %v2056_v36, %v1977_v10 }
  0x6f   : > { %v1431_v62 = vsel %vm1430_vm6, %v2697_v33, %v1429_v28  ;;  %v1432_v18 = vsel %vm1418_vm0, %v2699_v56, %v2698_v51  ;;  %v2701_v0 = vrot.slane %v2140_v11, 9  ;;  %v1241_v35 = vrot.slane %v2156_v4, %v1977_v10 }
  0x70   : > { %1489 = vst [vmem:[%s2422_s25] sm:$0xff] %v1431_v62  ;;  %v1433_v7 = vsel %vm1420_vm1, %v2700_v9, %v1432_v18  ;;  %v1245_v19 = vrot.slane %v2146_v41, %v1977_v10  ;;  %v1694_v20 = vrot.slane %v607_v45, 9  ;;  %v1056_v37 = vmax.f32 %v2138_v6, %v1693_v14 }
  0x71   : > { %v1055_v30 = vmax.f32 %v2140_v11, %v2701_v0  ;;  %v1434_v54 = vsel %vm1422_vm2, %v1209_v13, %v1433_v7  ;;  %v2702_v36 = vrot.slane %v2143_v27, %v1977_v10  ;;  %v2703_v28 = vrot.slane %v2148_v49, %v1977_v10 }
  0x72   : > { %v1435_v11 = vsel %vm1424_vm3, %v1213_v32, %v1434_v54  ;;  %v2704_v41 = vrot.slane %v2150_v60, %v1977_v10  ;;  %v641_v6 = vcombine.high %v2163_v2, %v2163_v2  ;;  %v1057_v62 = vmax.f32 %v607_v45, %v1694_v20 }
  0x73   : > { %v1439_v33 = vsel %vm1418_vm0, %v2703_v28, %v2702_v36  ;;  %v1249_v4 = vrot.slane %v1055_v30, %v1977_v10  ;;  %v1436_v27 = vsel %vm1426_vm4, %v1217_v61, %v1435_v11  ;;  %v1253_v49 = vrot.slane %v1056_v37, %v1977_v10 }
  0x74   : > { %v1440_v13 = vsel %vm1420_vm1, %v2704_v41, %v1439_v33  ;;  %v1437_v32 = vsel %vm1428_vm5, %v1221_v46, %v1436_v27  ;;  %v1701_v18 = vrot.slane %v2163_v2, 9  ;;  %v1702_v60 = vrot.slane %v641_v6, 9 }
  0x75   : > { %v1441_v51 = vsel %vm1422_vm2, %v1241_v35, %v1440_v13  ;;  %v1438_v14 = vsel %vm1430_vm6, %v1225_v34, %v1437_v32  ;;  %v1257_v9 = vrot.slane %v1057_v62, %v1977_v10  ;;  %v2705_v61 = vrot.slane %v2174_v15, 9 }
  0x76   : > { %v1442_v56 = vsel %vm1424_vm3, %v1245_v19, %v1441_v51  ;;  %1490 = vst [vmem:[%s2422_s25 + $0x8] sm:$0xff] %v1438_v14  ;;  %v1064_v46 = vmax.f32 %v2163_v2, %v1701_v18  ;;  %v1065_v30 = vmax.f32 %v641_v6, %v1702_v60  ;;  %v1273_v35 = vrot.slane %v2170_v57, %v1977_v10  ;;  %v2712_v51 = vld [vmem:[#allocation2_spill] sm:$0xff] }
  0x77   : > { %v1443_v7 = vsel %vm1426_vm4, %v1249_v4, %v1442_v56  ;;  %v1063_v45 = vmax.f32 %v2174_v15, %v2705_v61  ;;  %v1277_v34 = vrot.slane %v2185_v58, %v1977_v10  ;;  %v2706_v20 = vrot.slane %v2154_v55, %v1977_v10  ;;  %v2714_v60 = vld [vmem:[#allocation6_spill] sm:$0xff] }
  0x78   : > { %v1444_v0 = vsel %vm1428_vm5, %v1253_v49, %v1443_v7  ;;  %v2707_v15 = vrot.slane %v2166_v17, %v1977_v10  ;;  %v1285_v2 = vrot.slane %v1064_v46, %v1977_v10  ;;  %v1289_v57 = vrot.slane %v1065_v30, %v1977_v10  ;;  %v2715_v46 = vld [vmem:[#allocation8_spill] sm:$0xff] }
  0x79   : > { %v1445_v19 = vsel %vm1430_vm6, %v1257_v9, %v1444_v0  ;;  %v1281_v54 = vrot.slane %v1063_v45, %v1977_v10  ;;  %v2708_v36 = vrot.slane %v2168_v21, %v1977_v10  ;;  %v675_v28 = vcombine.high %v2221_v12, %v2221_v12 }
  0x7a   : > { %v1446_v37 = vsel %vm1418_vm0, %v2707_v15, %v2706_v20  ;;  %1491 = vst [vmem:[%s2422_s25 + $0x10] sm:$0xff] %v1445_v19  ;;  %v1709_v33 = vrot.slane %v2221_v12, 9  ;;  %v2709_v17 = vrot.slane %v2223_v1, 9  ;;  %v1305_v4 = vrot.slane %v2244_v63, %v1977_v10  ;;  %v2718_v15 = vld [vmem:[#allocation9_spill] sm:$0xff] }
  0x7b   : > { %v1447_v58 = vsel %vm1420_vm1, %v2708_v36, %v1446_v37  ;;  %v1710_v21 = vrot.slane %v675_v28, 9  ;;  %v1309_v13 = vrot.slane %v2235_v42, %v1977_v10  ;;  %v2710_v6 = vrot.slane %v2232_v3, %v1977_v10 }
  0x7c   : > { %v1448_v55 = vsel %vm1422_vm2, %v1273_v35, %v1447_v58  ;;  %v1071_v11 = vmax.f32 %v2223_v1, %v2709_v17  ;;  %v2711_v27 = vrot.slane %v2238_v38, %v1977_v10  ;;  %v1072_v49 = vmax.f32 %v2221_v12, %v1709_v33  ;;  %v2719_v58 = vld [vmem:[#allocation3_spill] sm:$0xff] }
  0x7d   : > { %v1449_v41 = vsel %vm1424_vm3, %v1277_v34, %v1448_v55  ;;  %v2713_v32 = vrot.slane %v2712_v51, %v1977_v10  ;;  %v1073_v18 = vmax.f32 %v675_v28, %v1710_v21  ;;  %v709_v38 = vcombine.high %v2714_v60, %v2714_v60  ;;  %v2721_v55 = vld [vmem:[#allocation4_spill] sm:$0xff] }
  0x7e   : > { %v1453_v62 = vsel %vm1418_vm0, %v2711_v27, %v2710_v6  ;;  %v1450_v1 = vsel %vm1426_vm4, %v1281_v54, %v1449_v41  ;;  %v1313_v63 = vrot.slane %v1071_v11, %v1977_v10  ;;  %v1317_v9 = vrot.slane %v1072_v49, %v1977_v10  ;;  %v2717_v54 = vld [vmem:[#allocation7_spill] sm:$0xff] }
  0x7f   : > { %v1454_v56 = vsel %vm1420_vm1, %v2713_v32, %v1453_v62  ;;  %v1451_v42 = vsel %vm1428_vm5, %v1285_v2, %v1450_v1  ;;  %v1717_v7 = vrot.slane %v2714_v60, 9  ;;  %v1321_v61 = vrot.slane %v1073_v18, %v1977_v10 }
  0x80   : > { %v1455_v3 = vsel %vm1422_vm2, %v1305_v4, %v1454_v56  ;;  %v1452_v14 = vsel %vm1430_vm6, %v1289_v57, %v1451_v42  ;;  %v1718_v0 = vrot.slane %v709_v38, 9  ;;  %v2716_v30 = vrot.slane %v2715_v46, 9  ;;  %v2723_v4 = vld [vmem:[#allocation5_spill] sm:$0xff] }
  0x81   : > { %v1456_v12 = vsel %vm1424_vm3, %v1309_v13, %v1455_v3  ;;  %1492 = vst [vmem:[%s2422_s25 + $0x18] sm:$0xff] %v1452_v14  ;;  %v1080_v34 = vmax.f32 %v2714_v60, %v1717_v7  ;;  %v1337_v20 = vrot.slane %v2717_v54, %v1977_v10  ;;  %v1341_v37 = vrot.slane %v2718_v15, %v1977_v10  ;;  %v2725_v13 = vld [vmem:[#allocation10_spill] sm:$0xff] }
  0x82   : > { %v1457_v45 = vsel %vm1426_vm4, %v1313_v63, %v1456_v12  ;;  %v1079_v35 = vmax.f32 %v2715_v46, %v2716_v30  ;;  %v1081_v57 = vmax.f32 %v709_v38, %v1718_v0  ;;  %v2720_v28 = vrot.slane %v2719_v58, %v1977_v10 }
  0x83   : > { %v1458_v19 = vsel %vm1428_vm5, %v1317_v9, %v1457_v45  ;;  %v2722_v33 = vrot.slane %v2721_v55, %v1977_v10  ;;  %v1349_v11 = vrot.slane %v1080_v34, %v1977_v10  ;;  %v2724_v41 = vrot.slane %v2723_v4, %v1977_v10 }
  0x84   : > { %v1459_v2 = vsel %vm1430_vm6, %v1321_v61, %v1458_v19  ;;  %v1345_v36 = vrot.slane %v1079_v35, %v1977_v10  ;;  %v743_v6 = vcombine.high %v2725_v13, %v2725_v13  ;;  %v1725_v27 = vrot.slane %v2725_v13, 9 }
  0x85   : > { %v1460_v17 = vsel %vm1418_vm0, %v2722_v33, %v2720_v28  ;;  %1493 = vst [vmem:[%s2422_s25 + $0x20] sm:$0xff] %v1459_v2  ;;  %v1353_v62 = vrot.slane %v1081_v57, %v1977_v10  ;;  %v1087_v49 = vmax.f32 %v2364_v5, %v1724_v53  ;;  %v1369_v63 = vrot.slane %v2382_v22, %v1977_v10 }
  0x86   : > { %v1461_v21 = vsel %vm1420_vm1, %v2724_v41, %v1460_v17  ;;  %v1726_v32 = vrot.slane %v743_v6, 9  ;;  %v1088_v56 = vmax.f32 %v2725_v13, %v1725_v27  ;;  %v1373_v42 = vrot.slane %v2372_v59, %v1977_v10 }
  0x87   : > { %v1462_v1 = vsel %vm1422_vm2, %v1337_v20, %v1461_v21  ;;  %v1377_v3 = vrot.slane %v1087_v49, %v1977_v10  ;;  %v1467_v5 = vsel %vm1418_vm0, %v1361_v23, %v1357_v25  ;;  %v777_v53 = vcombine.high %v2389_v8, %v2389_v8 }
  0x88   : > { %v1463_v51 = vsel %vm1424_vm3, %v1341_v37, %v1462_v1  ;;  %v1089_v60 = vmax.f32 %v743_v6, %v1726_v32  ;;  %v1381_v59 = vrot.slane %v1088_v56, %v1977_v10  ;;  %v2726_v38 = vrot.slane %v2376_v26, %v1977_v10 }
  0x89   : > { %v1464_v18 = vsel %vm1426_vm4, %v1345_v36, %v1463_v51  ;;  %v1733_v47 = vrot.slane %v2389_v8, 9  ;;  %v1734_v25 = vrot.slane %v777_v53, 9  ;;  %v1095_v7 = vmax.f32 %v2399_v29, %v1732_v31 }
  0x8a   : > { %v1465_v22 = vsel %vm1428_vm5, %v1349_v11, %v1464_v18  ;;  %v1468_v14 = vsel %vm1420_vm1, %v2726_v38, %v1467_v5  ;;  %v1385_v23 = vrot.slane %v1089_v60, %v1977_v10  ;;  %v1401_v26 = vrot.slane %v2395_v24, %v1977_v10 }
  0x8b   : > { %v1466_v48 = vsel %vm1430_vm6, %v1353_v62, %v1465_v22  ;;  %v1469_v9 = vsel %vm1422_vm2, %v1369_v63, %v1468_v14  ;;  %v1096_v45 = vmax.f32 %v2389_v8, %v1733_v47  ;;  %v1097_v0 = vmax.f32 %v777_v53, %v1734_v25 }
  0x8c   : > { %1494 = vst [vmem:[%s2422_s25 + $0x28] sm:$0xff] %v1466_v48  ;;  %v1470_v12 = vsel %vm1424_vm3, %v1373_v42, %v1469_v9  ;;  %v1405_v46 = vrot.slane %v2417_v16, %v1977_v10  ;;  %v1409_v35 = vrot.slane %v1095_v7, %v1977_v10  ;;  %v1474_v24 = vsel %vm1418_vm0, %v1393_v40, %v1389_v52 }
  0x8d   : > { %v1471_v61 = vsel %vm1426_vm4, %v1377_v3, %v1470_v12  ;;  %v1413_v8 = vrot.slane %v1096_v45, %v1977_v10  ;;  %v1475_v31 = vsel %vm1420_vm1, %v1397_v50, %v1474_v24  ;;  %v1417_v16 = vrot.slane %v1097_v0, %v1977_v10 }
  0x8e   : > { %v1472_v30 = vsel %vm1428_vm5, %v1381_v59, %v1471_v61  ;;  %v1476_v19 = vsel %vm1422_vm2, %v1401_v26, %v1475_v31 }
  0x8f   : > { %v1473_v29 = vsel %vm1430_vm6, %v1385_v23, %v1472_v30  ;;  %v1477_v43 = vsel %vm1424_vm3, %v1405_v46, %v1476_v19 }
  0x90   : > { %1495 = vst [vmem:[%s2422_s25 + $0x30] sm:$0xff] %v1473_v29  ;;  %v1478_v39 = vsel %vm1426_vm4, %v1409_v35, %v1477_v43 }
  0x91   : > { %v1479_v52 = vsel %vm1428_vm5, %v1413_v8, %v1478_v39 }
  0x92   : > { %v1480_v40 = vsel %vm1430_vm6, %v1417_v16, %v1479_v52 }
  0x93   : > { %1496 = vst [vmem:[%s2422_s25 + $0x38] sm:$0xff] %v1480_v40 }
  0x94 PF: > { %s15_s19 = sadd.s32 1, %s1895_s19   ;;  %s2727_s15 = smov %s1887_s17 }
  0x95   : > { %p12_p8 = scmp.ge.s32.totalorder %s15_s19, 10   ;;  %s2728_s16 = smov %s1891_s18 }
  0x96   : > { %s2729_s17 = smov %s2732_s20  ;;  %s2730_s18 = smov %s2736_s21 }
  0x97   :  { %14 = sbr.rel (!%p12_p8) target bundleno = 3 (0x3), region = 74 }

// kernel: encoder_block_forward.4
= control target key start
LH: loop header
LB: loop body
LE: loop exit
PB: predicated region body
PF: predicated region fallthrough
CT: control target
= control target key end

     0   :  { %s4723_s24 = smov 0   ;;  %s4725_s25 = smov 0   ;;  %s6061_s0 = inlined_call_operand.vmem [shape: bf16[2,32,32,128], index: 0, kind: input, shape index: {}, may-alias: {0,1,2}]   ;;  %s6062_s1 = inlined_call_operand.vmem [shape: bf16[2,32,32,128], index: 1, kind: input, shape index: {}, may-alias: {0,1,2}]   ;;  %s6063_s2 = inlined_call_operand.vmem [shape: bf16[2,32,32,128], index: 2, kind: input, shape index: {}, may-alias: {0,1,2}]   ;;  %s6064_s3 = inlined_call_operand.vmem [shape: bf16[3,384,128], index: 3, kind: input, shape index: {}]   ;;  %s6065_s4 = inlined_call_operand.vmem [shape: f32[1,128], index: 4, kind: input, shape index: {}]   ;;  %s6066_s5 = inlined_call_operand.vmem [shape: f32[1,128], index: 5, kind: input, shape index: {}]   ;;  %s6067_s6 = inlined_call_operand.vmem [shape: bf16[2,32,32,128], index: 6, kind: output, shape index: {0}]   ;;  %s6068_s7 = inlined_call_operand.vmem [shape: f32[2,4,2,128], index: 7, kind: output, shape index: {1}]  }
   0x1   :  { %s4727_s26 = smov 0   ;;  %s4729_s27 = smov 0  }
   0x2   :  { %s4731_s28 = smov 0  }
   0x3 LB: > { %s27_s29 = sadd.s32 1, %s4673_s26  ;;  %s30_s30 = sadd.s32 1, %s4677_s27  ;;  %s4681_s28 = sphi %s4731_s28, %s18_s28   ;;  %s4677_s27 = sphi %s4729_s27, %s6101_s27   ;;  %s4673_s26 = sphi %s4727_s26, %s6100_s26   ;;  %s4669_s25 = sphi %s4725_s25, %s6099_s25   ;;  %s4665_s24 = sphi %s4723_s24, %s6098_s24  }
   0x4   : > { %p28_p0 = scmp.ge.s32.totalorder %s27_s29, 4  ;;  %p3497_p1 = scmp.ge.s32.totalorder %s4681_s28, 1 }
   0x5   : > { %p328_p2 = scmp.lt.s32.totalorder %s4681_s28, 9 }
   0x6   : > { %s6103_s29 = smov (%p28_p0, %s27_s29), 0  ;;  %s6105_s30 = smov (!%p28_p0, %s30_s30), %s4677_s27 }
   0x7   : > { %p329_p3 = pnand %p3497_p1, %p328_p2  ;;  %p32_p4 = scmp.ge.s32.totalorder %s6105_s30, 2 }
   0x9   : > { %s6107_s30 = smov (%p32_p4, %s6105_s30), 0  ;;  %332 = sbr.rel (%p329_p3) target bundleno = 562 (0x232), region = 44 }
   0xe   : > { %v4569_v0 = vld [vmem:[%s6064_s3 + $0x78] sm:$0xff]   ;;  %s4759_s10 = sshll.u32 %s4665_s24, 3  ;;  %p405_p5 = scmp.lt.s32.totalorder %s4669_s25, 1  ;;  %v4571_v2 = vld [vmem:[%s6064_s3 + $0x70] sm:$0xff]   ;;  %v4573_v4 = vld [vmem:[%s6064_s3 + $0x68] sm:$0xff]   ;;  %vm896_vm0 = vcmask 1040384  }
   0xf   : > { %v4570_v1 = vld [vmem:[%s6064_s3 + $0x38] sm:$0xff]   ;;  %4513 = vmatprep.subr.bf16.mxu1 %v4569_v0  ;;  %3961 = vmatprep.subr.bf16.mxu0 %v4569_v0  ;;  %p407_p6 = scmp.lt.s32.totalorder %s4759_s10, 31  ;;  %v4572_v3 = vld [vmem:[%s6064_s3 + $0x30] sm:$0xff]   ;;  %v4574_v5 = vld [vmem:[%s6064_s3 + $0x28] sm:$0xff]   ;;  %s3503_s12 = sadd.s32 4294967295, %s4759_s10  ;;  %vm1111_vm5 = vcmask 1046528  }
  0x10   : > { %4521 = vmatpush3.bf16.msra.mxu1 %v4570_v1  ;;  %3962 = vmatpush3.bf16.msra.mxu0 %v4570_v1  ;;  %s6109_s25 = smov (!%p405_p5, %s4669_s25), 1  ;;  %v4575_v6 = vld [vmem:[%s6064_s3 + $0x60] sm:$0xff]   ;;  %p417_p7 = scmp.gt.s32.totalorder %s3503_s12, 0  ;;  %v4577_v8 = vld [vmem:[%s6064_s3 + $0x58] sm:$0xff]   ;;  %v4579_v10 = vld [vmem:[%s6064_s3 + $0x50] sm:$0xff]  }
  0x11   : > { %4514 = vmatprep.subr.bf16.mxu1 %v4571_v2  ;;  %3963 = vmatprep.subr.bf16.mxu0 %v4571_v2  ;;  %s408_s19 = scalar_select %p407_p6, %s4759_s10, 31  ;;  %v4576_v7 = vld [vmem:[%s6064_s3 + $0x20] sm:$0xff]   ;;  %v4578_v9 = vld [vmem:[%s6064_s3 + $0x18] sm:$0xff]   ;;  %v4580_v17 = vld [vmem:[%s6064_s3 + $0x10] sm:$0xff]   ;;  %vm715_vm1 = vsmask.f32 256 }
  0x12   : > { %s4778_s20 = sshll.u32 %s6109_s25, 7  ;;  %p3504_p8 = scmp.lt.s32.totalorder %s3503_s12, 31  ;;  %v4813_v11 = vld [vmem:[%s6065_s4] ss:$0 sm:$0xff]  ;;  %v4581_v20 = vld [vmem:[%s6064_s3 + $0x48] sm:$0xff]   ;;  %v4861_v51 = vld [vmem:[%s6064_s3 + $0xb8] sm:$0xff]  }
  0x13   : > { %s3499_s21 = sshll.u32 %s408_s19, 2  ;;  %s6111_s12 = smov (!%p417_p7, %s3503_s12), 0  ;;  %v4819_v13 = vld [vmem:[%s6066_s5] ss:$0 sm:$0xff]  ;;  %v4582_v35 = vld [vmem:[%s6064_s3 + $0x8] sm:$0xff]   ;;  %v4872_v55 = vld [vmem:[%s6064_s3 + $0x178] sm:$0xff]  }
  0x14   : > { %4522 = vmatpush3.bf16.msra.mxu1 %v4572_v3  ;;  %3964 = vmatpush3.bf16.msra.mxu0 %v4572_v3  ;;  %s4784_s8 = sadd.s32 %s4778_s20, %s3499_s21  ;;  %s6113_s12 = smov (!%p3504_p8, %s6111_s12), 31  ;;  %v4583_v40 = vld [vmem:[%s6064_s3 + $0x40] sm:$0xff]   ;;  %vm918_vm3 = vsmask.f32 7424  ;;  %vm4878_vm4 = vmand %vm896_vm0, %vm715_vm1 }
  0x15   : > { %4515 = vmatprep.subr.bf16.mxu1 %v4573_v4  ;;  %3965 = vmatprep.subr.bf16.mxu0 %v4573_v4  ;;  %s3501_s13 = sshll.u32 %s4784_s8, 2  ;;  %s3509_s16 = sshll.u32 %s6113_s12, 2  ;;  %v4584_v45 = vld [vmem:[%s6064_s3] sm:$0xff]  }
  0x16   : > { %s4802_s21 = scalar_lea.vmem %s6061_s0, %s3501_s13  ;;  %s425_s19 = sadd.s32 %s3509_s16, %s4778_s20 }
  0x17   : > { %v3938_v12 = vld [vmem:[%s4802_s21 + $0x50] sm:$0xff]   ;;  %v3939_v16 = vld [vmem:[%s4802_s21 + $0x58] sm:$0xff]   ;;  %p659_p9 = scmp.gt.s32.totalorder %s4665_s24, 0  ;;  %s3511_s9 = sshll.u32 %s425_s19, 2  ;;  %v3940_v56 = vld [vmem:[%s4802_s21 + $0x60] sm:$0xff]  }
  0x18   : > { %4523 = vmatpush3.bf16.msra.mxu1 %v4574_v5  ;;  %3966 = vmatpush3.bf16.msra.mxu0 %v4574_v5  ;;  %v3811_v14 = vunpack.c.l.bf16 %v3938_v12  ;;  %v3812_v15 = vunpack.c.h.bf16 %v3938_v12  ;;  %v3815_v18 = vunpack.c.l.bf16 %v3939_v16  ;;  %v3816_v19 = vunpack.c.h.bf16 %v3939_v16  ;;  %s427_s16 = scalar_lea.vmem %s6062_s1, %s3511_s9  ;;  %v3941_v57 = vld [vmem:[%s4802_s21 + $0x68] sm:$0xff]   ;;  %p462_p11 = scmp.lt.s32.totalorder %s4665_s24, 3 }
  0x19   : > { %4516 = vmatprep.subr.bf16.mxu1 %v4575_v6  ;;  %3967 = vmatprep.subr.bf16.mxu0 %v4575_v6  ;;  %v3834_v25 = vld [vmem:[%s427_s16] sm:$0xff]   ;;  %v3944_v26 = vld [vmem:[%s427_s16 + $0x8] sm:$0xff]   ;;  %s682_s17 = scalar_select %p659_p9, 1, 0  ;;  %v3819_v4 = vunpack.c.l.bf16 %v3940_v56 }
  0x1a   : > { %v561_v21 = vmul.f32 %v3811_v14, %v4813_v11  ;;  %v562_v22 = vmul.f32 %v3812_v15, %v4813_v11  ;;  %v563_v23 = vmul.f32 %v3815_v18, %v4813_v11  ;;  %v564_v24 = vmul.f32 %v3816_v19, %v4813_v11  ;;  %s5938_s14 = scalar_lea.vmem %s6067_s6, %s3501_s13  ;;  %s6119_s24 = smov (!%p462_p11, %s4665_s24), 3 }
  0x1b   : > { %v3835_v29 = vunpack.c.l.bf16 %v3834_v25  ;;  %v3836_v30 = vunpack.c.h.bf16 %v3834_v25  ;;  %v3839_v33 = vunpack.c.l.bf16 %v3944_v26  ;;  %v3840_v34 = vunpack.c.h.bf16 %v3944_v26  ;;  %s3523_s8 = sshll.u32 %s6109_s25, 2 }
  0x1c   : > { %4524 = vmatpush3.bf16.msra.mxu1 %v4576_v7  ;;  %3968 = vmatpush3.bf16.msra.mxu0 %v4576_v7  ;;  %v599_v27 = vadd.f32 %v4819_v13, %v561_v21  ;;  %v600_v28 = vadd.f32 %v4819_v13, %v562_v22  ;;  %v601_v31 = vadd.f32 %v4819_v13, %v563_v23  ;;  %v683_v49 = vstv %s682_s17  ;;  %s465_s13 = sadd.s32 %s3523_s8, %s6119_s24 }
  0x1d   : > { %4517 = vmatprep.subr.bf16.mxu1 %v4577_v8  ;;  %3969 = vmatprep.subr.bf16.mxu0 %v4577_v8  ;;  %v602_v32 = vadd.f32 %v4819_v13, %v564_v24  ;;  %v668_v38 = vmul.f32 %v3835_v29, %v4813_v11  ;;  %v669_v39 = vmul.f32 %v3836_v30, %v4813_v11  ;;  %vm4865_vm2 = vcmp.eq.s32.totalorder %v683_v49, 1  ;;  %s3524_s15 = sshll.u32 %s465_s13, 1 }
  0x1e   : > { %v631_v36 = vmax.f32 %v599_v27, 0.0  ;;  %v632_v37 = vmax.f32 %v600_v28, 0.0  ;;  %v633_v41 = vmax.f32 %v601_v31, 0.0  ;;  %v670_v43 = vmul.f32 %v3839_v33, %v4813_v11  ;;  %s467_s17 = scalar_lea.vmem %s6068_s7, %s3524_s15 }
  0x1f   : > { %v634_v42 = vmax.f32 %v602_v32, 0.0  ;;  %v671_v44 = vmul.f32 %v3840_v34, %v4813_v11  ;;  %v672_v47 = vadd.f32 %v4819_v13, %v668_v38  ;;  %v673_v48 = vadd.f32 %v4819_v13, %v669_v39 }
  0x20   : > { %4525 = vmatpush3.bf16.msra.mxu1 %v4578_v9  ;;  %3970 = vmatpush3.bf16.msra.mxu0 %v4578_v9  ;;  %v653_v46 = vpack.c.bf16 %v632_v37, %v631_v36  ;;  %v674_v52 = vadd.f32 %v4819_v13, %v670_v43  ;;  %v3820_v8 = vunpack.c.h.bf16 %v3940_v56  ;;  %v3823_v9 = vunpack.c.l.bf16 %v3941_v57 }
  0x21   : > { %4518 = vmatprep.subr.bf16.mxu1 %v4579_v10  ;;  %3971 = vmatprep.subr.bf16.mxu0 %v4579_v10  ;;  %v654_v50 = vpack.c.bf16 %v634_v42, %v633_v41  ;;  %v675_v53 = vadd.f32 %v4819_v13, %v671_v44  ;;  %v676_v60 = vmax.f32 %v672_v47, 0.0  ;;  %v677_v61 = vmax.f32 %v673_v48, 0.0  ;;  %v3770_v44 = vld [vmem:[%s4802_s21] sm:$0xff]  }
  0x22   : > { %v807_v58 = vshrl.u32 %v653_v46, 16  ;;  %v810_v59 = vshll.u32 %v653_v46, 16  ;;  %v678_v0 = vmax.f32 %v674_v52, 0.0  ;;  %v3824_v14 = vunpack.c.h.bf16 %v3941_v57  ;;  %v4587_v52 = vld [vmem:[%s6064_s3 + $0xb0] sm:$0xff]  }
  0x23   : > { %v814_v62 = vshrl.u32 %v654_v50, 16  ;;  %v817_v63 = vshll.u32 %v654_v50, 16  ;;  %v679_v1 = vmax.f32 %v675_v53, 0.0  ;;  %v680_v3 = vpack.c.bf16 %v677_v61, %v676_v60  ;;  %v3929_v60 = vld [vmem:[%s4802_s21 + $0x8] sm:$0xff]  }
  0x24   : > { %4526 = vmatpush3.bf16.msra.mxu1 %v4580_v17  ;;  %3972 = vmatpush3.bf16.msra.mxu0 %v4580_v17  ;;  %v809_v2 = vrot.slane %v807_v58, 7  ;;  %v565_v15 = vmul.f32 %v3819_v4, %v4813_v11  ;;  %v566_v34 = vmul.f32 %v3820_v8, %v4813_v11  ;;  %v568_v43 = vmul.f32 %v3824_v14, %v4813_v11 }
  0x25   : > { %4519 = vmatprep.subr.bf16.mxu1 %v4581_v20  ;;  %3973 = vmatprep.subr.bf16.mxu0 %v4581_v20  ;;  %v816_v5 = vrot.slane %v814_v62, 7  ;;  %v681_v7 = vpack.c.bf16 %v679_v1, %v678_v0  ;;  %v685_v12 = vsel %vm4865_vm2, %v680_v3, 0  ;;  %v3771_v0 = vunpack.c.l.bf16 %v3770_v44 }
  0x26   : > { %v812_v10 = vor.u32 %v810_v59, %v809_v2  ;;  %v717_v18 = vshrl.u32 %v685_v12, 16  ;;  %v720_v19 = vshll.u32 %v685_v12, 16  ;;  %v603_v58 = vadd.f32 %v4819_v13, %v565_v15 }
  0x27   : > { %v819_v16 = vor.u32 %v817_v63, %v816_v5  ;;  %v686_v17 = vsel %vm4865_vm2, %v681_v7, 0  ;;  %v4895_v23 = vsel %vm4878_vm4, %v816_v5, 0  ;;  %v604_v59 = vadd.f32 %v4819_v13, %v566_v34 }
  0x28   : > { %4527 = vmatpush3.bf16.msra.mxu1 %v4582_v35  ;;  %3974 = vmatpush3.bf16.msra.mxu0 %v4582_v35  ;;  %v4891_v20 = vsel %vm4878_vm4, 0, %v812_v10  ;;  %v724_v21 = vshrl.u32 %v686_v17, 16  ;;  %v727_v22 = vshll.u32 %v686_v17, 16  ;;  %v719_v27 = vrot.slane %v717_v18, 7 }
  0x29   : > { %4520 = vmatprep.subr.bf16.mxu1 %v4583_v40  ;;  %3975 = vmatprep.subr.bf16.mxu0 %v4583_v40  ;;  %v4898_v24 = vsel %vm715_vm1, %v809_v2, %v819_v16  ;;  %v1040_v25 = vshrl.u32 %v4891_v20, 16  ;;  %v1042_v26 = vshll.u32 %v4891_v20, 16  ;;  %v1055_v31 = vshll.u32 %v4895_v23, 16  ;;  %v4588_v2 = vld [vmem:[%s6064_s3 + $0xa8] sm:$0xff]  }
  0x2a   : > { %v1047_v28 = vshll.u32 %v4898_v24, 16  ;;  %v726_v29 = vrot.slane %v724_v21, 7  ;;  %v1051_v30 = vshrl.u32 %v4898_v24, 16  ;;  %v722_v33 = vor.u32 %v720_v19, %v719_v27 }
  0x2b   : > { %v1044_v32 = vrot.slane %v1042_v26, 1  ;;  %v567_v35 = vmul.f32 %v3823_v9, %v4813_v11  ;;  %v1057_v38 = vrot.slane %v1055_v31, 1  ;;  %v606_v63 = vadd.f32 %v4819_v13, %v568_v43 }
  0x2c   : > { %4528 = vmatpush3.bf16.msra.mxu1 %v4584_v45  ;;  %3976 = vmatpush3.bf16.msra.mxu0 %v4584_v45  ;;  %v1049_v36 = vrot.slane %v1047_v28, 1  ;;  %v729_v37 = vor.u32 %v727_v22, %v726_v29  ;;  %v4909_v39 = vsel %vm4878_vm4, %v726_v29, 0  ;;  %v4913_v41 = vsel %vm4878_vm4, 0, %v722_v33  ;;  %v4589_v22 = vld [vmem:[%s6064_s3 + $0xa0] sm:$0xff]   ;;  %v4961_v29 = vld [vmem:[%s4802_s21 + $0x10] sm:$0xff]  }
  0x2d   : > { %4369 = vmatprep.subr.bf16.mxu1 %v4861_v51  ;;  %4417 = vmatprep.subr.bf16.mxu0 %v4872_v55  ;;  %v1045_v40 = vor.u32 %v1044_v32, %v1040_v25  ;;  %v935_v42 = vshll.u32 %v4909_v39, 16  ;;  %v920_v46 = vshrl.u32 %v4913_v41, 16  ;;  %v922_v47 = vshll.u32 %v4913_v41, 16 }
  0x2e   : > { %v4919_v45 = vsel %vm715_vm1, %v719_v27, %v729_v37  ;;  %v1053_v48 = vor.u32 %v1051_v30, %v1049_v36  ;;  %v605_v62 = vadd.f32 %v4819_v13, %v567_v35  ;;  %v635_v3 = vmax.f32 %v603_v58, 0.0  ;;  %v4594_v37 = vld [vmem:[%s6064_s3 + $0x168] sm:$0xff]  }
  0x2f   : > { %v4924_v49 = vsel %vm918_vm3, %v1045_v40, %v1049_v36  ;;  %v927_v50 = vshll.u32 %v4919_v45, 16  ;;  %v931_v53 = vshrl.u32 %v4919_v45, 16  ;;  %v937_v54 = vrot.slane %v935_v42, 1 }
  0x30   : > { %1488 = vmatprep.mubr.bf16.mxu1 %v4924_v49  ;;  %v924_v56 = vrot.slane %v922_v47, 1  ;;  %v4933_v57 = vsel %vm918_vm3, %v1053_v48, %v1057_v38  ;;  %v636_v4 = vmax.f32 %v604_v59, 0.0  ;;  %v3772_v5 = vunpack.c.h.bf16 %v3770_v44 }
  0x31   : > { %1489 = vmatmul.mubr.bf16.vlgmr.msra.gmra.mxu1 %v4891_v20  ;;  %v929_v61 = vrot.slane %v927_v50, 1  ;;  %v637_v8 = vmax.f32 %v605_v62, 0.0  ;;  %v638_v9 = vmax.f32 %v606_v63, 0.0  ;;  %v3775_v10 = vunpack.c.l.bf16 %v3929_v60 }
  0x32   : > { %4370 = vmatpush3.bf16.msra.mxu1 %v4861_v51  ;;  %v925_v1 = vor.u32 %v924_v56, %v920_v46  ;;  %1496 = vmatprep.mubr.bf16.mxu1 %v4933_v57  ;;  %v655_v14 = vpack.c.bf16 %v636_v4, %v635_v3  ;;  %v4590_v51 = vld [vmem:[%s6064_s3 + $0x170] sm:$0xff]   ;;  %v3776_v15 = vunpack.c.h.bf16 %v3929_v60  ;;  %v541_v16 = vmul.f32 %v3771_v0, %v4813_v11  ;;  %v4598_v56 = vld [vmem:[%s6064_s3 + $0x160] sm:$0xff]  }
  0x33   : > { %4371 = vmatprep.subr.bf16.mxu1 %v4587_v52  ;;  %v933_v7 = vor.u32 %v931_v53, %v929_v61  ;;  %v656_v18 = vpack.c.bf16 %v638_v9, %v637_v8  ;;  %v542_v19 = vmul.f32 %v3772_v5, %v4813_v11  ;;  %v543_v21 = vmul.f32 %v3775_v10, %v4813_v11  ;;  %v4592_v10 = vld [vmem:[%s6064_s3 + $0x90] sm:$0xff]  }
  0x34   : > { %v930_v12 = vsel %vm918_vm3, %v925_v1, %v929_v61  ;;  %v822_v25 = vshrl.u32 %v655_v14, 16  ;;  %v825_v26 = vshll.u32 %v655_v14, 16  ;;  %v544_v27 = vmul.f32 %v3776_v15, %v4813_v11 }
  0x35   : > { %1392 = vmatprep.mubr.bf16.mxu0 %v930_v12  ;;  %v938_v17 = vsel %vm918_vm3, %v933_v7, %v937_v54  ;;  %v579_v28 = vadd.f32 %v4819_v13, %v541_v16  ;;  %v829_v30 = vshrl.u32 %v656_v18, 16  ;;  %v832_v31 = vshll.u32 %v656_v18, 16 }
  0x36   : > { %1393 = vmatmul.mubr.bf16.vlgmr.msra.gmra.mxu0 %v4913_v41  ;;  %4372 = vmatpush3.bf16.msra.mxu1 %v4587_v52  ;;  %v580_v32 = vadd.f32 %v4819_v13, %v542_v19  ;;  %v581_v33 = vadd.f32 %v4819_v13, %v543_v21  ;;  %v824_v34 = vrot.slane %v822_v25, 7  ;;  %v582_v35 = vadd.f32 %v4819_v13, %v544_v27 }
  0x37   : > { %4418 = vmatpush3.bf16.msra.mxu0 %v4872_v55  ;;  %4373 = vmatprep.subr.bf16.mxu1 %v4588_v2  ;;  %v611_v36 = vmax.f32 %v579_v28, 0.0  ;;  %v1112_v38 = vrot.slane %v4913_v41, 1  ;;  %v831_v55 = vrot.slane %v829_v30, 7  ;;  %v1113_v43 = vrot.slane %v4919_v45, 1  ;;  %v4591_v41 = vld [vmem:[%s6064_s3 + $0x98] sm:$0xff]   ;;  %v4593_v28 = vld [vmem:[%s6064_s3 + $0x88] sm:$0xff]  }
  0x38   : > { %1400 = vmatprep.mubr.bf16.mxu0 %v938_v17  ;;  %4419 = vmatprep.subr.bf16.mxu0 %v4590_v51  ;;  %v612_v40 = vmax.f32 %v580_v32, 0.0  ;;  %v613_v42 = vmax.f32 %v581_v33, 0.0  ;;  %v1115_v44 = vrot.slane %v4909_v39, 1  ;;  %v827_v46 = vor.u32 %v825_v26, %v824_v34 }
  0x39   : > { %1497 = vmatmul.mubr.bf16.gmra.mxu1 %v4898_v24  ;;  %v614_v47 = vmax.f32 %v582_v35, 0.0  ;;  %v3779_v48 = vunpack.c.l.bf16 %v4961_v29  ;;  %v834_v50 = vor.u32 %v832_v31, %v831_v55  ;;  %v4980_v53 = vsel %vm4878_vm4, %v831_v55, 0  ;;  %v5042_v55 = vld [vmem:[%s6064_s3 + $0x150] sm:$0xff]  }
  0x3a   : > { %4374 = vmatpush3.bf16.msra.mxu1 %v4588_v2  ;;  %v643_v52 = vpack.c.bf16 %v612_v40, %v611_v36  ;;  %v3780_v54 = vunpack.c.h.bf16 %v4961_v29  ;;  %v4988_v58 = vsel %vm4878_vm4, 0, %v827_v46  ;;  %v1075_v60 = vshll.u32 %v4980_v53, 16  ;;  %v3931_v2 = vld [vmem:[%s4802_s21 + $0x18] sm:$0xff]  }
  0x3b   : > { %4375 = vmatprep.subr.bf16.mxu1 %v4589_v22  ;;  %4420 = vmatpush3.bf16.msra.mxu0 %v4590_v51  ;;  %v644_v59 = vpack.c.bf16 %v614_v47, %v613_v42  ;;  %v4994_v61 = vsel %vm1111_vm5, %v1112_v38, %v1113_v43  ;;  %v4997_v62 = vsel %vm715_vm1, %v824_v34, %v834_v50  ;;  %v1060_v63 = vshrl.u32 %v4988_v58, 16  ;;  %v4603_v51 = vld [vmem:[%s6064_s3 + $0x158] sm:$0xff]   ;;  %v4595_v47 = vld [vmem:[%s6064_s3 + $0x80] sm:$0xff]  }
  0x3c   : > { %4421 = vmatprep.subr.bf16.mxu0 %v4594_v37  ;;  %v1062_v0 = vshll.u32 %v4988_v58, 16  ;;  %v732_v1 = vshrl.u32 %v643_v52, 16  ;;  %v1067_v3 = vshll.u32 %v4997_v62, 16  ;;  %v735_v4 = vshll.u32 %v643_v52, 16 }
  0x3d   : > { %v739_v5 = vshrl.u32 %v644_v59, 16  ;;  %v742_v7 = vshll.u32 %v644_v59, 16  ;;  %v1071_v12 = vshrl.u32 %v4997_v62, 16  ;;  %v1077_v14 = vrot.slane %v1075_v60, 1 }
  0x3e   : > { %1401 = vmatmul.mubr.bf16.gmra.mxu0 %v4919_v45  ;;  %4376 = vmatpush3.bf16.msra.mxu1 %v4589_v22  ;;  %v1064_v8 = vrot.slane %v1062_v0, 1  ;;  %v734_v9 = vrot.slane %v732_v1, 7  ;;  %v1069_v15 = vrot.slane %v1067_v3, 1  ;;  %v3783_v17 = vunpack.c.l.bf16 %v3931_v2 }
  0x3f   : > { %4377 = vmatprep.subr.bf16.mxu1 %v4591_v41  ;;  %4422 = vmatpush3.bf16.msra.mxu0 %v4594_v37  ;;  %v741_v16 = vrot.slane %v739_v5, 7  ;;  %v3784_v18 = vunpack.c.h.bf16 %v3931_v2  ;;  %v545_v22 = vmul.f32 %v3779_v48, %v4813_v11  ;;  %v546_v25 = vmul.f32 %v3780_v54, %v4813_v11  ;;  %v3933_v5 = vld [vmem:[%s4802_s21 + $0x28] sm:$0xff]  }
  0x40   : > { %4423 = vmatprep.subr.bf16.mxu0 %v4598_v56  ;;  %v1065_v19 = vor.u32 %v1064_v8, %v1060_v63  ;;  %v737_v21 = vor.u32 %v735_v4, %v734_v9  ;;  %v1073_v27 = vor.u32 %v1071_v12, %v1069_v15  ;;  %v547_v30 = vmul.f32 %v3783_v17, %v4813_v11 }
  0x41   : > { %v744_v26 = vor.u32 %v742_v7, %v741_v16  ;;  %v5018_v29 = vsel %vm4878_vm4, %v741_v16, 0  ;;  %v548_v34 = vmul.f32 %v3784_v18, %v4813_v11  ;;  %v583_v48 = vadd.f32 %v4819_v13, %v545_v22 }
  0x42   : > { %4378 = vmatpush3.bf16.msra.mxu1 %v4591_v41  ;;  %v5022_v31 = vsel %vm918_vm3, %v1065_v19, %v1069_v15  ;;  %v5026_v32 = vsel %vm4878_vm4, 0, %v737_v21  ;;  %v955_v33 = vshll.u32 %v5018_v29, 16  ;;  %v5037_v38 = vsel %vm918_vm3, %v1073_v27, %v1077_v14  ;;  %v5076_v14 = vld [vmem:[%s4802_s21 + $0x30] sm:$0xff]   ;;  %v4611_v19 = vld [vmem:[%s6064_s3 + $0x148] sm:$0xff]  }
  0x43   : > { %4379 = vmatprep.subr.bf16.mxu1 %v4592_v10  ;;  %4424 = vmatpush3.bf16.msra.mxu0 %v4598_v56  ;;  %v5032_v35 = vsel %vm715_vm1, %v734_v9, %v744_v26  ;;  %v940_v36 = vshrl.u32 %v5026_v32, 16  ;;  %v942_v37 = vshll.u32 %v5026_v32, 16  ;;  %v584_v41 = vadd.f32 %v4819_v13, %v546_v25  ;;  %v3932_v56 = vld [vmem:[%s4802_s21 + $0x20] sm:$0xff]   ;;  %v4596_v9 = vld [vmem:[%s6064_s3 + $0x138] sm:$0xff]  }
  0x44   : > { %1504 = vmatprep.mubr.bf16.mxu1 %v5022_v31  ;;  %4425 = vmatprep.subr.bf16.mxu0 %v4603_v51  ;;  %v947_v40 = vshll.u32 %v5032_v35, 16  ;;  %v951_v42 = vshrl.u32 %v5032_v35, 16  ;;  %v957_v46 = vrot.slane %v955_v33, 1  ;;  %v585_v52 = vadd.f32 %v4819_v13, %v547_v30 }
  0x45   : > { %1505 = vmatmul.mubr.bf16.gmra.mxu1 %v4988_v58  ;;  %v944_v50 = vrot.slane %v942_v37, 1  ;;  %v586_v54 = vadd.f32 %v4819_v13, %v548_v34  ;;  %v615_v60 = vmax.f32 %v583_v48, 0.0  ;;  %v1117_v63 = vrot.slane %v5026_v32, 1 }
  0x46   : > { %4380 = vmatpush3.bf16.msra.mxu1 %v4592_v10  ;;  %1512 = vmatprep.mubr.bf16.mxu1 %v5037_v38  ;;  %v949_v59 = vrot.slane %v947_v40, 1  ;;  %v1118_v0 = vrot.slane %v5032_v35, 1  ;;  %v616_v2 = vmax.f32 %v584_v41, 0.0  ;;  %v617_v3 = vmax.f32 %v585_v52, 0.0 }
  0x47   : > { %4381 = vmatprep.subr.bf16.mxu1 %v4593_v28  ;;  %4426 = vmatpush3.bf16.msra.mxu0 %v4603_v51  ;;  %v945_v1 = vor.u32 %v944_v50, %v940_v36  ;;  %v618_v4 = vmax.f32 %v586_v54, 0.0  ;;  %v5065_v8 = vsel %vm1111_vm5, %v1113_v43, %v1115_v44  ;;  %v3787_v12 = vunpack.c.l.bf16 %v3932_v56  ;;  %v5082_v44 = vld [vmem:[%s4802_s21 + $0x38] sm:$0xff]   ;;  %v4614_v54 = vld [vmem:[%s6064_s3 + $0x140] sm:$0xff]  }
  0x48   : > { %4427 = vmatprep.subr.bf16.mxu0 %v5042_v55  ;;  %v953_v7 = vor.u32 %v951_v42, %v949_v59  ;;  %v5073_v10 = vsel %vm1111_vm5, %v1117_v63, %v1118_v0  ;;  %v645_v39 = vpack.c.bf16 %v616_v2, %v615_v60  ;;  %v3788_v43 = vunpack.c.h.bf16 %v3932_v56  ;;  %v4597_v56 = vld [vmem:[%s6064_s3 + $0xf8] sm:$0xff]  }
  0x49   : > { %v5079_v51 = vsel %vm918_vm3, %v945_v1, %v949_v59  ;;  %v646_v45 = vpack.c.bf16 %v618_v4, %v617_v3  ;;  %v1120_v16 = vrot.slane %v5018_v29, 1  ;;  %v3791_v17 = vunpack.c.l.bf16 %v3933_v5  ;;  %v4599_v3 = vld [vmem:[%s6064_s3 + $0x130] sm:$0xff]   ;;  %v4601_v29 = vld [vmem:[%s6064_s3 + $0x128] sm:$0xff]  }
  0x4a   : > { %4382 = vmatpush3.bf16.msra.mxu1 %v4593_v28  ;;  %1408 = vmatprep.mubr.bf16.mxu0 %v5079_v51  ;;  %v5086_v15 = vsel %vm918_vm3, %v953_v7, %v957_v46  ;;  %v3792_v18 = vunpack.c.h.bf16 %v3933_v5  ;;  %v747_v21 = vshrl.u32 %v645_v39, 16  ;;  %v750_v22 = vshll.u32 %v645_v39, 16  ;;  %v4600_v39 = vld [vmem:[%s6064_s3 + $0xf0] sm:$0xff]  }
  0x4b   : > { %4383 = vmatprep.subr.bf16.mxu1 %v4595_v47  ;;  %1409 = vmatmul.mubr.bf16.gmra.mxu0 %v5026_v32  ;;  %v754_v25 = vshrl.u32 %v646_v45, 16  ;;  %v757_v26 = vshll.u32 %v646_v45, 16  ;;  %v549_v27 = vmul.f32 %v3787_v12, %v4813_v11  ;;  %v550_v28 = vmul.f32 %v3788_v43, %v4813_v11 }
  0x4c   : > { %1416 = vmatprep.mubr.bf16.mxu0 %v5086_v15  ;;  %v551_v30 = vmul.f32 %v3791_v17, %v4813_v11  ;;  %v3795_v33 = vunpack.c.l.bf16 %v5076_v14  ;;  %v749_v34 = vrot.slane %v747_v21, 7  ;;  %v552_v37 = vmul.f32 %v3792_v18, %v4813_v11  ;;  %4428 = vmatpush3.bf16.msra.mxu0 %v5042_v55  ;;  %v4618_v21 = vld [vmem:[%s6064_s3 + $0x1f8] sm:$0xff]  }
  0x4d   : > { %1513 = vmatmul.mubr.bf16.gmra.mxu1 %v4997_v62  ;;  %v756_v36 = vrot.slane %v754_v25, 7  ;;  %v3796_v40 = vunpack.c.h.bf16 %v5076_v14  ;;  %v587_v42 = vadd.f32 %v4819_v13, %v549_v27  ;;  %v588_v46 = vadd.f32 %v4819_v13, %v550_v28  ;;  %4429 = vmatprep.subr.bf16.mxu0 %v4611_v19 }
  0x4e   : > { %4384 = vmatpush3.bf16.msra.mxu1 %v4595_v47  ;;  %4385 = vmatprep.mubr.bf16.mxu1 %v4994_v61  ;;  %v589_v48 = vadd.f32 %v4819_v13, %v551_v30  ;;  %v3799_v50 = vunpack.c.l.bf16 %v5082_v44  ;;  %v752_v47 = vor.u32 %v750_v22, %v749_v34  ;;  %v590_v52 = vadd.f32 %v4819_v13, %v552_v37 }
  0x4f   : > { %4097 = vmatprep.subr.bf16.mxu1 %v4596_v9  ;;  %v759_v41 = vor.u32 %v757_v26, %v756_v36  ;;  %v5109_v61 = vsel %vm4878_vm4, %v756_v36, 0  ;;  %v619_v60 = vmax.f32 %v587_v42, 0.0  ;;  %v620_v63 = vmax.f32 %v588_v46, 0.0 }
  0x50   : > { %v975_v59 = vshll.u32 %v5109_v61, 16  ;;  %v1125_v55 = vrot.slane %v5109_v61, 1  ;;  %v5125_v2 = vsel %vm4878_vm4, 0, %v752_v47  ;;  %v621_v4 = vmax.f32 %v589_v48, 0.0  ;;  %4430 = vmatpush3.bf16.msra.mxu0 %v4611_v19  ;;  %v4608_v61 = vld [vmem:[%s6064_s3 + $0xd8] sm:$0xff]  }
  0x51   : > { %v5121_v1 = vsel %vm715_vm1, %v749_v34, %v759_v41  ;;  %v622_v5 = vmax.f32 %v590_v52, 0.0  ;;  %v960_v7 = vshrl.u32 %v5125_v2, 16  ;;  %v962_v9 = vshll.u32 %v5125_v2, 16  ;;  %4431 = vmatprep.subr.bf16.mxu0 %v4614_v54 }
  0x52   : > { %v967_v12 = vshll.u32 %v5121_v1, 16  ;;  %v971_v14 = vshrl.u32 %v5121_v1, 16  ;;  %v977_v45 = vrot.slane %v975_v59, 1  ;;  %v1122_v43 = vrot.slane %v5125_v2, 1 }
  0x53   : > { %1417 = vmatmul.mubr.bf16.gmra.mxu0 %v5032_v35  ;;  %v1123_v17 = vrot.slane %v5121_v1, 1  ;;  %v647_v18 = vpack.c.bf16 %v620_v63, %v619_v60  ;;  %v964_v19 = vrot.slane %v962_v9, 1  ;;  %v648_v25 = vpack.c.bf16 %v622_v5, %v621_v4  ;;  %v4604_v63 = vld [vmem:[%s6064_s3 + $0x120] sm:$0xff]  }
  0x54   : > { %v969_v22 = vrot.slane %v967_v12, 1  ;;  %v3800_v26 = vunpack.c.h.bf16 %v5082_v44  ;;  %v5151_v27 = vsel %vm1111_vm5, %v1118_v0, %v1120_v16  ;;  %4432 = vmatpush3.bf16.msra.mxu0 %v4614_v54  ;;  %v4602_v0 = vld [vmem:[%s6064_s3 + $0xe8] sm:$0xff]   ;;  %v553_v42 = vmul.f32 %v3795_v33, %v4813_v11 }
  0x55   : > { %4386 = vmatmul.mubr.bf16.vlgmr.msra.gmra.mxu1 %v5065_v8  ;;  %v5156_v28 = vsel %vm1111_vm5, %v1122_v43, %v1123_v17  ;;  %v762_v8 = vshrl.u32 %v647_v18, 16  ;;  %v765_v30 = vshll.u32 %v647_v18, 16  ;;  %v965_v34 = vor.u32 %v964_v19, %v960_v7  ;;  %4233 = vmatprep.subr.bf16.mxu0 %v4618_v21  ;;  %v4607_v43 = vld [vmem:[%s6064_s3 + $0x118] sm:$0xff]   ;;  %v3937_v18 = vld [vmem:[%s4802_s21 + $0x48] sm:$0xff]  }
  0x56   : > { %4098 = vmatpush3.bf16.msra.mxu1 %v4597_v56  ;;  %4389 = vmatprep.mubr.bf16.mxu1 %v5073_v10  ;;  %v973_v44 = vor.u32 %v971_v14, %v969_v22  ;;  %v769_v36 = vshrl.u32 %v648_v25, 16  ;;  %v772_v37 = vshll.u32 %v648_v25, 16  ;;  %v554_v46 = vmul.f32 %v3796_v40, %v4813_v11  ;;  %v3936_v56 = vld [vmem:[%s4802_s21 + $0x40] sm:$0xff]  }
  0x57   : > { %4099 = vmatprep.subr.bf16.mxu1 %v4599_v3  ;;  %v764_v16 = vrot.slane %v762_v8, 7  ;;  %v555_v48 = vmul.f32 %v3799_v50, %v4813_v11  ;;  %v5168_v47 = vsel %vm918_vm3, %v965_v34, %v969_v22  ;;  %v556_v54 = vmul.f32 %v3800_v26, %v4813_v11 }
  0x58   : > { %v5171_v41 = vsel %vm918_vm3, %v973_v44, %v977_v45  ;;  %v771_v52 = vrot.slane %v769_v36, 7  ;;  %1424 = vmatprep.mubr.bf16.mxu0 %v5168_v47  ;;  %v591_v33 = vadd.f32 %v4819_v13, %v553_v42  ;;  %v592_v40 = vadd.f32 %v4819_v13, %v554_v46 }
  0x59   : > { %v767_v59 = vor.u32 %v765_v30, %v764_v16  ;;  %v593_v11 = vadd.f32 %v4819_v13, %v555_v48  ;;  %v594_v3 = vadd.f32 %v4819_v13, %v556_v54  ;;  %v3803_v9 = vunpack.c.l.bf16 %v3936_v56 }
  0x5a   : > { %4100 = vmatpush3.bf16.msra.mxu1 %v4600_v39  ;;  %v774_v50 = vor.u32 %v772_v37, %v771_v52  ;;  %v5180_v60 = vsel %vm4878_vm4, %v771_v52, 0  ;;  %v4605_v39 = vld [vmem:[%s6064_s3 + $0xe0] sm:$0xff]   ;;  %v623_v45 = vmax.f32 %v591_v33, 0.0  ;;  %v624_v8 = vmax.f32 %v592_v40, 0.0 }
  0x5b   : > { %4101 = vmatprep.subr.bf16.mxu1 %v4601_v29  ;;  %1425 = vmatmul.mubr.bf16.gmra.mxu0 %v5125_v2  ;;  %v5190_v4 = vsel %vm4878_vm4, 0, %v767_v59  ;;  %v1130_v5 = vrot.slane %v5180_v60, 1  ;;  %v995_v7 = vshll.u32 %v5180_v60, 16  ;;  %v625_v30 = vmax.f32 %v593_v11, 0.0 }
  0x5c   : > { %1432 = vmatprep.mubr.bf16.mxu0 %v5171_v41  ;;  %v5197_v12 = vsel %vm715_vm1, %v764_v16, %v774_v50  ;;  %v980_v13 = vshrl.u32 %v5190_v4, 16  ;;  %v982_v14 = vshll.u32 %v5190_v4, 16  ;;  %v1127_v19 = vrot.slane %v5190_v4, 1  ;;  %v4609_v50 = vld [vmem:[%s6064_s3 + $0x110] sm:$0xff]  }
  0x5d   : > { %4390 = vmatmul.mubr.bf16.gmra.mxu1 %v5151_v27  ;;  %v987_v21 = vshll.u32 %v5197_v12, 16  ;;  %v1128_v22 = vrot.slane %v5197_v12, 1  ;;  %v991_v25 = vshrl.u32 %v5197_v12, 16  ;;  %v626_v34 = vmax.f32 %v594_v3, 0.0 }
  0x5e   : > { %4393 = vmatprep.mubr.bf16.mxu1 %v5156_v28  ;;  %4102 = vmatpush3.bf16.msra.mxu1 %v4602_v0  ;;  %v984_v26 = vrot.slane %v982_v14, 1  ;;  %v5218_v44 = vsel %vm1111_vm5, %v1123_v17, %v1125_v55  ;;  %v997_v36 = vrot.slane %v995_v7, 1  ;;  %v3804_v37 = vunpack.c.h.bf16 %v3936_v56  ;;  %v5229_v55 = vld [vmem:[%s6065_s4] ss:$0 sm:$0xff] }
  0x5f   : > { %4103 = vmatprep.subr.bf16.mxu1 %v4604_v63  ;;  %v989_v29 = vrot.slane %v987_v21, 1  ;;  %v649_v16 = vpack.c.bf16 %v624_v8, %v623_v45  ;;  %v650_v42 = vpack.c.bf16 %v626_v34, %v625_v30  ;;  %v3807_v46 = vunpack.c.l.bf16 %v3937_v18  ;;  %v5247_v14 = vld [vmem:[%s6066_s5] ss:$0 sm:$0xff]  ;;  %v4610_v21 = vld [vmem:[%s6064_s3 + $0xd0] sm:$0xff]   ;;  %v4612_v8 = vld [vmem:[%s6064_s3 + $0x108] sm:$0xff]  }
  0x60   : > { %v985_v0 = vor.u32 %v984_v26, %v980_v13  ;;  %v5221_v48 = vsel %vm1111_vm5, %v1127_v19, %v1128_v22  ;;  %v3808_v52 = vunpack.c.h.bf16 %v3937_v18  ;;  %v557_v17 = vmul.f32 %v5229_v55, %v3803_v9 }
  0x61   : > { %v558_v54 = vmul.f32 %v5229_v55, %v3804_v37  ;;  %v777_v59 = vshrl.u32 %v649_v16, 16  ;;  %v780_v33 = vshll.u32 %v649_v16, 16  ;;  %v784_v40 = vshrl.u32 %v650_v42, 16 }
  0x62   : > { %4104 = vmatpush3.bf16.msra.mxu1 %v4605_v39  ;;  %v5234_v56 = vsel %vm918_vm3, %v985_v0, %v989_v29  ;;  %v993_v63 = vor.u32 %v991_v25, %v989_v29  ;;  %v787_v11 = vshll.u32 %v650_v42, 16  ;;  %v559_v3 = vmul.f32 %v5229_v55, %v3807_v46 }
  0x63   : > { %4105 = vmatprep.subr.bf16.mxu1 %v4607_v43  ;;  %1433 = vmatmul.mubr.bf16.gmra.mxu0 %v5121_v1  ;;  %v560_v7 = vmul.f32 %v5229_v55, %v3808_v52  ;;  %v779_v9 = vrot.slane %v777_v59, 7  ;;  %v786_v13 = vrot.slane %v784_v40, 7  ;;  %v595_v39 = vadd.f32 %v5247_v14, %v557_v17  ;;  %v4615_v59 = vld [vmem:[%s6064_s3 + $0x100] sm:$0xff]  }
  0x64   : > { %1440 = vmatprep.mubr.bf16.mxu0 %v5234_v56  ;;  %v596_v45 = vadd.f32 %v5247_v14, %v558_v54  ;;  %v597_v43 = vadd.f32 %v5247_v14, %v559_v3  ;;  %v5263_v37 = vsel %vm1111_vm5, %v1128_v22, %v1130_v5  ;;  %v5266_v0 = vsel %vm918_vm3, %v993_v63, %v997_v36  ;;  %v4613_v5 = vld [vmem:[%s6064_s3 + $0xc8] sm:$0xff]  }
  0x65   : > { %4394 = vmatmul.mubr.bf16.gmra.mxu1 %v5218_v44  ;;  %v598_v18 = vadd.f32 %v5247_v14, %v560_v7  ;;  %v782_v19 = vor.u32 %v780_v33, %v779_v9  ;;  %v789_v25 = vor.u32 %v787_v11, %v786_v13  ;;  %v627_v26 = vmax.f32 %v595_v39, 0.0  ;;  %v4616_v39 = vld [vmem:[%s6064_s3 + $0xc0] sm:$0xff]  }
  0x66   : > { %4397 = vmatprep.mubr.bf16.mxu1 %v5221_v48  ;;  %4106 = vmatpush3.bf16.msra.mxu1 %v4608_v61  ;;  %v628_v30 = vmax.f32 %v596_v45, 0.0  ;;  %v629_v34 = vmax.f32 %v597_v43, 0.0  ;;  %v912_v22 = vsel %vm4878_vm4, %v786_v13, 0 }
  0x67   : > { %4107 = vmatprep.subr.bf16.mxu1 %v4609_v50  ;;  %v630_v29 = vmax.f32 %v598_v18, 0.0  ;;  %v5269_v16 = vsel %vm715_vm1, %v779_v9, %v789_v25  ;;  %v5273_v42 = vsel %vm4878_vm4, 0, %v782_v19  ;;  %v1135_v3 = vrot.slane %v912_v22, 1  ;;  %v4617_v18 = vld [vmem:[%s6064_s3 + $0x238] sm:$0xff]  }
  0x68   : > { %v1132_v46 = vrot.slane %v5273_v42, 1  ;;  %v1133_v61 = vrot.slane %v5269_v16, 1  ;;  %v1000_v52 = vshrl.u32 %v5273_v42, 16  ;;  %v1002_v60 = vshll.u32 %v5273_v42, 16 }
  0x69   : > { %v1007_v36 = vshll.u32 %v5269_v16, 16  ;;  %v651_v17 = vpack.c.bf16 %v628_v30, %v627_v26  ;;  %v652_v54 = vpack.c.bf16 %v630_v29, %v629_v34  ;;  %v1011_v25 = vshrl.u32 %v5269_v16, 16 }
  0x6a   : > { %4108 = vmatpush3.bf16.msra.mxu1 %v4610_v21  ;;  %v5290_v33 = vsel %vm1111_vm5, %v1132_v46, %v1133_v61  ;;  %v1004_v40 = vrot.slane %v1002_v60, 1  ;;  %v1015_v26 = vshll.u32 %v912_v22, 16 }
  0x6b   : > { %4109 = vmatprep.subr.bf16.mxu1 %v4612_v8  ;;  %1441 = vmatmul.mubr.bf16.gmra.mxu0 %v5190_v4  ;;  %v792_v50 = vshrl.u32 %v651_v17, 16  ;;  %v795_v63 = vshll.u32 %v651_v17, 16  ;;  %v799_v11 = vshrl.u32 %v652_v54, 16  ;;  %v1009_v9 = vrot.slane %v1007_v36, 1 }
  0x6c   : > { %1448 = vmatprep.mubr.bf16.mxu0 %v5266_v0  ;;  %v1005_v7 = vor.u32 %v1004_v40, %v1000_v52  ;;  %v802_v13 = vshll.u32 %v652_v54, 16  ;;  %v5303_v8 = vsel %vm1111_vm5, %v1133_v61, %v1135_v3  ;;  %v1142_v54 = vrot.slane %v4891_v20, 1 }
  0x6d   : > { %4398 = vmatmul.mubr.bf16.gmra.mxu1 %v5263_v37  ;;  %v794_v45 = vrot.slane %v792_v50, 7  ;;  %v801_v43 = vrot.slane %v799_v11, 7  ;;  %v1013_v60 = vor.u32 %v1011_v25, %v1009_v9 }
  0x6e   : > { %4401 = vmatprep.mubr.bf16.mxu1 %v5290_v33  ;;  %4110 = vmatpush3.bf16.msra.mxu1 %v4613_v5  ;;  %v5306_v30 = vsel %vm918_vm3, %v1005_v7, %v1009_v9  ;;  %v1017_v5 = vrot.slane %v1015_v26, 1  ;;  %v1145_v9 = vrot.slane %v4895_v23, 1  ;;  %v1150_v23 = vrot.slane %v4980_v53, 1  ;;  %v4622_v53 = vld [vmem:[%s6064_s3 + $0x230] sm:$0xff]  }
  0x6f   : > { %4111 = vmatprep.subr.bf16.mxu1 %v4615_v59  ;;  %v797_v21 = vor.u32 %v795_v63, %v794_v45  ;;  %v804_v19 = vor.u32 %v802_v13, %v801_v43  ;;  %v913_v46 = vsel %vm4878_vm4, %v801_v43, 0  ;;  %v1143_v59 = vrot.slane %v4898_v24, 1 }
  0x70   : > { %v1140_v36 = vrot.slane %v913_v46, 1  ;;  %v5330_v40 = vsel %vm918_vm3, %v1013_v60, %v1017_v5  ;;  %v1148_v43 = vrot.slane %v4997_v62, 1  ;;  %v1035_v26 = vshll.u32 %v913_v46, 16 }
  0x71   : > { %v5309_v34 = vsel %vm715_vm1, %v794_v45, %v804_v19  ;;  %v5313_v29 = vsel %vm4878_vm4, 0, %v797_v21  ;;  %v5338_v7 = vsel %vm1111_vm5, %v1142_v54, %v1143_v59  ;;  %v1147_v45 = vrot.slane %v4988_v58, 1  ;;  %v4624_v54 = vld [vmem:[%s6064_s3 + $0x1a8] sm:$0xff]  }
  0x72   : > { %4112 = vmatpush3.bf16.msra.mxu1 %v4616_v39  ;;  %v1137_v61 = vrot.slane %v5313_v29, 1  ;;  %v1138_v52 = vrot.slane %v5309_v34, 1  ;;  %v1022_v17 = vshll.u32 %v5313_v29, 16  ;;  %v1020_v63 = vshrl.u32 %v5313_v29, 16 }
  0x73   : > { %4465 = vmatprep.subr.bf16.mxu1 %v4617_v18  ;;  %1449 = vmatmul.mubr.bf16.gmra.mxu0 %v5197_v12  ;;  %v1027_v3 = vshll.u32 %v5309_v34, 16  ;;  %v5348_v21 = vsel %vm1111_vm5, %v1143_v59, %v1145_v9  ;;  %v1031_v25 = vshrl.u32 %v5309_v34, 16  ;;  %v1037_v60 = vrot.slane %v1035_v26, 1 }
  0x74   : > { %1456 = vmatprep.mubr.bf16.mxu0 %v5306_v30  ;;  %v5323_v22 = vsel %vm1111_vm5, %v1137_v61, %v1138_v52  ;;  %v5333_v50 = vsel %vm1111_vm5, %v1138_v52, %v1140_v36  ;;  %v1024_v11 = vrot.slane %v1022_v17, 1  ;;  %v5355_v61 = vsel %vm1111_vm5, %v1147_v45, %v1148_v43  ;;  %v4627_v36 = vld [vmem:[%s6064_s3 + $0x228] sm:$0xff]   ;;  %v3943_v17 = vld [vmem:[%s4802_s21 + $0x78] sm:$0xff]  }
  0x75   : > { %4402 = vmatmul.mubr.bf16.gmra.mxu1 %v5303_v8  ;;  %v1029_v39 = vrot.slane %v1027_v3, 1  ;;  %v5363_v5 = vsel %vm1111_vm5, %v1148_v43, %v1150_v23  ;;  %v3831_v3 = vunpack.c.l.bf16 %v3943_v17  ;;  %v3832_v9 = vunpack.c.h.bf16 %v3943_v17  ;;  %v4628_v43 = vld [vmem:[%s6064_s3 + $0x1d8] sm:$0xff]  }
  0x76   : > { %4405 = vmatprep.mubr.bf16.mxu1 %v5323_v22  ;;  %v1025_v13 = vor.u32 %v1024_v11, %v1020_v63  ;;  %v4625_v63 = vld [vmem:[%s6064_s3 + $0x1e0] sm:$0xff]  }
  0x77   : > { %v1033_v52 = vor.u32 %v1031_v25, %v1029_v39  ;;  %v571_v26 = vmul.f32 %v5229_v55, %v3831_v3  ;;  %v572_v23 = vmul.f32 %v5229_v55, %v3832_v9  ;;  %v4635_v9 = vld [vmem:[%s6064_s3 + $0x1c0] sm:$0xff]  }
  0x78   : > { %v5351_v19 = vsel %vm918_vm3, %v1025_v13, %v1029_v39  ;;  %v4638_v13 = vld [vmem:[%s6064_s3 + $0x210] sm:$0xff]   ;;  %v4626_v39 = vld [vmem:[%s6064_s3 + $0x1a0] sm:$0xff]  }
  0x79   : > { %v5366_v46 = vsel %vm918_vm3, %v1033_v52, %v1037_v60  ;;  %v4639_v52 = vld [vmem:[%s6064_s3 + $0x208] sm:$0xff]   ;;  %v4629_v60 = vld [vmem:[%s6064_s3 + $0x198] sm:$0xff]  }
  0x7b   : > { %1457 = vmatmul.mubr.bf16.gmra.mxu0 %v5273_v42 }
  0x7c   : > { %1464 = vmatprep.mubr.bf16.mxu0 %v5330_v40 }
  0x7d   : > { %4406 = vmatmul.mubr.bf16.gmra.mxu1 %v5333_v50 }
  0x7e   : > { %4409 = vmatprep.mubr.bf16.mxu1 %v5338_v7 }
  0x83   : > { %1465 = vmatmul.mubr.bf16.gmra.mxu0 %v5269_v16 }
  0x84   : > { %1472 = vmatprep.mubr.bf16.mxu0 %v5351_v19 }
  0x85   : > { %4410 = vmatmul.mubr.bf16.gmra.mxu1 %v5348_v21 }
  0x86   : > { %4413 = vmatprep.mubr.bf16.mxu1 %v5355_v61 }
  0x8b   : > { %1473 = vmatmul.mubr.bf16.gmra.mxu0 %v5313_v29 }
  0x8c   : > { %1480 = vmatprep.mubr.bf16.mxu0 %v5366_v46 }
  0x8d   : > { %4414 = vmatmul.mubr.bf16.gmra.mxu1 %v5363_v5 }
  0x8e   : > { %1970 = vmatprep.mubr.bf16.mxu1 %v5079_v51  ;;  %v4619_v51 = vld [vmem:[%s6064_s3 + $0x1b8] sm:$0xff]  }
  0x93   : > { %1481 = vmatmul.mubr.bf16.gmra.mxu0 %v5309_v34 }
  0x94   : > { %4433 = vmatprep.mubr.bf16.mxu0 %v5073_v10  ;;  %v4632_v10 = vld [vmem:[%s6064_s3 + $0x220] sm:$0xff]  }
  0x95   : > { %1971 = vmatmul.mubr.bf16.vlgmr.msra.gmra.mxu1 %v5026_v32  ;;  %v4620_v32 = vld [vmem:[%s6064_s3 + $0x1f0] sm:$0xff]  }
  0x96   : > { %4466 = vmatpush3.bf16.msra.mxu1 %v4617_v18  ;;  %1978 = vmatprep.mubr.bf16.mxu1 %v5086_v15  ;;  %v4621_v15 = vld [vmem:[%s6064_s3 + $0x1b0] sm:$0xff]   ;;  %v4623_v18 = vld [vmem:[%s6064_s3 + $0x1e8] sm:$0xff]  }
  0x97   : > { %4467 = vmatprep.subr.bf16.mxu1 %v4622_v53 }
  0x9a   : > { %4468 = vmatpush3.bf16.msra.mxu1 %v4622_v53 }
  0x9b   : > { %4469 = vmatprep.subr.bf16.mxu1 %v4627_v36  ;;  %4434 = vmatmul.mubr.bf16.vlgmr.msra.gmra.mxu0 %v5151_v27  ;;  %v3942_v27 = vld [vmem:[%s4802_s21 + $0x70] sm:$0xff]   ;;  %s3736_s21 = sadd.s32 8, %s4759_s10 }
  0x9c   : > { %4234 = vmatpush3.bf16.msra.mxu0 %v4619_v51  ;;  %4437 = vmatprep.mubr.bf16.mxu0 %v5156_v28  ;;  %v3827_v59 = vunpack.c.l.bf16 %v3942_v27  ;;  %v3828_v11 = vunpack.c.h.bf16 %v3942_v27  ;;  %v4633_v27 = vld [vmem:[%s6064_s3 + $0x1c8] sm:$0xff]   ;;  %p5525_p10 = scmp.lt.s32.totalorder %s3736_s21, 31 }
  0x9d   : > { %1979 = vmatmul.mubr.bf16.gmra.mxu1 %v5032_v35  ;;  %4235 = vmatprep.subr.bf16.mxu0 %v4620_v32  ;;  %v4637_v35 = vld [vmem:[%s6064_s3 + $0x218] sm:$0xff]   ;;  %v609_v32 = vadd.f32 %v5247_v14, %v571_v26 }
  0x9e   : > { %1986 = vmatprep.mubr.bf16.mxu1 %v5168_v47  ;;  %4470 = vmatpush3.bf16.msra.mxu1 %v4627_v36  ;;  %v569_v45 = vmul.f32 %v5229_v55, %v3827_v59  ;;  %v570_v25 = vmul.f32 %v5229_v55, %v3828_v11  ;;  %v4630_v36 = vld [vmem:[%s6064_s3 + $0x1d0] sm:$0xff]   ;;  %s6115_s21 = smov (!%p5525_p10, %s3736_s21), 31 }
  0x9f   : > { %4471 = vmatprep.subr.bf16.mxu1 %v4632_v10  ;;  %s6117_s21 = smov (!%p5525_p10, %s6115_s21), 31 }
  0xa0   : > { %4236 = vmatpush3.bf16.msra.mxu0 %v4621_v15  ;;  %v607_v53 = vadd.f32 %v5247_v14, %v569_v45  ;;  %v608_v51 = vadd.f32 %v5247_v14, %v570_v25  ;;  %v4640_v15 = vld [vmem:[%s6064_s3 + $0x200] sm:$0xff]   ;;  %s3516_s10 = sshll.u32 %s6117_s21, 2 }
  0xa1   : > { %4237 = vmatprep.subr.bf16.mxu0 %v4623_v18  ;;  %v4631_v18 = vld [vmem:[%s6064_s3 + $0x190] sm:$0xff]   ;;  %s442_s18 = sadd.s32 %s3516_s10, %s4778_s20 }
  0xa2   : > { %4472 = vmatpush3.bf16.msra.mxu1 %v4632_v10  ;;  %v610_v10 = vadd.f32 %v5247_v14, %v572_v23  ;;  %v639_v17 = vmax.f32 %v607_v53, 0.0  ;;  %s3518_s19 = sshll.u32 %s442_s18, 2 }
  0xa3   : > { %4438 = vmatmul.mubr.bf16.gmra.mxu0 %v5218_v44  ;;  %4473 = vmatprep.subr.bf16.mxu1 %v4637_v35  ;;  %s444_s9 = scalar_lea.vmem %s6063_s2, %s3518_s19 }
  0xa4   : > { %4441 = vmatprep.mubr.bf16.mxu0 %v5221_v48  ;;  %4238 = vmatpush3.bf16.msra.mxu0 %v4624_v54  ;;  %v641_v54 = vmax.f32 %v609_v32, 0.0  ;;  %v642_v59 = vmax.f32 %v610_v10, 0.0  ;;  %s710_s20 = scalar_select %p462_p11, 1, 0 }
  0xa5   : > { %1987 = vmatmul.mubr.bf16.gmra.mxu1 %v5125_v2  ;;  %4239 = vmatprep.subr.bf16.mxu0 %v4625_v63  ;;  %v4634_v63 = vld [vmem:[%s6064_s3 + $0x188] sm:$0xff]  }
  0xa6   : > { %1994 = vmatprep.mubr.bf16.mxu1 %v5171_v41  ;;  %4474 = vmatpush3.bf16.msra.mxu1 %v4637_v35  ;;  %v640_v35 = vmax.f32 %v608_v51, 0.0  ;;  %v658_v3 = vpack.c.bf16 %v642_v59, %v641_v54 }
  0xa7   : > { %4475 = vmatprep.subr.bf16.mxu1 %v4638_v13 }
  0xa8   : > { %4240 = vmatpush3.bf16.msra.mxu0 %v4626_v39  ;;  %v657_v11 = vpack.c.bf16 %v640_v35, %v639_v17  ;;  %v844_v45 = vshrl.u32 %v658_v3, 16  ;;  %v847_v23 = vshll.u32 %v658_v3, 16 }
  0xa9   : > { %4241 = vmatprep.subr.bf16.mxu0 %v4628_v43 }
  0xaa   : > { %4476 = vmatpush3.bf16.msra.mxu1 %v4638_v13  ;;  %v4636_v13 = vld [vmem:[%s6064_s3 + $0x180] sm:$0xff]   ;;  %v837_v39 = vshrl.u32 %v657_v11, 16  ;;  %v840_v25 = vshll.u32 %v657_v11, 16  ;;  %v846_v26 = vrot.slane %v844_v45, 7 }
  0xab   : > { %4442 = vmatmul.mubr.bf16.gmra.mxu0 %v5263_v37  ;;  %4477 = vmatprep.subr.bf16.mxu1 %v4639_v52 }
  0xac   : > { %4445 = vmatprep.mubr.bf16.mxu0 %v5290_v33  ;;  %4242 = vmatpush3.bf16.msra.mxu0 %v4629_v60  ;;  %v839_v43 = vrot.slane %v837_v39, 7  ;;  %v849_v60 = vor.u32 %v847_v23, %v846_v26 }
  0xad   : > { %1995 = vmatmul.mubr.bf16.gmra.mxu1 %v5121_v1  ;;  %4243 = vmatprep.subr.bf16.mxu0 %v4630_v36 }
  0xae   : > { %2002 = vmatprep.mubr.bf16.mxu1 %v5234_v56  ;;  %4478 = vmatpush3.bf16.msra.mxu1 %v4639_v52  ;;  %v842_v52 = vor.u32 %v840_v25, %v839_v43  ;;  %v5473_v53 = vsel %vm715_vm1, %v839_v43, %v849_v60 }
  0xaf   : > { %4479 = vmatprep.subr.bf16.mxu1 %v4640_v15  ;;  %v1739_v32 = vrot.slane %v5473_v53, 1  ;;  %v1726_v45 = vshrl.u32 %v5473_v53, 16 }
  0xb0   : > { %4244 = vmatpush3.bf16.msra.mxu0 %v4631_v18  ;;  %v5477_v36 = vsel %vm4878_vm4, 0, %v842_v52 }
  0xb1   : > { %4245 = vmatprep.subr.bf16.mxu0 %v4633_v27  ;;  %v1738_v51 = vrot.slane %v5477_v36, 1 }
  0xb2   : > { %4480 = vmatpush3.bf16.msra.mxu1 %v4640_v15  ;;  %v5490_v15 = vsel %vm4878_vm4, %v846_v26, 0 }
  0xb3   : > { %4446 = vmatmul.mubr.bf16.gmra.mxu0 %v5303_v8  ;;  %v5486_v10 = vsel %vm1111_vm5, %v1738_v51, %v1739_v32  ;;  %v1741_v18 = vrot.slane %v5490_v15, 1  ;;  %v1730_v43 = vshll.u32 %v5490_v15, 16 }
  0xb4   : > { %4449 = vmatprep.mubr.bf16.mxu0 %v5323_v22  ;;  %4246 = vmatpush3.bf16.msra.mxu0 %v4634_v63 }
  0xb5   : > { %2003 = vmatmul.mubr.bf16.gmra.mxu1 %v5190_v4  ;;  %4247 = vmatprep.subr.bf16.mxu0 %v4635_v9  ;;  %v5498_v27 = vsel %vm1111_vm5, %v1739_v32, %v1741_v18  ;;  %v1732_v15 = vrot.slane %v1730_v43, 1 }
  0xb6   : > { %2010 = vmatprep.mubr.bf16.mxu1 %v5266_v0 }
  0xb8   : > { %4248 = vmatpush3.bf16.msra.mxu0 %v4636_v13 }
  0xbb   : > { %4450 = vmatmul.mubr.bf16.gmra.mxu0 %v5333_v50 }
  0xbc   : > { %4453 = vmatprep.mubr.bf16.mxu0 %v5338_v7 }
  0xbd   : > { %2011 = vmatmul.mubr.bf16.gmra.mxu1 %v5197_v12 }
  0xbe   : > { %2018 = vmatprep.mubr.bf16.mxu1 %v5306_v30 }
  0xc3   : > { %4454 = vmatmul.mubr.bf16.gmra.mxu0 %v5348_v21 }
  0xc4   : > { %4457 = vmatprep.mubr.bf16.mxu0 %v5355_v61 }
  0xc5   : > { %2019 = vmatmul.mubr.bf16.gmra.mxu1 %v5273_v42 }
  0xc6   : > { %2026 = vmatprep.mubr.bf16.mxu1 %v5330_v40 }
  0xcb   : > { %4458 = vmatmul.mubr.bf16.gmra.mxu0 %v5363_v5 }
  0xcc   : > { %4461 = vmatprep.mubr.bf16.mxu0 %v5486_v10 }
  0xcd   : > { %2027 = vmatmul.mubr.bf16.gmra.mxu1 %v5269_v16 }
  0xce   : > { %2034 = vmatprep.mubr.bf16.mxu1 %v5351_v19 }
  0xd3   : > { %4462 = vmatmul.mubr.bf16.gmra.mxu0 %v5498_v27 }
  0xd4   : > { %2612 = vmatprep.mubr.bf16.mxu0 %v5168_v47 }
  0xd5   : > { %2035 = vmatmul.mubr.bf16.gmra.mxu1 %v5313_v29 }
  0xd6   : > { %2042 = vmatprep.mubr.bf16.mxu1 %v5366_v46 }
  0xdb   : > { %2613 = vmatmul.mubr.bf16.vlgmr.msra.gmra.mxu0 %v5125_v2  ;;  %v1717_v2 = vshll.u32 %v5477_v36, 16 }
  0xdc   : > { %2620 = vmatprep.mubr.bf16.mxu0 %v5171_v41 }
  0xdd   : > { %2043 = vmatmul.mubr.bf16.gmra.mxu1 %v5309_v34  ;;  %v1719_v17 = vrot.slane %v1717_v2, 1 }
  0xde   : > { %2050 = vmatprep.mubr.bf16.mxu1 %v4924_v49 }
  0xe3   : > { %2621 = vmatmul.mubr.bf16.gmra.mxu0 %v5121_v1  ;;  %v1715_v1 = vshrl.u32 %v5477_v36, 16 }
  0xe4   : > { %2628 = vmatprep.mubr.bf16.mxu0 %v5234_v56  ;;  %v1722_v56 = vshll.u32 %v5473_v53, 16 }
  0xe5   : > { %2051 = vmatmul.mubr.bf16.gmra.mxu1 %v4891_v20  ;;  %v1720_v59 = vor.u32 %v1719_v17, %v1715_v1 }
  0xe6   : > { %2058 = vmatprep.mubr.bf16.mxu1 %v4933_v57  ;;  %v1724_v63 = vrot.slane %v1722_v56, 1 }
  0xe8   : > { %v5537_v39 = vsel %vm918_vm3, %v1720_v59, %v1724_v63  ;;  %v1728_v32 = vor.u32 %v1726_v45, %v1724_v63 }
  0xeb   : > { %2629 = vmatmul.mubr.bf16.gmra.mxu0 %v5190_v4 }
  0xec   : > { %2636 = vmatprep.mubr.bf16.mxu0 %v5266_v0 }
  0xed   : > { %2059 = vmatmul.mubr.bf16.gmra.mxu1 %v4898_v24 }
  0xee   : > { %2066 = vmatprep.mubr.bf16.mxu1 %v5022_v31 }
  0xf1   : > { %v4049_v47 = vpop.f32.mrf.mxu1 }
  0xf3   : > { %v4050_v41 = vpop.f32.mrf.mxu1  ;;  %2637 = vmatmul.mubr.bf16.gmra.mxu0 %v5197_v12 }
  0xf4   : > { %v5521_v35 = vadd.f32 %v4050_v41, %v4049_v47  ;;  %2644 = vmatprep.mubr.bf16.mxu0 %v5306_v30  ;;  %v5554_v41 = vsel %vm918_vm3, %v1728_v32, %v1732_v15 }
  0xf5   : > { %2067 = vmatmul.mubr.bf16.gmra.mxu1 %v4988_v58  ;;  %v4052_v4 = vpop.f32.mrf.mxu1 }
  0xf6   : > { %v3977_v0 = vpop.f32.mrf.mxu0  ;;  %2074 = vmatprep.mubr.bf16.mxu1 %v5037_v38 }
  0xf7   : > { %v4053_v54 = vpop.f32.mrf.mxu1 }
  0xf8   : > { %v3978_v11 = vpop.f32.mrf.mxu0  ;;  %v5530_v12 = vadd.f32 %v4053_v54, %v4052_v4 }
  0xf9   : > { %v5532_v3 = vadd.f32 %v3978_v11, %v3977_v0  ;;  %v4055_v9 = vpop.f32.mrf.mxu1 }
  0xfa   : > { %v3980_v30 = vpop.f32.mrf.mxu0 }
  0xfb   : > { %v4056_v13 = vpop.f32.mrf.mxu1  ;;  %2645 = vmatmul.mubr.bf16.gmra.mxu0 %v5273_v42 }
  0xfc   : > { %v3981_v25 = vpop.f32.mrf.mxu0  ;;  %v5542_v26 = vadd.f32 %v4056_v13, %v4055_v9  ;;  %2652 = vmatprep.mubr.bf16.mxu0 %v5330_v40 }
  0xfd   : > { %2075 = vmatmul.mubr.bf16.gmra.mxu1 %v4997_v62  ;;  %v5545_v23 = vadd.f32 %v3981_v25, %v3980_v30  ;;  %v4058_v52 = vpop.f32.mrf.mxu1 }
  0xfe   : > { %v3983_v60 = vpop.f32.mrf.mxu0  ;;  %2082 = vmatprep.mubr.bf16.mxu1 %v5537_v39 }
  0xff   : > { %v4059_v51 = vpop.f32.mrf.mxu1 }
 0x100   : > { %v3984_v42 = vpop.f32.mrf.mxu0  ;;  %v5551_v18 = vadd.f32 %v4059_v51, %v4058_v52  ;;  %v3945_v52 = vld [vmem:[%s444_s9 + $0x8] sm:$0xff]  }
 0x101   : > { %v3985_v2 = vadd.f32 %v3984_v42, %v3983_v60  ;;  %v3847_v15 = vunpack.c.l.bf16 %v3945_v52 }
 0x102   : > { %v3986_v47 = vpop.f32.mrf.mxu0 }
 0x103   : > { %2653 = vmatmul.mubr.bf16.gmra.mxu0 %v5269_v16 }
 0x104   : > { %v3987_v40 = vpop.f32.mrf.mxu0  ;;  %2660 = vmatprep.mubr.bf16.mxu0 %v5351_v19  ;;  %v3842_v19 = vld [vmem:[%s444_s9] sm:$0xff]  }
 0x105   : > { %v4061_v1 = vpop.f32.mrf.mxu1  ;;  %2083 = vmatmul.mubr.bf16.gmra.mxu1 %v5477_v36  ;;  %v3988_v17 = vadd.f32 %v3987_v40, %v3986_v47  ;;  %v3843_v43 = vunpack.c.l.bf16 %v3842_v19  ;;  %v3844_v25 = vunpack.c.h.bf16 %v3842_v19 }
 0x106   : > { %2090 = vmatprep.mubr.bf16.mxu1 %v5554_v41 }
 0x107   : > { %v4062_v56 = vpop.f32.mrf.mxu1  ;;  %v696_v47 = vmul.f32 %v5229_v55, %v3843_v43  ;;  %v697_v40 = vmul.f32 %v5229_v55, %v3844_v25 }
 0x108   : > { %v5561_v4 = vadd.f32 %v4062_v56, %v4061_v1 }
 0x109   : > { %v4064_v0 = vpop.f32.mrf.mxu1 }
 0x10b   : > { %v4065_v16 = vpop.f32.mrf.mxu1  ;;  %v3989_v54 = vpop.f32.mrf.mxu0  ;;  %2661 = vmatmul.mubr.bf16.gmra.mxu0 %v5313_v29 }
 0x10c   : > { %v5567_v59 = vadd.f32 %v4065_v16, %v4064_v0  ;;  %2668 = vmatprep.mubr.bf16.mxu0 %v5366_v46 }
 0x10d   : > { %v4067_v63 = vpop.f32.mrf.mxu1  ;;  %2091 = vmatmul.mubr.bf16.gmra.mxu1 %v5473_v53  ;;  %v3990_v11 = vpop.f32.mrf.mxu0 }
 0x10e   : > { %4481 = vmatprep.mubr.bf16.mxu1 %v5156_v28  ;;  %v3991_v9 = vadd.f32 %v3990_v11, %v3989_v54  ;;  %v3848_v28 = vunpack.c.h.bf16 %v3945_v52  ;;  %v698_v54 = vmul.f32 %v5229_v55, %v3847_v15 }
 0x10f   : > { %v4068_v30 = vpop.f32.mrf.mxu1  ;;  %v3992_v13 = vpop.f32.mrf.mxu0 }
 0x110   : > { %v5572_v45 = vadd.f32 %v4068_v30, %v4067_v63  ;;  %v699_v11 = vmul.f32 %v5229_v55, %v3848_v28  ;;  %v702_v25 = vadd.f32 %v5247_v14, %v698_v54 }
 0x111   : > { %v4070_v29 = vpop.f32.mrf.mxu1  ;;  %v3993_v60 = vpop.f32.mrf.mxu0 }
 0x112   : > { %v3994_v51 = vadd.f32 %v3993_v60, %v3992_v13  ;;  %v703_v55 = vadd.f32 %v5247_v14, %v699_v11 }
 0x113   : > { %v4071_v32 = vpop.f32.mrf.mxu1  ;;  %v3995_v42 = vpop.f32.mrf.mxu0  ;;  %2669 = vmatmul.mubr.bf16.gmra.mxu0 %v5309_v34 }
 0x114   : > { %v5575_v46 = vadd.f32 %v4071_v32, %v4070_v29  ;;  %2676 = vmatprep.mubr.bf16.mxu0 %v4924_v49  ;;  %v701_v49 = vadd.f32 %v5247_v14, %v697_v40  ;;  %v706_v40 = vmax.f32 %v702_v25, 0.0 }
 0x115   : > { %v4387_v1 = vpop.f32.mrf.mxu1  ;;  %4482 = vmatmul.mubr.bf16.vlgmr.msra.gmra.mxu1 %v5218_v44  ;;  %v3996_v56 = vpop.f32.mrf.mxu0  ;;  %v700_v44 = vadd.f32 %v5247_v14, %v696_v47  ;;  %v707_v14 = vmax.f32 %v703_v55, 0.0 }
 0x116   : > { %v5581_v0 = vadd.f32 %v4387_v1, %v3985_v2  ;;  %4485 = vmatprep.mubr.bf16.mxu1 %v5221_v48  ;;  %v3997_v34 = vadd.f32 %v3996_v56, %v3995_v42  ;;  %v705_v60 = vmax.f32 %v701_v49, 0.0  ;;  %v711_v42 = vstv %s710_s20 }
 0x117   : > { %v1555_v16 = vpop.f32.mrf.mxu1  ;;  %v3998_v63 = vpop.f32.mrf.mxu0  ;;  %v704_v29 = vmax.f32 %v700_v44, 0.0  ;;  %vm5609_vm6 = vcmp.eq.s32.totalorder %v711_v42, 1 }
 0x118   : > { %v5587_v19 = vadd.f32 %v5532_v3, %v1555_v16 }
 0x119   : > { %v4388_v30 = vpop.f32.mrf.mxu1  ;;  %v3999_v2 = vpop.f32.mrf.mxu0  ;;  %v708_v1 = vpack.c.bf16 %v705_v60, %v704_v29 }
 0x11a   : > { %v5592_v13 = vadd.f32 %v4388_v30, %v3988_v17  ;;  %v4000_v48 = vadd.f32 %v3999_v2, %v3998_v63 }
 0x11b   : > { %v1558_v43 = vpop.f32.mrf.mxu1  ;;  %v4001_v52 = vpop.f32.mrf.mxu0  ;;  %2677 = vmatmul.mubr.bf16.gmra.mxu0 %v4891_v20  ;;  %v713_v11 = vsel %vm5609_vm6, %v708_v1, 0 }
 0x11c   : > { %v5599_v3 = vadd.f32 %v5545_v23, %v1558_v43  ;;  %2684 = vmatprep.mubr.bf16.mxu0 %v4933_v57 }
 0x11d   : > { %v4391_v32 = vpop.f32.mrf.mxu1  ;;  %4486 = vmatmul.mubr.bf16.gmra.mxu1 %v5263_v37  ;;  %v4002_v17 = vpop.f32.mrf.mxu0 }
 0x11e   : > { %v5604_v15 = vadd.f32 %v4391_v32, %v3997_v34  ;;  %4489 = vmatprep.mubr.bf16.mxu1 %v5290_v33  ;;  %v4003_v28 = vadd.f32 %v4002_v17, %v4001_v52 }
 0x11f   : > { %v1571_v20 = vpop.f32.mrf.mxu1  ;;  %v4004_v47 = vpop.f32.mrf.mxu0 }
 0x120   : > { %v5607_v23 = vadd.f32 %v3991_v9, %v1571_v20  ;;  %v709_v9 = vpack.c.bf16 %v707_v14, %v706_v40 }
 0x121   : > { %v4392_v56 = vpop.f32.mrf.mxu1  ;;  %v4005_v57 = vpop.f32.mrf.mxu0 }
 0x122   : > { %v5613_v37 = vadd.f32 %v4392_v56, %v4000_v48  ;;  %v4006_v34 = vadd.f32 %v4005_v57, %v4004_v47  ;;  %v852_v48 = vshrl.u32 %v713_v11, 16 }
 0x123   : > { %v1574_v54 = vpop.f32.mrf.mxu1  ;;  %v4007_v33 = vpop.f32.mrf.mxu0  ;;  %2685 = vmatmul.mubr.bf16.gmra.mxu0 %v4898_v24  ;;  %v714_v24 = vsel %vm5609_vm6, %v709_v9, 0 }
 0x124   : > { %v5616_v63 = vadd.f32 %v3994_v51, %v1574_v54  ;;  %2692 = vmatprep.mubr.bf16.mxu0 %v5022_v31  ;;  %v854_v60 = vrot.slane %v852_v48, 7  ;;  %v855_v31 = vshll.u32 %v713_v11, 16  ;;  %v859_v32 = vshrl.u32 %v714_v24, 16 }
 0x125   : > { %v4395_v44 = vpop.f32.mrf.mxu1  ;;  %4490 = vmatmul.mubr.bf16.gmra.mxu1 %v5303_v8  ;;  %v4008_v49 = vpop.f32.mrf.mxu0  ;;  %v862_v56 = vshll.u32 %v714_v24, 16 }
 0x126   : > { %4493 = vmatprep.mubr.bf16.mxu1 %v5323_v22  ;;  %v4009_v30 = vadd.f32 %v4008_v49, %v4007_v33  ;;  %v857_v14 = vor.u32 %v855_v31, %v854_v60  ;;  %v861_v1 = vrot.slane %v859_v32, 7 }
 0x127   : > { %v1587_v2 = vpop.f32.mrf.mxu1  ;;  %v4010_v43 = vpop.f32.mrf.mxu0 }
 0x128   : > { %v5623_v25 = vadd.f32 %v4003_v28, %v1587_v2  ;;  %v5627_v51 = vadd.f32 %v4395_v44, %v4009_v30  ;;  %v864_v9 = vor.u32 %v862_v56, %v861_v1 }
 0x129   : > { %v4396_v52 = vpop.f32.mrf.mxu1  ;;  %v4011_v55 = vpop.f32.mrf.mxu0 }
 0x12a   : > { %v4012_v29 = vadd.f32 %v4011_v55, %v4010_v43  ;;  %v5651_v48 = vsel %vm715_vm1, %v854_v60, %v864_v9 }
 0x12b   : > { %v1590_v8 = vpop.f32.mrf.mxu1  ;;  %v4013_v17 = vpop.f32.mrf.mxu0  ;;  %2693 = vmatmul.mubr.bf16.gmra.mxu0 %v4988_v58 }
 0x12c   : > { %v5630_v22 = vadd.f32 %v4006_v34, %v1590_v8  ;;  %v5632_v42 = vadd.f32 %v4396_v52, %v4012_v29  ;;  %2700 = vmatprep.mubr.bf16.mxu0 %v5037_v38 }
 0x12d   : > { %v4399_v28 = vpop.f32.mrf.mxu1  ;;  %4494 = vmatmul.mubr.bf16.gmra.mxu1 %v5333_v50  ;;  %v4014_v20 = vpop.f32.mrf.mxu0  ;;  %v5641_v50 = vsel %vm4878_vm4, 0, %v857_v14  ;;  %v2381_v14 = vrot.slane %v5651_v48, 1 }
 0x12e   : > { %4497 = vmatprep.mubr.bf16.mxu1 %v5338_v7  ;;  %v4015_v47 = vadd.f32 %v4014_v20, %v4013_v17  ;;  %v2359_v49 = vshll.u32 %v5641_v50, 16  ;;  %v2357_v55 = vshrl.u32 %v5641_v50, 16 }
 0x12f   : > { %v1603_v40 = vpop.f32.mrf.mxu1  ;;  %v4016_v16 = vpop.f32.mrf.mxu0 }
 0x130   : > { %v5637_v57 = vadd.f32 %v4015_v47, %v1603_v40  ;;  %v2380_v40 = vrot.slane %v5641_v50, 1 }
 0x131   : > { %v4400_v58 = vpop.f32.mrf.mxu1  ;;  %v4017_v34 = vpop.f32.mrf.mxu0 }
 0x132   : > { %v4018_v54 = vadd.f32 %v4017_v34, %v4016_v16  ;;  %v2382_v9 = vsel %vm1111_vm5, %v2380_v40, %v2381_v14 }
 0x133   : > { %v1606_v33 = vpop.f32.mrf.mxu1  ;;  %v4019_v38 = vpop.f32.mrf.mxu0  ;;  %2701 = vmatmul.mubr.bf16.gmra.mxu0 %v4997_v62 }
 0x134   : > { %v5644_v7 = vadd.f32 %v4018_v54, %v1606_v33  ;;  %2708 = vmatprep.mubr.bf16.mxu0 %v5537_v39  ;;  %v2364_v39 = vshll.u32 %v5651_v48, 16 }
 0x135   : > { %v4403_v11 = vpop.f32.mrf.mxu1  ;;  %4498 = vmatmul.mubr.bf16.gmra.mxu1 %v5348_v21  ;;  %v4020_v44 = vpop.f32.mrf.mxu0  ;;  %v2361_v21 = vrot.slane %v2359_v49, 1 }
 0x136   : > { %4501 = vmatprep.mubr.bf16.mxu1 %v5355_v61  ;;  %v4021_v30 = vadd.f32 %v4020_v44, %v4019_v38 }
 0x137   : > { %v1619_v2 = vpop.f32.mrf.mxu1  ;;  %v4022_v43 = vpop.f32.mrf.mxu0  ;;  %v2362_v17 = vor.u32 %v2361_v21, %v2357_v55 }
 0x138   : > { %v5653_v24 = vadd.f32 %v4399_v28, %v4021_v30  ;;  %v2366_v28 = vrot.slane %v2364_v39, 1 }
 0x139   : > { %v4404_v62 = vpop.f32.mrf.mxu1  ;;  %v4023_v52 = vpop.f32.mrf.mxu0 }
 0x13a   : > { %v4024_v29 = vadd.f32 %v4023_v52, %v4022_v43 }
 0x13b   : > { %v1622_v8 = vpop.f32.mrf.mxu1  ;;  %v4025_v61 = vpop.f32.mrf.mxu0  ;;  %2709 = vmatmul.mubr.bf16.gmra.mxu0 %v5477_v36  ;;  %v917_v36 = vsel %vm4878_vm4, %v861_v1, 0 }
 0x13c   : > { %v5658_v31 = vadd.f32 %v4400_v58, %v4024_v29  ;;  %2716 = vmatprep.mubr.bf16.mxu0 %v5554_v41  ;;  %v2367_v58 = vsel %vm918_vm3, %v2362_v17, %v2366_v28  ;;  %v2372_v34 = vshll.u32 %v917_v36, 16  ;;  %v2383_v30 = vrot.slane %v917_v36, 1 }
 0x13d   : > { %v5660_v32 = vpop.f32.mrf.mxu1  ;;  %4502 = vmatmul.mubr.bf16.gmra.mxu1 %v5363_v5  ;;  %v4026_v60 = vpop.f32.mrf.mxu0 }
 0x13e   : > { %4505 = vmatprep.mubr.bf16.mxu1 %v5486_v10  ;;  %v4027_v20 = vadd.f32 %v4026_v60, %v4025_v61  ;;  %v2368_v10 = vshrl.u32 %v5651_v48, 16  ;;  %v2374_v43 = vrot.slane %v2372_v34, 1 }
 0x13f   : > { %v1635_v47 = vpop.f32.mrf.mxu1  ;;  %v4028_v56 = vpop.f32.mrf.mxu0 }
 0x140   : > { %v5669_v16 = vadd.f32 %v4027_v20, %v1619_v2  ;;  %v2370_v2 = vor.u32 %v2368_v10, %v2366_v28 }
 0x141   : > { %v5671_v5 = vpop.f32.mrf.mxu1  ;;  %v4029_v41 = vpop.f32.mrf.mxu0 }
 0x142   : > { %v4030_v54 = vadd.f32 %v4029_v41, %v4028_v56  ;;  %v2375_v61 = vsel %vm918_vm3, %v2370_v2, %v2374_v43 }
 0x143   : > { %v1638_v33 = vpop.f32.mrf.mxu1  ;;  %v4031_v38 = vpop.f32.mrf.mxu0  ;;  %2717 = vmatmul.mubr.bf16.gmra.mxu0 %v5473_v53 }
 0x144   : > { %v5677_v6 = vadd.f32 %v4030_v54, %v1622_v8  ;;  %2724 = vmatprep.mubr.bf16.mxu0 %v2367_v58 }
 0x145   : > { %v4411_v1 = vpop.f32.mrf.mxu1  ;;  %4506 = vmatmul.mubr.bf16.gmra.mxu1 %v5498_v27  ;;  %v4032_v44 = vpop.f32.mrf.mxu0 }
 0x146   : > { %v5681_v49 = vadd.f32 %v4411_v1, %v5542_v26  ;;  %4509 = vmatprep.mubr.bf16.mxu1 %v2382_v9  ;;  %v4033_v52 = vadd.f32 %v4032_v44, %v4031_v38  ;;  %v2384_v26 = vsel %vm1111_vm5, %v2381_v14, %v2383_v30 }
 0x147   : > { %v1651_v55 = vpop.f32.mrf.mxu1  ;;  %v4034_v21 = vpop.f32.mrf.mxu0 }
 0x148   : > { %v5684_v39 = vadd.f32 %v5521_v35, %v1651_v55  ;;  %v5686_v53 = vadd.f32 %v4403_v11, %v4033_v52 }
 0x149   : > { %v4412_v29 = vpop.f32.mrf.mxu1  ;;  %v4035_v8 = vpop.f32.mrf.mxu0 }
 0x14a   : > { %v5689_v27 = vadd.f32 %v4412_v29, %v5551_v18  ;;  %v4036_v60 = vadd.f32 %v4035_v8, %v4034_v21 }
 0x14b   : > { %v1654_v17 = vpop.f32.mrf.mxu1  ;;  %v4037_v28 = vpop.f32.mrf.mxu0  ;;  %2725 = vmatmul.mubr.bf16.gmra.mxu0 %v5641_v50 }
 0x14c   : > { %v5695_v20 = vadd.f32 %v5530_v12, %v1654_v17  ;;  %v5697_v35 = vadd.f32 %v4404_v62, %v4036_v60  ;;  %2732 = vmatprep.mubr.bf16.mxu0 %v2375_v61 }
 0x14d   : > { %v4415_v11 = vpop.f32.mrf.mxu1  ;;  %4510 = vmatmul.mubr.bf16.gmra.mxu1 %v2384_v26  ;;  %v4038_v40 = vpop.f32.mrf.mxu0 }
 0x14e   : > { %v5700_v18 = vadd.f32 %v4415_v11, %v5572_v45  ;;  %v4039_v14 = vadd.f32 %v4038_v40, %v4037_v28 }
 0x14f   : > { %v1667_v36 = vpop.f32.mrf.mxu1  ;;  %v4040_v56 = vpop.f32.mrf.mxu0 }
 0x150   : > { %v5703_v41 = vadd.f32 %v5561_v4, %v1667_v36  ;;  %v5705_v58 = vadd.f32 %v4039_v14, %v1635_v47 }
 0x151   : > { %v4416_v50 = vpop.f32.mrf.mxu1  ;;  %v4041_v12 = vpop.f32.mrf.mxu0 }
 0x152   : > { %v5708_v62 = vadd.f32 %v4416_v50, %v5575_v46  ;;  %v4042_v10 = vadd.f32 %v4041_v12, %v4040_v56 }
 0x153   : > { %v1670_v34 = vpop.f32.mrf.mxu1  ;;  %v4043_v54 = vpop.f32.mrf.mxu0  ;;  %2733 = vmatmul.mubr.bf16.gmra.mxu0 %v5651_v48 }
 0x154   : > { %v5712_v45 = vadd.f32 %v5567_v59, %v1670_v34  ;;  %v5714_v9 = vadd.f32 %v4042_v10, %v1638_v33 }
 0x155   : > { %v4113_v38 = vpop.f32.mrf.mxu1  ;;  %v4044_v4 = vpop.f32.mrf.mxu0 }
 0x156   : > { %v4045_v1 = vadd.f32 %v4044_v4, %v4043_v54 }
 0x157   : > { %v4114_v47 = vpop.f32.mrf.mxu1  ;;  %v4046_v44 = vpop.f32.mrf.mxu0 }
 0x158   : > { %v4115_v30 = vadd.f32 %v4114_v47, %v4113_v38  ;;  %v5717_v2 = vadd.f32 %v5660_v32, %v4045_v1 }
 0x159   : > { %v4116_v46 = vpop.f32.mrf.mxu1  ;;  %v4047_v43 = vpop.f32.mrf.mxu0 }
 0x15a   : > { %v4048_v52 = vadd.f32 %v4047_v43, %v4046_v44 }
 0x15b   : > { %v4117_v55 = vpop.f32.mrf.mxu1  ;;  %v4435_v21 = vpop.f32.mrf.mxu0 }
 0x15c   : > { %v4118_v48 = vadd.f32 %v4117_v55, %v4116_v46  ;;  %v5720_v59 = vadd.f32 %v5671_v5, %v4048_v52 }
 0x15d   : > { %v4119_v33 = vpop.f32.mrf.mxu1  ;;  %v2133_v29 = vpop.f32.mrf.mxu0 }
 0x15e   : > { %v2134_v8 = vadd.f32 %v4115_v30, %v2133_v29 }
 0x15f   : > { %v4120_v26 = vpop.f32.mrf.mxu1  ;;  %v4436_v61 = vpop.f32.mrf.mxu0 }
 0x160   : > { %v4121_v60 = vadd.f32 %v4120_v26, %v4119_v33  ;;  %v5723_v17 = vadd.f32 %v2134_v8, %v5587_v19 }
 0x161   : > { %v4122_v32 = vpop.f32.mrf.mxu1  ;;  %v2136_v11 = vpop.f32.mrf.mxu0 }
 0x162   : > { %v2142_v28 = vadd.f32 %v4435_v21, %v4121_v60  ;;  %v2137_v40 = vadd.f32 %v4118_v48, %v2136_v11 }
 0x163   : > { %v4123_v14 = vpop.f32.mrf.mxu1  ;;  %v4439_v36 = vpop.f32.mrf.mxu0 }
 0x164   : > { %v4124_v56 = vadd.f32 %v4123_v14, %v4122_v32  ;;  %v5726_v50 = vadd.f32 %v2142_v28, %v5581_v0  ;;  %v5729_v5 = vadd.f32 %v2137_v40, %v5599_v3 }
 0x165   : > { %v4125_v12 = vpop.f32.mrf.mxu1  ;;  %v2149_v34 = vpop.f32.mrf.mxu0 }
 0x166   : > { %v2145_v10 = vadd.f32 %v4436_v61, %v4124_v56 }
 0x167   : > { %v4126_v54 = vpop.f32.mrf.mxu1  ;;  %v4440_v38 = vpop.f32.mrf.mxu0 }
 0x168   : > { %v4127_v19 = vadd.f32 %v4126_v54, %v4125_v12  ;;  %v5732_v4 = vadd.f32 %v2145_v10, %v5592_v13 }
 0x169   : > { %v4128_v1 = vpop.f32.mrf.mxu1  ;;  %v2152_v44 = vpop.f32.mrf.mxu0 }
 0x16a   : > { %v2150_v47 = vadd.f32 %v4127_v19, %v2149_v34 }
 0x16b   : > { %v4129_v30 = vpop.f32.mrf.mxu1  ;;  %v4443_v46 = vpop.f32.mrf.mxu0 }
 0x16c   : > { %v4130_v43 = vadd.f32 %v4129_v30, %v4128_v1  ;;  %v5735_v0 = vadd.f32 %v2150_v47, %v5607_v23 }
 0x16d   : > { %v4131_v3 = vpop.f32.mrf.mxu1  ;;  %v2165_v55 = vpop.f32.mrf.mxu0 }
 0x16e   : > { %v2153_v52 = vadd.f32 %v4130_v43, %v2152_v44 }
 0x16f   : > { %v4132_v21 = vpop.f32.mrf.mxu1  ;;  %v4444_v48 = vpop.f32.mrf.mxu0 }
 0x170   : > { %v4133_v33 = vadd.f32 %v4132_v21, %v4131_v3  ;;  %v5738_v29 = vadd.f32 %v2153_v52, %v5616_v63 }
 0x171   : > { %v4134_v13 = vpop.f32.mrf.mxu1  ;;  %v2168_v26 = vpop.f32.mrf.mxu0 }
 0x172   : > { %v2158_v8 = vadd.f32 %v4439_v36, %v4133_v33 }
 0x173   : > { %v4135_v61 = vpop.f32.mrf.mxu1  ;;  %v4447_v60 = vpop.f32.mrf.mxu0 }
 0x174   : > { %v4136_v32 = vadd.f32 %v4135_v61, %v4134_v13  ;;  %v5741_v28 = vadd.f32 %v2158_v8, %v5604_v15 }
 0x175   : > { %v4137_v23 = vpop.f32.mrf.mxu1  ;;  %v2181_v40 = vpop.f32.mrf.mxu0 }
 0x176   : > { %v2161_v11 = vadd.f32 %v4440_v38, %v4136_v32 }
 0x177   : > { %v4138_v14 = vpop.f32.mrf.mxu1  ;;  %v4448_v56 = vpop.f32.mrf.mxu0 }
 0x178   : > { %v4139_v12 = vadd.f32 %v4138_v14, %v4137_v23  ;;  %v5744_v10 = vadd.f32 %v2161_v11, %v5613_v37 }
 0x179   : > { %v4140_v63 = vpop.f32.mrf.mxu1  ;;  %v2184_v54 = vpop.f32.mrf.mxu0 }
 0x17a   : > { %v2166_v34 = vadd.f32 %v4139_v12, %v2165_v55 }
 0x17b   : > { %v4141_v36 = vpop.f32.mrf.mxu1  ;;  %v5746_v19 = vpop.f32.mrf.mxu0 }
 0x17c   : > { %v4142_v1 = vadd.f32 %v4141_v36, %v4140_v63  ;;  %v5749_v47 = vadd.f32 %v2166_v34, %v5623_v25 }
 0x17d   : > { %v4143_v15 = vpop.f32.mrf.mxu1  ;;  %v2197_v38 = vpop.f32.mrf.mxu0 }
 0x17e   : > { %v2169_v44 = vadd.f32 %v4142_v1, %v2168_v26 }
 0x17f   : > { %v4144_v30 = vpop.f32.mrf.mxu1  ;;  %v5751_v43 = vpop.f32.mrf.mxu0 }
 0x180   : > { %v4145_v3 = vadd.f32 %v4144_v30, %v4143_v15  ;;  %v5754_v37 = vadd.f32 %v2169_v44, %v5630_v22 }
 0x181   : > { %v4146_v52 = vpop.f32.mrf.mxu1  ;;  %v2200_v21 = vpop.f32.mrf.mxu0 }
 0x182   : > { %v2174_v55 = vadd.f32 %v4443_v46, %v4145_v3 }
 0x183   : > { %v4147_v33 = vpop.f32.mrf.mxu1  ;;  %v5756_v13 = vpop.f32.mrf.mxu0 }
 0x184   : > { %v4148_v8 = vadd.f32 %v4147_v33, %v4146_v52  ;;  %v5759_v25 = vadd.f32 %v2174_v55, %v5627_v51 }
 0x185   : > { %v4149_v61 = vpop.f32.mrf.mxu1  ;;  %v2213_v32 = vpop.f32.mrf.mxu0 }
 0x186   : > { %v2177_v26 = vadd.f32 %v4444_v48, %v4148_v8 }
 0x187   : > { %v4150_v23 = vpop.f32.mrf.mxu1  ;;  %v5761_v11 = vpop.f32.mrf.mxu0 }
 0x188   : > { %v4151_v14 = vadd.f32 %v4150_v23, %v4149_v61  ;;  %v5764_v22 = vadd.f32 %v2177_v26, %v5632_v42 }
 0x189   : > { %v4152_v12 = vpop.f32.mrf.mxu1  ;;  %v2216_v63 = vpop.f32.mrf.mxu0 }
 0x18a   : > { %v2182_v46 = vadd.f32 %v4151_v14, %v2181_v40 }
 0x18b   : > { %v4153_v34 = vpop.f32.mrf.mxu1  ;;  %v5766_v36 = vpop.f32.mrf.mxu0 }
 0x18c   : > { %v4154_v1 = vadd.f32 %v4153_v34, %v4152_v12  ;;  %v5769_v51 = vadd.f32 %v2182_v46, %v5637_v57 }
 0x18d   : > { %v4155_v15 = vpop.f32.mrf.mxu1  ;;  %v5771_v44 = vpop.f32.mrf.mxu0 }
 0x18e   : > { %v2185_v48 = vadd.f32 %v4154_v1, %v2184_v54 }
 0x18f   : > { %v4156_v30 = vpop.f32.mrf.mxu1  ;;  %v5773_v3 = vpop.f32.mrf.mxu0 }
 0x190   : > { %v4157_v52 = vadd.f32 %v4156_v30, %v4155_v15  ;;  %v5776_v42 = vadd.f32 %v2185_v48, %v5644_v7 }
 0x191   : > { %v4158_v40 = vpop.f32.mrf.mxu1  ;;  %v5778_v33 = vpop.f32.mrf.mxu0 }
 0x192   : > { %v2190_v55 = vadd.f32 %v4447_v60, %v4157_v52 }
 0x193   : > { %v4159_v8 = vpop.f32.mrf.mxu1  ;;  %v5780_v61 = vpop.f32.mrf.mxu0 }
 0x194   : > { %v4160_v57 = vadd.f32 %v4159_v8, %v4158_v40  ;;  %v5783_v26 = vadd.f32 %v2190_v55, %v5653_v24 }
 0x195   : > { %v4161_v54 = vpop.f32.mrf.mxu1  ;;  %v5785_v14 = vpop.f32.mrf.mxu0 }
 0x196   : > { %v2193_v23 = vadd.f32 %v4448_v56, %v4160_v57 }
 0x197   : > { %v4162_v12 = vpop.f32.mrf.mxu1  ;;  %v5787_v46 = vpop.f32.mrf.mxu0 }
 0x198   : > { %v4163_v7 = vadd.f32 %v4162_v12, %v4161_v54  ;;  %v5790_v34 = vadd.f32 %v2193_v23, %v5658_v31 }
 0x199   : > { %v4164_v60 = vpop.f32.mrf.mxu1  ;;  %v5792_v15 = vpop.f32.mrf.mxu0 }
 0x19a   : > { %v2198_v1 = vadd.f32 %v4163_v7, %v2197_v38 }
 0x19b   : > { %v4165_v48 = vpop.f32.mrf.mxu1  ;;  %v5794_v30 = vpop.f32.mrf.mxu0 }
 0x19c   : > { %v4166_v24 = vadd.f32 %v4165_v48, %v4164_v60  ;;  %v5797_v52 = vadd.f32 %v2198_v1, %v5669_v16 }
 0x19d   : > { %v4167_v56 = vpop.f32.mrf.mxu1  ;;  %v5799_v55 = vpop.f32.mrf.mxu0 }
 0x19e   : > { %6076 = vst [vmem:[#allocation3_spill] sm:$0xff] %v5797_v52  ;;  %v2201_v40 = vadd.f32 %v4166_v24, %v2200_v21 }
 0x19f   : > { %v4168_v8 = vpop.f32.mrf.mxu1  ;;  %v5801_v57 = vpop.f32.mrf.mxu0 }
 0x1a0   : > { %v4169_v31 = vadd.f32 %v4168_v8, %v4167_v56  ;;  %v5804_v54 = vadd.f32 %v2201_v40, %v5677_v6 }
 0x1a1   : > { %v4170_v38 = vpop.f32.mrf.mxu1  ;;  %v5807_v12 = vpop.f32.mrf.mxu0 }
 0x1a2   : > { %6077 = vst [vmem:[#allocation4_spill] sm:$0xff] %v5804_v54  ;;  %v2206_v23 = vadd.f32 %v5746_v19, %v4169_v31 }
 0x1a3   : > { %v4171_v7 = vpop.f32.mrf.mxu1  ;;  %v5809_v60 = vpop.f32.mrf.mxu0 }
 0x1a4   : > { %v4172_v16 = vadd.f32 %v4171_v7, %v4170_v38  ;;  %v5812_v21 = vadd.f32 %v2206_v23, %v5686_v53 }
 0x1a5   : > { %v4173_v1 = vpop.f32.mrf.mxu1  ;;  %v5815_v24 = vpop.f32.mrf.mxu0 }
 0x1a6   : > { %6078 = vst [vmem:[#allocation5_spill] sm:$0xff] %v5812_v21  ;;  %v2209_v48 = vadd.f32 %v5751_v43, %v4172_v16 }
 0x1a7   : > { %v4174_v56 = vpop.f32.mrf.mxu1  ;;  %v5817_v6 = vpop.f32.mrf.mxu0 }
 0x1a8   : > { %v4175_v40 = vadd.f32 %v4174_v56, %v4173_v1  ;;  %v5820_v19 = vadd.f32 %v2209_v48, %v5697_v35 }
 0x1a9   : > { %v4176_v8 = vpop.f32.mrf.mxu1  ;;  %v5822_v54 = vpop.f32.mrf.mxu0 }
 0x1aa   : > { %v2214_v31 = vadd.f32 %v4175_v40, %v2213_v32 }
 0x1ab   : > { %v4177_v38 = vpop.f32.mrf.mxu1  ;;  %v5824_v7 = vpop.f32.mrf.mxu0 }
 0x1ac   : > { %v4178_v53 = vadd.f32 %v4177_v38, %v4176_v8  ;;  %v5827_v23 = vadd.f32 %v2214_v31, %v5705_v58 }
 0x1ad   : > { %v4179_v43 = vpop.f32.mrf.mxu1  ;;  %v5829_v21 = vpop.f32.mrf.mxu0 }
 0x1ae   : > { %6079 = vst [vmem:[#allocation6_spill] sm:$0xff] %v5827_v23  ;;  %v2217_v16 = vadd.f32 %v4178_v53, %v2216_v63 }
 0x1af   : > { %v4180_v52 = vpop.f32.mrf.mxu1  ;;  %v5831_v1 = vpop.f32.mrf.mxu0 }
 0x1b0   : > { %v4181_v35 = vadd.f32 %v4180_v52, %v4179_v43  ;;  %v5834_v48 = vadd.f32 %v2217_v16, %v5714_v9 }
 0x1b1   : > { %v4182_v32 = vpop.f32.mrf.mxu1  ;;  %v5837_v40 = vpop.f32.mrf.mxu0 }
 0x1b2   : > { %6080 = vst [vmem:[#allocation7_spill] sm:$0xff] %v5834_v48  ;;  %v2222_v56 = vadd.f32 %v5756_v13, %v4181_v35 }
 0x1b3   : > { %v4183_v8 = vpop.f32.mrf.mxu1  ;;  %v5839_v38 = vpop.f32.mrf.mxu0 }
 0x1b4   : > { %v4184_v58 = vadd.f32 %v4183_v8, %v4182_v32  ;;  %v5842_v63 = vadd.f32 %v2222_v56, %v5717_v2 }
 0x1b5   : > { %v4185_v31 = vpop.f32.mrf.mxu1  ;;  %v5845_v23 = vpop.f32.mrf.mxu0 }
 0x1b6   : > { %6081 = vst [vmem:[#allocation8_spill] sm:$0xff] %v5842_v63  ;;  %v2225_v53 = vadd.f32 %v5761_v11, %v4184_v58 }
 0x1b7   : > { %v4186_v52 = vpop.f32.mrf.mxu1  ;;  %v5847_v9 = vpop.f32.mrf.mxu0 }
 0x1b8   : > { %v4187_v43 = vadd.f32 %v4186_v52, %v4185_v31  ;;  %v5850_v13 = vadd.f32 %v2225_v53, %v5720_v59 }
 0x1b9   : > { %v4188_v16 = vpop.f32.mrf.mxu1  ;;  %v5853_v48 = vpop.f32.mrf.mxu0 }
 0x1ba   : > { %6082 = vst [vmem:[#allocation9_spill] sm:$0xff] %v5850_v13  ;;  %v2230_v35 = vadd.f32 %v4187_v43, %v5771_v44 }
 0x1bb   : > { %v4189_v32 = vpop.f32.mrf.mxu1  ;;  %v5855_v2 = vpop.f32.mrf.mxu0 }
 0x1bc   : > { %v4190_v56 = vadd.f32 %v4189_v32, %v4188_v16  ;;  %v5858_v11 = vadd.f32 %v2230_v35, %v5684_v39 }
 0x1bd   : > { %v4191_v8 = vpop.f32.mrf.mxu1  ;;  %v5861_v63 = vpop.f32.mrf.mxu0 }
 0x1be   : > { %6083 = vst [vmem:[#allocation10_spill] sm:$0xff] %v5858_v11  ;;  %v2233_v58 = vadd.f32 %v4190_v56, %v5778_v33 }
 0x1bf   : > { %v4192_v31 = vpop.f32.mrf.mxu1  ;;  %v5863_v59 = vpop.f32.mrf.mxu0 }
 0x1c0   : > { %v4193_v53 = vadd.f32 %v4192_v31, %v4191_v8  ;;  %v5866_v44 = vadd.f32 %v2233_v58, %v5695_v20 }
 0x1c1   : > { %v4194_v52 = vpop.f32.mrf.mxu1  ;;  %v5869_v13 = vpop.f32.mrf.mxu0 }
 0x1c2   : > { %6084 = vst [vmem:[#allocation11_spill] sm:$0xff] %v5866_v44  ;;  %v2238_v43 = vadd.f32 %v5766_v36, %v4193_v53 }
 0x1c3   : > { %v4195_v16 = vpop.f32.mrf.mxu1  ;;  %v5871_v39 = vpop.f32.mrf.mxu0 }
 0x1c4   : > { %v4196_v35 = vadd.f32 %v4195_v16, %v4194_v52  ;;  %v5874_v33 = vadd.f32 %v2238_v43, %v5681_v49 }
 0x1c5   : > { %v4197_v32 = vpop.f32.mrf.mxu1  ;;  %v5877_v11 = vpop.f32.mrf.mxu0 }
 0x1c6   : > { %6085 = vst [vmem:[#allocation12_spill] sm:$0xff] %v5874_v33  ;;  %v2241_v56 = vadd.f32 %v5773_v3, %v4196_v35 }
 0x1c7   : > { %v4198_v8 = vpop.f32.mrf.mxu1  ;;  %v5879_v20 = vpop.f32.mrf.mxu0 }
 0x1c8   : > { %v4199_v58 = vadd.f32 %v4198_v8, %v4197_v32  ;;  %v5882_v36 = vadd.f32 %v2241_v56, %v5689_v27 }
 0x1c9   : > { %v4200_v31 = vpop.f32.mrf.mxu1  ;;  %v5885_v44 = vpop.f32.mrf.mxu0 }
 0x1ca   : > { %6086 = vst [vmem:[#allocation13_spill] sm:$0xff] %v5882_v36  ;;  %v2246_v53 = vadd.f32 %v4199_v58, %v5785_v14 }
 0x1cb   : > { %v4201_v52 = vpop.f32.mrf.mxu1  ;;  %v5887_v49 = vpop.f32.mrf.mxu0 }
 0x1cc   : > { %v4202_v43 = vadd.f32 %v4201_v52, %v4200_v31  ;;  %v5890_v3 = vadd.f32 %v2246_v53, %v5703_v41 }
 0x1cd   : > { %v4203_v16 = vpop.f32.mrf.mxu1  ;;  %v5893_v33 = vpop.f32.mrf.mxu0 }
 0x1ce   : > { %v2249_v35 = vadd.f32 %v4202_v43, %v5792_v15  ;;  %v4251_v43 = vadd.f32 %v5799_v55, %v5794_v30  ;;  %v4254_v55 = vadd.f32 %v5807_v12, %v5801_v57 }
 0x1cf   : > { %v4204_v32 = vpop.f32.mrf.mxu1  ;;  %v5895_v27 = vpop.f32.mrf.mxu0 }
 0x1d0   : > { %v4205_v56 = vadd.f32 %v4204_v32, %v4203_v16  ;;  %v5898_v14 = vadd.f32 %v2249_v35, %v5712_v45  ;;  %v4257_v45 = vadd.f32 %v5815_v24, %v5809_v60  ;;  %v4260_v32 = vadd.f32 %v5822_v54, %v5817_v6 }
 0x1d1   : > { %v4206_v8 = vpop.f32.mrf.mxu1  ;;  %v5901_v36 = vpop.f32.mrf.mxu0 }
 0x1d2   : > { %v2254_v58 = vadd.f32 %v5780_v61, %v4205_v56 }
 0x1d3   : > { %v4207_v31 = vpop.f32.mrf.mxu1  ;;  %v5906_v53 = vpop.f32.mrf.mxu0 }
 0x1d4   : > { %v5904_v41 = vadd.f32 %v2254_v58, %v5700_v18  ;;  %v4208_v15 = vadd.f32 %v4207_v31, %v4206_v8 }
 0x1d5   : > { %v4483_v52 = vpop.f32.mrf.mxu1  ;;  %v5913_v35 = vpop.f32.mrf.mxu0 }
 0x1d6   : > { %v2257_v16 = vadd.f32 %v5787_v46, %v4208_v15  ;;  %v2784_v8 = vadd.f32 %v4483_v52, %v4257_v45  ;;  %v4269_v52 = vadd.f32 %v5845_v23, %v5839_v38  ;;  %v4272_v23 = vadd.f32 %v5853_v48, %v5847_v9 }
 0x1d7   : > { %v2775_v61 = vpop.f32.mrf.mxu1  ;;  %v5920_v56 = vpop.f32.mrf.mxu0 }
 0x1d8   : > { %v5918_v18 = vadd.f32 %v2257_v16, %v5708_v62  ;;  %v2776_v58 = vadd.f32 %v4251_v43, %v2775_v61  ;;  %v2936_v31 = vadd.f32 %v2784_v8, %v5726_v50 }
 0x1d9   : > { %v4484_v30 = vpop.f32.mrf.mxu1  ;;  %v5924_v60 = vpop.f32.mrf.mxu0 }
 0x1da   : > { %v2787_v46 = vadd.f32 %v4484_v30, %v4260_v32  ;;  %v2934_v54 = vadd.f32 %v2776_v58, %v5723_v17  ;;  %v4266_v58 = vadd.f32 %v5837_v40, %v5831_v1 }
 0x1db   : > { %v2778_v24 = vpop.f32.mrf.mxu1  ;;  %v5928_v6 = vpop.f32.mrf.mxu0 }
 0x1dc   : > { %v2937_v62 = vadd.f32 %v2787_v46, %v5732_v4  ;;  %v2779_v15 = vadd.f32 %v4254_v55, %v2778_v24  ;;  %v4263_v4 = vadd.f32 %v5829_v21, %v5824_v7  ;;  %v3067_v45 = vmul.f32 %v2934_v54, %v2934_v54 }
 0x1dd   : > { %v4487_v57 = vpop.f32.mrf.mxu1  ;;  %v5940_v50 = vpop.f32.mrf.mxu0  ;;  %v3069_v55 = vmul.f32 %v2936_v31, %v2936_v31 }
 0x1de   : > { %v3857_v12 = vpack.c.bf16 %v2937_v62, %v2936_v31  ;;  %v2935_v17 = vadd.f32 %v2779_v15, %v5729_v5  ;;  %v2800_v38 = vadd.f32 %v4487_v57, %v4269_v52  ;;  %v3070_v9 = vmul.f32 %v2937_v62, %v2937_v62 }
 0x1df   : > { %v2791_v43 = vpop.f32.mrf.mxu1  ;;  %v5948_v8 = vpop.f32.mrf.mxu0 }
 0x1e0   : > { %3946 = vst [vmem:[%s5938_s14 + $0x8] sm:$0xff] %v3857_v12   ;;  %v3030_v16 = vadd.f32 %v2935_v17, %v2934_v54  ;;  %v3068_v61 = vmul.f32 %v2935_v17, %v2935_v17  ;;  %v3852_v32 = vpack.c.bf16 %v2935_v17, %v2934_v54  ;;  %v2792_v5 = vadd.f32 %v4263_v4, %v2791_v43 }
 0x1e1   : > { %v4488_v30 = vpop.f32.mrf.mxu1  ;;  %v5953_v46 = vpop.f32.mrf.mxu0  ;;  %v2940_v24 = vadd.f32 %v2800_v38, %v5741_v28  ;;  %v4281_v17 = vadd.f32 %v5877_v11, %v5871_v39 }
 0x1e2   : > { %v3031_v21 = vadd.f32 %v3030_v16, %v2936_v31  ;;  %v3099_v7 = vadd.f32 %v3068_v61, %v3067_v45  ;;  %3853 = vst [vmem:[%s5938_s14] sm:$0xff] %v3852_v32   ;;  %v2803_v48 = vadd.f32 %v4488_v30, %v4272_v23  ;;  %v2938_v15 = vadd.f32 %v2792_v5, %v5735_v0 }
 0x1e3   : > { %v2794_v54 = vpop.f32.mrf.mxu1  ;;  %v5957_v12 = vpop.f32.mrf.mxu0  ;;  %v4275_v31 = vadd.f32 %v5861_v63, %v5855_v2  ;;  %v4278_v5 = vadd.f32 %v5869_v13, %v5863_v59 }
 0x1e4   : > { %v3100_v52 = vadd.f32 %v3099_v7, %v3069_v55  ;;  %v3032_v57 = vadd.f32 %v3031_v21, %v2937_v62  ;;  %v2941_v1 = vadd.f32 %v2803_v48, %v5744_v10  ;;  %v2795_v40 = vadd.f32 %v4266_v58, %v2794_v54 }
 0x1e5   : > { %v4491_v4 = vpop.f32.mrf.mxu1  ;;  %v3071_v28 = vmul.f32 %v2938_v15, %v2938_v15  ;;  %v5964_v43 = vpop.f32.mrf.mxu0  ;;  %v4284_v10 = vadd.f32 %v5885_v44, %v5879_v20  ;;  %v3073_v55 = vmul.f32 %v2940_v24, %v2940_v24 }
 0x1e6   : > { %v3033_v23 = vadd.f32 %v3032_v57, %v2938_v15  ;;  %v3101_v38 = vadd.f32 %v3100_v52, %v3070_v9  ;;  %v3867_v0 = vpack.c.bf16 %v2941_v1, %v2940_v24  ;;  %v2939_v62 = vadd.f32 %v2795_v40, %v5738_v29 }
 0x1e7   : > { %v2807_v45 = vpop.f32.mrf.mxu1  ;;  %v5970_v63 = vpop.f32.mrf.mxu0  ;;  %v2816_v2 = vadd.f32 %v4491_v4, %v4281_v17  ;;  %v3074_v52 = vmul.f32 %v2941_v1, %v2941_v1  ;;  %v4293_v40 = vadd.f32 %v5913_v35, %v5906_v53 }
 0x1e8   : > { %v3102_v16 = vadd.f32 %v3101_v38, %v3071_v28  ;;  %3948 = vst [vmem:[%s5938_s14 + $0x18] sm:$0xff] %v3867_v0   ;;  %v2808_v11 = vadd.f32 %v4275_v31, %v2807_v45  ;;  %v3034_v39 = vadd.f32 %v3033_v23, %v2939_v62  ;;  %v3072_v61 = vmul.f32 %v2939_v62, %v2939_v62 }
 0x1e9   : > { %v3862_v32 = vpack.c.bf16 %v2939_v62, %v2938_v15  ;;  %v4492_v58 = vpop.f32.mrf.mxu1  ;;  %v4307_v30 = vpop.f32.mrf.mxu0  ;;  %v2944_v48 = vadd.f32 %v2816_v2, %v5759_v25 }
 0x1ea   : > { %v2819_v29 = vadd.f32 %v4492_v58, %v4284_v10  ;;  %v3035_v21 = vadd.f32 %v3034_v39, %v2940_v24  ;;  %v3103_v7 = vadd.f32 %v3102_v16, %v3072_v61  ;;  %v2942_v44 = vadd.f32 %v2808_v11, %v5749_v47 }
 0x1eb   : > { %3947 = vst [vmem:[%s5938_s14 + $0x10] sm:$0xff] %v3862_v32   ;;  %v2810_v20 = vpop.f32.mrf.mxu1  ;;  %v5977_v9 = vpop.f32.mrf.mxu0  ;;  %v4287_v24 = vadd.f32 %v5893_v33, %v5887_v49 }
 0x1ec   : > { %v2945_v54 = vadd.f32 %v2819_v29, %v5764_v22  ;;  %v2811_v15 = vadd.f32 %v4278_v5, %v2810_v20  ;;  %v3104_v57 = vadd.f32 %v3103_v7, %v3073_v55  ;;  %v3036_v13 = vadd.f32 %v3035_v21, %v2941_v1 }
 0x1ed   : > { %v4495_v59 = vpop.f32.mrf.mxu1  ;;  %v5984_v31 = vpop.f32.mrf.mxu0  ;;  %v4296_v22 = vadd.f32 %v5924_v60, %v5920_v56  ;;  %v3075_v4 = vmul.f32 %v2942_v44, %v2942_v44  ;;  %v3077_v60 = vmul.f32 %v2944_v48, %v2944_v48  ;;  %v4299_v55 = vadd.f32 %v5940_v50, %v5928_v6 }
 0x1ee   : > { %v3877_v47 = vpack.c.bf16 %v2945_v54, %v2944_v48  ;;  %v2943_v25 = vadd.f32 %v2811_v15, %v5754_v37  ;;  %v3037_v17 = vadd.f32 %v3036_v13, %v2942_v44  ;;  %v3105_v23 = vadd.f32 %v3104_v57, %v3074_v52 }
 0x1ef   : > { %v2823_v1 = vpop.f32.mrf.mxu1  ;;  %v5990_v33 = vpop.f32.mrf.mxu0  ;;  %v2832_v49 = vadd.f32 %v4495_v59, %v4293_v40  ;;  %v4290_v37 = vadd.f32 %v5901_v36, %v5895_v27  ;;  %v3078_v5 = vmul.f32 %v2945_v54, %v2945_v54  ;;  %v4305_v21 = vadd.f32 %v5964_v43, %v5957_v12 }
 0x1f0   : > { %3950 = vst [vmem:[%s5938_s14 + $0x28] sm:$0xff] %v3877_v47   ;;  %v3076_v28 = vmul.f32 %v2943_v25, %v2943_v25  ;;  %v3872_v38 = vpack.c.bf16 %v2943_v25, %v2942_v44  ;;  %v2824_v53 = vadd.f32 %v4287_v24, %v2823_v1  ;;  %v3106_v35 = vadd.f32 %v3105_v23, %v3075_v4  ;;  %v6087_v47 = vld [vmem:[#allocation3_spill] sm:$0xff] }
 0x1f1   : > { %v3038_v0 = vadd.f32 %v3037_v17, %v2943_v25  ;;  %v4496_v62 = vpop.f32.mrf.mxu1  ;;  %v5995_v45 = vpop.f32.mrf.mxu0  ;;  %v2948_v39 = vadd.f32 %v2832_v49, %v5783_v26  ;;  %v4308_v26 = vadd.f32 %v4307_v30, %v5970_v63  ;;  %v4302_v43 = vadd.f32 %v5953_v46, %v5948_v8  ;;  %v6088_v17 = vld [vmem:[#allocation5_spill] sm:$0xff] }
 0x1f2   : > { %3949 = vst [vmem:[%s5938_s14 + $0x20] sm:$0xff] %v3872_v38   ;;  %v2835_v56 = vadd.f32 %v4496_v62, %v4296_v22  ;;  %v3107_v16 = vadd.f32 %v3106_v35, %v3076_v28  ;;  %v2946_v2 = vadd.f32 %v2824_v53, %v5769_v51  ;;  %v4311_v46 = vadd.f32 %v5984_v31, %v5977_v9 }
 0x1f3   : > { %v3039_v10 = vadd.f32 %v3038_v0, %v2944_v48  ;;  %v2826_v11 = vpop.f32.mrf.mxu1  ;;  %v4315_v61 = vpop.f32.mrf.mxu0  ;;  %v3081_v63 = vmul.f32 %v2948_v39, %v2948_v39  ;;  %v4314_v31 = vadd.f32 %v5995_v45, %v5990_v33 }
 0x1f4   : > { %v2949_v32 = vadd.f32 %v2835_v56, %v5790_v34  ;;  %v2827_v58 = vadd.f32 %v4290_v37, %v2826_v11  ;;  %v3108_v29 = vadd.f32 %v3107_v16, %v3077_v60  ;;  %v3079_v20 = vmul.f32 %v2946_v2, %v2946_v2  ;;  %v6089_v37 = vld [vmem:[#allocation4_spill] sm:$0xff] }
 0x1f5   : > { %v3040_v36 = vadd.f32 %v3039_v10, %v2945_v54  ;;  %v4499_v27 = vpop.f32.mrf.mxu1  ;;  %v4316_v51 = vpop.f32.mrf.mxu0 }
 0x1f6   : > { %v3887_v7 = vpack.c.bf16 %v2949_v32, %v2948_v39  ;;  %v2947_v44 = vadd.f32 %v2827_v58, %v5776_v42  ;;  %v3109_v48 = vadd.f32 %v3108_v29, %v3078_v5  ;;  %v2848_v13 = vadd.f32 %v4499_v27, %v4305_v21 }
 0x1f7   : > { %v3041_v34 = vadd.f32 %v3040_v36, %v2946_v2  ;;  %v2839_v15 = vpop.f32.mrf.mxu1  ;;  %v4318_v57 = vpop.f32.mrf.mxu0  ;;  %v3082_v38 = vmul.f32 %v2949_v32, %v2949_v32  ;;  %v4317_v35 = vadd.f32 %v4316_v51, %v4315_v61  ;;  %v6090_v51 = vld [vmem:[#allocation6_spill] sm:$0xff] }
 0x1f8   : > { %3952 = vst [vmem:[%s5938_s14 + $0x38] sm:$0xff] %v3887_v7   ;;  %v3080_v54 = vmul.f32 %v2947_v44, %v2947_v44  ;;  %v3882_v52 = vpack.c.bf16 %v2947_v44, %v2946_v2  ;;  %v2840_v6 = vadd.f32 %v4299_v55, %v2839_v15  ;;  %v3110_v50 = vadd.f32 %v3109_v48, %v3079_v20  ;;  %v6092_v15 = vld [vmem:[#allocation9_spill] sm:$0xff] }
 0x1f9   : > { %v3042_v59 = vadd.f32 %v3041_v34, %v2947_v44  ;;  %v4500_v12 = vpop.f32.mrf.mxu1  ;;  %v4319_v42 = vpop.f32.mrf.mxu0  ;;  %v2952_v4 = vadd.f32 %v2848_v13, %v6088_v17  ;;  %v6091_v34 = vld [vmem:[#allocation8_spill] sm:$0xff] }
 0x1fa   : > { %3951 = vst [vmem:[%s5938_s14 + $0x30] sm:$0xff] %v3882_v52   ;;  %v2851_v24 = vadd.f32 %v4500_v12, %v4308_v26  ;;  %v3111_v40 = vadd.f32 %v3110_v50, %v3080_v54  ;;  %v2950_v25 = vadd.f32 %v2840_v6, %v6087_v47  ;;  %v4320_v60 = vadd.f32 %v4319_v42, %v4318_v57  ;;  %v6093_v12 = vld [vmem:[#allocation7_spill] sm:$0xff] }
 0x1fb   : > { %v3043_v30 = vadd.f32 %v3042_v59, %v2948_v39  ;;  %v2842_v22 = vpop.f32.mrf.mxu1  ;;  %v4321_v23 = vpop.f32.mrf.mxu0  ;;  %v3085_v55 = vmul.f32 %v2952_v4, %v2952_v4 }
 0x1fc   : > { %v2953_v1 = vadd.f32 %v2851_v24, %v5820_v19  ;;  %v2843_v28 = vadd.f32 %v4302_v43, %v2842_v22  ;;  %v3112_v49 = vadd.f32 %v3111_v40, %v3081_v63  ;;  %v3083_v16 = vmul.f32 %v2950_v25, %v2950_v25 }
 0x1fd   : > { %v3044_v53 = vadd.f32 %v3043_v30, %v2949_v32  ;;  %v4503_v8 = vpop.f32.mrf.mxu1  ;;  %v4322_v62 = vpop.f32.mrf.mxu0 }
 0x1fe   : > { %v3897_v0 = vpack.c.bf16 %v2953_v1, %v2952_v4  ;;  %v2951_v56 = vadd.f32 %v2843_v28, %v6089_v37  ;;  %v3113_v2 = vadd.f32 %v3112_v49, %v3082_v38  ;;  %v2864_v32 = vadd.f32 %v4503_v8, %v4317_v35 }
 0x1ff   : > { %v3045_v10 = vadd.f32 %v3044_v53, %v2950_v25  ;;  %v2855_v19 = vpop.f32.mrf.mxu1  ;;  %v4324_v58 = vpop.f32.mrf.mxu0  ;;  %v3086_v57 = vmul.f32 %v2953_v1, %v2953_v1  ;;  %v4323_v45 = vadd.f32 %v4322_v62, %v4321_v23 }
 0x200   : > { %3954 = vst [vmem:[%s5938_s14 + $0x48] sm:$0xff] %v3897_v0   ;;  %v3084_v11 = vmul.f32 %v2951_v56, %v2951_v56  ;;  %v3892_v39 = vpack.c.bf16 %v2951_v56, %v2950_v25  ;;  %v2856_v5 = vadd.f32 %v4311_v46, %v2855_v19  ;;  %v3114_v29 = vadd.f32 %v3113_v2, %v3083_v16  ;;  %v6094_v0 = vld [vmem:[#allocation10_spill] sm:$0xff] }
 0x201   : > { %v3046_v36 = vadd.f32 %v3045_v10, %v2951_v56  ;;  %v4504_v9 = vpop.f32.mrf.mxu1  ;;  %v4325_v61 = vpop.f32.mrf.mxu0  ;;  %v2956_v20 = vadd.f32 %v2864_v32, %v6091_v34 }
 0x202   : > { %3953 = vst [vmem:[%s5938_s14 + $0x40] sm:$0xff] %v3892_v39   ;;  %v2867_v27 = vadd.f32 %v4504_v9, %v4320_v60  ;;  %v3115_v7 = vadd.f32 %v3114_v29, %v3084_v11  ;;  %v2954_v44 = vadd.f32 %v2856_v5, %v6090_v51  ;;  %v4326_v23 = vadd.f32 %v4325_v61, %v4324_v58  ;;  %v6095_v39 = vld [vmem:[#allocation12_spill] sm:$0xff]  ;;  %v6096_v5 = vld [vmem:[#allocation11_spill] sm:$0xff]  ;;  %v6097_v61 = vld [vmem:[#allocation13_spill] sm:$0xff] }
 0x203   : > { %v3047_v21 = vadd.f32 %v3046_v36, %v2952_v4  ;;  %v2858_v26 = vpop.f32.mrf.mxu1  ;;  %v4327_v48 = vpop.f32.mrf.mxu0  ;;  %v3089_v38 = vmul.f32 %v2956_v20, %v2956_v20 }
 0x204   : > { %v2957_v54 = vadd.f32 %v2867_v27, %v6092_v15  ;;  %v2859_v52 = vadd.f32 %v4314_v31, %v2858_v26  ;;  %v3116_v13 = vadd.f32 %v3115_v7, %v3085_v55  ;;  %v3087_v24 = vmul.f32 %v2954_v44, %v2954_v44 }
 0x205   : > { %v3048_v6 = vadd.f32 %v3047_v21, %v2953_v1  ;;  %v4507_v33 = vpop.f32.mrf.mxu1  ;;  %v4328_v59 = vpop.f32.mrf.mxu0 }
 0x206   : > { %v3907_v50 = vpack.c.bf16 %v2957_v54, %v2956_v20  ;;  %v2955_v43 = vadd.f32 %v2859_v52, %v6093_v12  ;;  %v3117_v63 = vadd.f32 %v3116_v13, %v3086_v57  ;;  %v4329_v30 = vadd.f32 %v4328_v59, %v4327_v48 }
 0x207   : > { %v3049_v42 = vadd.f32 %v3048_v6, %v2954_v44  ;;  %v2871_v40 = vpop.f32.mrf.mxu1  ;;  %v4330_v22 = vpop.f32.mrf.mxu0  ;;  %v3090_v10 = vmul.f32 %v2957_v54, %v2957_v54 }
 0x208   : > { %3956 = vst [vmem:[%s5938_s14 + $0x58] sm:$0xff] %v3907_v50   ;;  %v3088_v47 = vmul.f32 %v2955_v43, %v2955_v43  ;;  %v3902_v25 = vpack.c.bf16 %v2955_v43, %v2954_v44  ;;  %v2872_v17 = vadd.f32 %v4323_v45, %v2871_v40  ;;  %v3118_v4 = vadd.f32 %v3117_v63, %v3087_v24 }
 0x209   : > { %v3050_v28 = vadd.f32 %v3049_v42, %v2955_v43  ;;  %v4508_v1 = vpop.f32.mrf.mxu1  ;;  %v2880_v49 = vadd.f32 %v4507_v33, %v4329_v30  ;;  %v4331_v53 = vpop.f32.mrf.mxu0 }
 0x20a   : > { %3955 = vst [vmem:[%s5938_s14 + $0x50] sm:$0xff] %v3902_v25   ;;  %v3119_v46 = vadd.f32 %v3118_v4, %v3088_v47  ;;  %v4332_v35 = vadd.f32 %v4331_v53, %v4330_v22  ;;  %v2958_v62 = vadd.f32 %v2872_v17, %v6094_v0 }
 0x20b   : > { %v3051_v8 = vadd.f32 %v3050_v28, %v2956_v20  ;;  %v2874_v37 = vpop.f32.mrf.mxu1  ;;  %v4333_v56 = vpop.f32.mrf.mxu0  ;;  %v2960_v32 = vadd.f32 %v2880_v49, %v6095_v39 }
 0x20c   : > { %v2875_v60 = vadd.f32 %v4326_v23, %v2874_v37  ;;  %v3120_v16 = vadd.f32 %v3119_v46, %v3089_v38  ;;  %v2883_v19 = vadd.f32 %v4508_v1, %v4332_v35  ;;  %v3091_v9 = vmul.f32 %v2958_v62, %v2958_v62 }
 0x20d   : > { %v3052_v2 = vadd.f32 %v3051_v8, %v2957_v54  ;;  %v4511_v11 = vpop.f32.mrf.mxu1  ;;  %v4334_v58 = vpop.f32.mrf.mxu0  ;;  %v3093_v52 = vmul.f32 %v2960_v32, %v2960_v32 }
 0x20e   : > { %v2959_v29 = vadd.f32 %v2875_v60, %v6096_v5  ;;  %v3121_v31 = vadd.f32 %v3120_v16, %v3090_v10  ;;  %v2961_v27 = vadd.f32 %v2883_v19, %v6097_v61  ;;  %v4335_v21 = vadd.f32 %v4334_v58, %v4333_v56 }
 0x20f   : > { %v3053_v36 = vadd.f32 %v3052_v2, %v2958_v62  ;;  %v2887_v55 = vpop.f32.mrf.mxu1  ;;  %v4336_v44 = vpop.f32.mrf.mxu0 }
 0x210   : > { %v3092_v7 = vmul.f32 %v2959_v29, %v2959_v29  ;;  %v3912_v51 = vpack.c.bf16 %v2959_v29, %v2958_v62  ;;  %v3122_v26 = vadd.f32 %v3121_v31, %v3091_v9  ;;  %v3917_v34 = vpack.c.bf16 %v2961_v27, %v2960_v32 }
 0x211   : > { %v3054_v20 = vadd.f32 %v3053_v36, %v2959_v29  ;;  %v4512_v48 = vpop.f32.mrf.mxu1  ;;  %v4337_v15 = vpop.f32.mrf.mxu0  ;;  %v2888_v54 = vadd.f32 %v4335_v21, %v2887_v55  ;;  %v3094_v59 = vmul.f32 %v2961_v27, %v2961_v27 }
 0x212   : > { %3957 = vst [vmem:[%s5938_s14 + $0x60] sm:$0xff] %v3912_v51   ;;  %3958 = vst [vmem:[%s5938_s14 + $0x68] sm:$0xff] %v3917_v34   ;;  %v3123_v13 = vadd.f32 %v3122_v26, %v3092_v7  ;;  %v4338_v6 = vadd.f32 %v4337_v15, %v4336_v44 }
 0x213   : > { %v3055_v57 = vadd.f32 %v3054_v20, %v2960_v32  ;;  %v2890_v33 = vpop.f32.mrf.mxu1  ;;  %v2962_v45 = vadd.f32 %v2888_v54, %v5890_v3  ;;  %v4339_v50 = vpop.f32.mrf.mxu0 }
 0x214   : > { %v3124_v12 = vadd.f32 %v3123_v13, %v3093_v52  ;;  %v2891_v42 = vadd.f32 %v4338_v6, %v2890_v33 }
 0x215   : > { %v3056_v43 = vadd.f32 %v3055_v57, %v2961_v27  ;;  %v3095_v24 = vmul.f32 %v2962_v45, %v2962_v45  ;;  %v4340_v63 = vpop.f32.mrf.mxu0 }
 0x216   : > { %v3125_v40 = vadd.f32 %v3124_v12, %v3094_v59  ;;  %v4341_v47 = vadd.f32 %v4340_v63, %v4339_v50  ;;  %v2963_v25 = vadd.f32 %v2891_v42, %v5898_v14 }
 0x217   : > { %v3057_v30 = vadd.f32 %v3056_v43, %v2962_v45  ;;  %v4342_v22 = vpop.f32.mrf.mxu0 }
 0x218   : > { %v3126_v17 = vadd.f32 %v3125_v40, %v3095_v24  ;;  %v2896_v4 = vadd.f32 %v4511_v11, %v4341_v47  ;;  %v3096_v1 = vmul.f32 %v2963_v25, %v2963_v25  ;;  %v3922_v38 = vpack.c.bf16 %v2963_v25, %v2962_v45 }
 0x219   : > { %v3058_v28 = vadd.f32 %v3057_v30, %v2963_v25  ;;  %v4343_v3 = vpop.f32.mrf.mxu0 }
 0x21a   : > { %v2964_v23 = vadd.f32 %v2896_v4, %v5904_v41  ;;  %v3127_v49 = vadd.f32 %v3126_v17, %v3096_v1  ;;  %v4344_v53 = vadd.f32 %v4343_v3, %v4342_v22  ;;  %3959 = vst [vmem:[%s5938_s14 + $0x70] sm:$0xff] %v3922_v38  }
 0x21c   : > { %v3097_v8 = vmul.f32 %v2964_v23, %v2964_v23  ;;  %v3059_v46 = vadd.f32 %v3058_v28, %v2964_v23  ;;  %v2899_v35 = vadd.f32 %v4512_v48, %v4344_v53 }
 0x21e   : > { %v3128_v14 = vadd.f32 %v3127_v49, %v3097_v8  ;;  %v2965_v0 = vadd.f32 %v2899_v35, %v5918_v18 }
 0x220   : > { %v3060_v62 = vadd.f32 %v3059_v46, %v2965_v0  ;;  %v3098_v37 = vmul.f32 %v2965_v0, %v2965_v0  ;;  %v3927_v56 = vpack.c.bf16 %v2965_v0, %v2964_v23 }
 0x222   : > { %v3061_v60 = vrot.slane %v3060_v62, 4  ;;  %v3129_v10 = vadd.f32 %v3128_v14, %v3098_v37  ;;  %3960 = vst [vmem:[%s5938_s14 + $0x78] sm:$0xff] %v3927_v56  }
 0x224   : > { %v3062_v16 = vadd.f32 %v3061_v60, %v3060_v62  ;;  %v3130_v41 = vrot.slane %v3129_v10, 4 }
 0x226   : > { %v3063_v2 = vrot.slane %v3062_v16, 2  ;;  %v3131_v19 = vadd.f32 %v3130_v41, %v3129_v10 }
 0x228   : > { %v3064_v11 = vadd.f32 %v3063_v2, %v3062_v16  ;;  %v3132_v39 = vrot.slane %v3131_v19, 2 }
 0x22a   : > { %v3065_v32 = vrot.slane %v3064_v11, 1  ;;  %v3133_v58 = vadd.f32 %v3132_v39, %v3131_v19 }
 0x22c   : > { %v3134_v18 = vrot.slane %v3133_v58, 1  ;;  %v3066_v5 = vadd.f32 %v3065_v32, %v3064_v11 }
 0x22e   : > { %v3135_v29 = vadd.f32 %v3134_v18, %v3133_v58 }
 0x230   : > { %v3137_v36 = vsel %vm896_vm0, %v3066_v5, %v3135_v29 }
 0x231   : > { %3138 = vst [vmem:[%s467_s17] sm:$0x3] %v3137_v36 }
 0x232 PF: > { %s18_s28 = sadd.s32 1, %s4681_s28   ;;  %s6098_s24 = smov %s4673_s26 }
 0x233   : > { %p15_p12 = scmp.ge.s32.totalorder %s18_s28, 10   ;;  %s6099_s25 = smov %s4677_s27 }
 0x234   : > { %s6100_s26 = smov %s6103_s29  ;;  %s6101_s27 = smov %s6107_s30 }
 0x235   :  { %17 = sbr.rel (!%p15_p12) target bundleno = 3 (0x3), region = 94 }

</bundles_post_ra>
